<compile_context>
chip_gen: v7x
topology: tpu7x:2x2x1
jax: 0.10.0
libtpu: 0.0.40
codegen_flags: <defaults>
</compile_context>

<pallas_src>
import jax
import jax.numpy as jnp
from jax.experimental import pallas as pl
from jax.experimental.pallas import tpu as pltpu

SUBLANE = 8


def _round_up(x, m):
    return (x + m - 1) // m * m


# ------------------------------ fused kernel --------------------------------

def _make_stack_kernel(num_gru_layers: int, T: int, B_pad: int):
    """Fused GRU-stack + TimeDistributed(Linear) kernel.

    Ref layout (all VMEM, gridless single invocation):
      inputs : x (T*B_pad, F_in) f32,
               per GRU layer: wi (Din,3H) bf16, wh (H,3H) bf16,
                              bi (1,3H) f32, bhn (1,H) f32,
               lin_w (H_last, F_out) bf16, lin_b (1, F_out) f32
      output : out (T*B_pad, F_out) f32
      scratch: per GRU layer y_l (T*B_pad, H_l) f32   (per-step output slabs)
    Rows are time-major: row index = t * B_pad + b, with B_pad a multiple of 8
    so every per-step row slice is sublane-aligned.
    """
    n_in = 1 + 4 * num_gru_layers + 2

    def kernel(*refs):
        x_ref = refs[0]
        layer_refs = refs[1:1 + 4 * num_gru_layers]
        lin_w_ref = refs[1 + 4 * num_gru_layers]
        lin_b_ref = refs[2 + 4 * num_gru_layers]
        out_ref = refs[n_in]
        y_scratch = refs[n_in + 1:]

        for li in range(num_gru_layers):
            wi_ref, wh_ref, bi_ref, bhn_ref = layer_refs[4 * li:4 * li + 4]
            H = wh_ref.shape[0]

            # Layer input: padded model input for layer 0, otherwise the previous
            # layer's scratch slab (already sublane/lane dense in VMEM).
            y_in = x_ref[...] if li == 0 else y_scratch[li - 1][...]

            # Hoisted input projection for the whole sequence: one wide bf16 MXU
            # matmul; bi already folds b_ih (all gates) + b_hh (r,z gates).
            gi = jnp.dot(y_in.astype(jnp.bfloat16), wi_ref[...],
                         preferred_element_type=jnp.float32) + bi_ref[...]

            wh = wh_ref[...]                                   # (H, 3H) bf16
            # Hoist the n-gate hidden-bias broadcast out of the recurrence
            # (JAX does not CSE broadcast_in_dim).
            bhn = jnp.broadcast_to(bhn_ref[...], (B_pad, H))

            out_sl = y_scratch[li]
            h = jnp.zeros((B_pad, H), jnp.float32)
            for t in range(T):                                 # fully unrolled (T static)
                gh = jnp.dot(h.astype(jnp.bfloat16), wh,
                             preferred_element_type=jnp.float32)   # (B_pad, 3H) f32
                gi_t = gi[t * B_pad:(t + 1) * B_pad, :]        # sublane-aligned slice
                rz = jax.nn.sigmoid(gi_t[:, :2 * H] + gh[:, :2 * H])
                r = rz[:, :H]
                z = rz[:, H:]
                n = jnp.tanh(gi_t[:, 2 * H:] + r * (gh[:, 2 * H:] + bhn))
                h = (1.0 - z) * n + z * h
                out_sl[t * B_pad:(t + 1) * B_pad, :] = h       # tile-aligned store

        # TimeDistributed(Linear): one (T*B_pad, H_last) x (H_last, F) matmul.
        y_last = y_scratch[num_gru_layers - 1][...]
        out_ref[...] = (jnp.dot(y_last.astype(jnp.bfloat16), lin_w_ref[...],
                                preferred_element_type=jnp.float32)
                        + lin_b_ref[...])

    return kernel


# ----------------------- one-time parameter packing --------------------------

def _pack_gru_layer(p):
    """Fuse PyTorch GRU params into (Din,3H)/(H,3H) bf16 weights + folded f32 biases."""
    w_ih, w_hh, b_ih, b_hh = p["w_ih"], p["w_hh"], p["b_ih"], p["b_hh"]
    H = w_hh.shape[1]
    wi = jnp.transpose(w_ih).astype(jnp.bfloat16)              # (Din, 3H), cols [r|z|n]
    wh = jnp.transpose(w_hh).astype(jnp.bfloat16)              # (H, 3H)
    bi3 = b_ih.reshape(3, H)
    bh3 = b_hh.reshape(3, H)
    bi = jnp.concatenate([bi3[0] + bh3[0], bi3[1] + bh3[1], bi3[2]]
                         ).reshape(1, 3 * H).astype(jnp.float32)
    bhn = bh3[2].reshape(1, H).astype(jnp.float32)
    return wi, wh, bi, bhn


def pack_params(params):
    """Run once at parameter-load time (keeps repack work out of the per-call path)."""
    layers = list(params["encoder"]) + list(params["decoder"])
    return {
        "layers": [_pack_gru_layer(p) for p in layers],
        "lin_w": jnp.transpose(params["linear"]["w"]).astype(jnp.bfloat16),
        "lin_b": params["linear"]["b"].reshape(1, -1).astype(jnp.float32),
    }


# ------------------------------ wrapper --------------------------------------

def lstm_simple_forward(packed, x):
    """x: (B, T, n_features) batch-first, matching nn.GRU(batch_first=True)."""
    B, T, F = x.shape
    B_pad = _round_up(max(B, 1), SUBLANE)
    layers = packed["layers"]
    num_gru_layers = len(layers)
    hiddens = [wh.shape[0] for (_, wh, _, _) in layers]

    # Time-major + sublane-pad the batch: padded rows are zero-input / zero-state
    # GRUs and never touch real rows; sliced away at the end.
    xt = jnp.transpose(x, (1, 0, 2))                           # (T, B, F)
    xt = jnp.pad(xt, ((0, 0), (0, B_pad - B), (0, 0)))
    xt = xt.reshape(T * B_pad, F)

    flat_inputs = [xt]
    for lw in layers:
        flat_inputs.extend(lw)
    flat_inputs.extend([packed["lin_w"], packed["lin_b"]])

    vmem = pl.BlockSpec(memory_space=pltpu.MemorySpace.VMEM)
    out2 = pl.pallas_call(
        _make_stack_kernel(num_gru_layers, T, B_pad),
        out_shape=jax.ShapeDtypeStruct((T * B_pad, F), jnp.float32),
        in_specs=[vmem] * len(flat_inputs),
        out_specs=vmem,
        scratch_shapes=[pltpu.VMEM((T * B_pad, h), jnp.float32) for h in hiddens],
    )(*flat_inputs)

    out = out2.reshape(T, B_pad, F)[:, :B, :]
    return jnp.transpose(out, (1, 0, 2))                       # back to (B, T, F)


# ----------------------------- parameter setup ------------------------------

def init_gru_params(key, in_dim, hidden):
    k = 1.0 / float(hidden) ** 0.5
    ks = jax.random.split(key, 4)
    return dict(
        w_ih=jax.random.uniform(ks[0], (3 * hidden, in_dim), jnp.float32, -k, k),
        w_hh=jax.random.uniform(ks[1], (3 * hidden, hidden), jnp.float32, -k, k),
        b_ih=jax.random.uniform(ks[2], (3 * hidden,), jnp.float32, -k, k),
        b_hh=jax.random.uniform(ks[3], (3 * hidden,), jnp.float32, -k, k),
    )


def init_linear_params(key, in_dim, out_dim):
    k = 1.0 / float(in_dim) ** 0.5
    k1, k2 = jax.random.split(key)
    return dict(
        w=jax.random.uniform(k1, (out_dim, in_dim), jnp.float32, -k, k),
        b=jax.random.uniform(k2, (out_dim,), jnp.float32, -k, k),
    )


def build_lstm_simple_params(key, n_features, hidden_layer_list):
    hiddens = list(hidden_layer_list)
    params = {"encoder": [], "decoder": []}
    in_dim = n_features
    for h in hiddens:                        # encoder GRU stack
        key, sub = jax.random.split(key)
        params["encoder"].append(init_gru_params(sub, in_dim, h))
        in_dim = h
    rev = list(reversed(hiddens))            # self.hiddens.reverse()
    in_dim = rev[0]
    for h in rev:                            # decoder GRU stack
        key, sub = jax.random.split(key)
        params["decoder"].append(init_gru_params(sub, in_dim, h))
        in_dim = h
    key, sub = jax.random.split(key)
    params["linear"] = init_linear_params(sub, rev[-1], n_features)
    return params


# ----------------------------- pure-JAX reference ---------------------------

def _gru_ref(p, x):
    B, T, _ = x.shape
    H = p["w_hh"].shape[1]
    h = jnp.zeros((B, H), jnp.float32)
    outs = []
    for t in range(T):
        gi = x[:, t] @ p["w_ih"].T + p["b_ih"]
        gh = h @ p["w_hh"].T + p["b_hh"]
        r = jax.nn.sigmoid(gi[:, :H] + gh[:, :H])
        z = jax.nn.sigmoid(gi[:, H:2 * H] + gh[:, H:2 * H])
        n = jnp.tanh(gi[:, 2 * H:] + r * gh[:, 2 * H:])
        h = (1.0 - z) * n + z * h
        outs.append(h)
    return jnp.stack(outs, axis=1)


def lstm_simple_ref(params, x):
    y = x
    for p in params["encoder"]:
        y = _gru_ref(p, y)
    for p in params["decoder"]:
        y = _gru_ref(p, y)
    return y @ params["linear"]["w"].T + params["linear"]["b"]


if __name__ == "__main__":
    seq_len, n_features = 8, 4
    hidden_layer_list = [32, 16]
    batch = 2

    key = jax.random.PRNGKey(0)
    kx, kp = jax.random.split(key)
    x = jax.random.normal(kx, (batch, seq_len, n_features), jnp.float32)
    params = build_lstm_simple_params(kp, n_features, hidden_layer_list)

    packed = pack_params(params)             # one-time weight repack (not per-call)
    out = jax.jit(lstm_simple_forward)(packed, x)
    jax.block_until_ready(out)
    assert out.shape == (batch, seq_len, n_features), out.shape

    ref = lstm_simple_ref(params, x)
    max_err = float(jnp.max(jnp.abs(out - ref)))
    # bf16 MXU operands with f32 accumulation over a T=8, 4-layer recurrence:
    # relaxed tolerance vs the f32 reference.
    assert max_err < 1e-1, f"max abs err vs f32 reference: {max_err}"
    print("KERNEL_OK")
</pallas_src>

<mosaic_0001>
module attributes {stable_mosaic.version = 11 : i64} {
  func.func @kernel(%arg0: memref<64x4xf32, #tpu.memory_space<vmem>>, %arg1: memref<4x96xbf16, #tpu.memory_space<vmem>>, %arg2: memref<32x96xbf16, #tpu.memory_space<vmem>>, %arg3: memref<1x96xf32, #tpu.memory_space<vmem>>, %arg4: memref<1x32xf32, #tpu.memory_space<vmem>>, %arg5: memref<32x48xbf16, #tpu.memory_space<vmem>>, %arg6: memref<16x48xbf16, #tpu.memory_space<vmem>>, %arg7: memref<1x48xf32, #tpu.memory_space<vmem>>, %arg8: memref<1x16xf32, #tpu.memory_space<vmem>>, %arg9: memref<16x48xbf16, #tpu.memory_space<vmem>>, %arg10: memref<16x48xbf16, #tpu.memory_space<vmem>>, %arg11: memref<1x48xf32, #tpu.memory_space<vmem>>, %arg12: memref<1x16xf32, #tpu.memory_space<vmem>>, %arg13: memref<16x96xbf16, #tpu.memory_space<vmem>>, %arg14: memref<32x96xbf16, #tpu.memory_space<vmem>>, %arg15: memref<1x96xf32, #tpu.memory_space<vmem>>, %arg16: memref<1x32xf32, #tpu.memory_space<vmem>>, %arg17: memref<32x4xbf16, #tpu.memory_space<vmem>>, %arg18: memref<1x4xf32, #tpu.memory_space<vmem>>, %arg19: memref<64x4xf32, #tpu.memory_space<vmem>>, %arg20: memref<64x32xf32, #tpu.memory_space<vmem>>, %arg21: memref<64x16xf32, #tpu.memory_space<vmem>>, %arg22: memref<64x16xf32, #tpu.memory_space<vmem>>, %arg23: memref<64x32xf32, #tpu.memory_space<vmem>>) attributes {dimension_semantics = [], scalar_prefetch = 0 : i64, scratch_operands = 4 : i64, tpu.core_type = #tpu.core_type<tc>} {
    %c0 = arith.constant 0 : index
    %c0_0 = arith.constant 0 : index
    %0 = vector.load %arg0[%c0, %c0_0] : memref<64x4xf32, #tpu.memory_space<vmem>>, vector<64x4xf32>
    %1 = arith.truncf %0 : vector<64x4xf32> to vector<64x4xbf16>
    %c0_1 = arith.constant 0 : index
    %c0_2 = arith.constant 0 : index
    %2 = vector.load %arg1[%c0_1, %c0_2] : memref<4x96xbf16, #tpu.memory_space<vmem>>, vector<4x96xbf16>
    %cst = arith.constant dense<0.000000e+00> : vector<64x96xf32>
    %3 = tpu.matmul %1, %2, %cst {dimension_numbers = #tpu.dot_dimension_numbers<[1], [0], [0], [1], [0, 0, 1, 1], [], []>} : vector<64x4xbf16>, vector<4x96xbf16>, vector<64x96xf32> -> vector<64x96xf32>
    %c0_3 = arith.constant 0 : index
    %c0_4 = arith.constant 0 : index
    %4 = vector.load %arg3[%c0_3, %c0_4] : memref<1x96xf32, #tpu.memory_space<vmem>>, vector<1x96xf32>
    %5 = vector.broadcast %4 : vector<1x96xf32> to vector<64x96xf32>
    %6 = arith.addf %3, %5 : vector<64x96xf32>
    %c0_5 = arith.constant 0 : index
    %c0_6 = arith.constant 0 : index
    %7 = vector.load %arg2[%c0_5, %c0_6] : memref<32x96xbf16, #tpu.memory_space<vmem>>, vector<32x96xbf16>
    %c0_7 = arith.constant 0 : index
    %c0_8 = arith.constant 0 : index
    %8 = vector.load %arg4[%c0_7, %c0_8] : memref<1x32xf32, #tpu.memory_space<vmem>>, vector<1x32xf32>
    %9 = vector.shape_cast %8 : vector<1x32xf32> to vector<1x32xf32>
    %10 = vector.broadcast %9 : vector<1x32xf32> to vector<8x32xf32>
    %cst_9 = arith.constant 0.000000e+00 : f32
    %11 = vector.broadcast %cst_9 : f32 to vector<8x32xf32>
    %12 = arith.truncf %11 : vector<8x32xf32> to vector<8x32xbf16>
    %cst_10 = arith.constant dense<0.000000e+00> : vector<8x96xf32>
    %13 = tpu.matmul %12, %7, %cst_10 {dimension_numbers = #tpu.dot_dimension_numbers<[1], [0], [0], [1], [0, 0, 1, 1], [], []>} : vector<8x32xbf16>, vector<32x96xbf16>, vector<8x96xf32> -> vector<8x96xf32>
    %14 = vector.extract_strided_slice %6 {offsets = [0, 0], sizes = [8, 96], strides = [1, 1]} : vector<64x96xf32> to vector<8x96xf32>
    %15 = vector.extract_strided_slice %14 {offsets = [0, 0], sizes = [8, 64], strides = [1, 1]} : vector<8x96xf32> to vector<8x64xf32>
    %16 = vector.extract_strided_slice %13 {offsets = [0, 0], sizes = [8, 64], strides = [1, 1]} : vector<8x96xf32> to vector<8x64xf32>
    %17 = arith.addf %15, %16 : vector<8x64xf32>
    %18 = arith.negf %17 : vector<8x64xf32>
    %19 = math.exp %18 : vector<8x64xf32>
    %cst_11 = arith.constant 1.000000e+00 : f32
    %20 = vector.broadcast %cst_11 : f32 to vector<8x64xf32>
    %21 = arith.addf %20, %19 : vector<8x64xf32>
    %22 = arith.divf %20, %21 : vector<8x64xf32>
    %23 = vector.extract_strided_slice %22 {offsets = [0, 0], sizes = [8, 32], strides = [1, 1]} : vector<8x64xf32> to vector<8x32xf32>
    %24 = vector.extract_strided_slice %22 {offsets = [0, 32], sizes = [8, 32], strides = [1, 1]} : vector<8x64xf32> to vector<8x32xf32>
    %25 = vector.extract_strided_slice %14 {offsets = [0, 64], sizes = [8, 32], strides = [1, 1]} : vector<8x96xf32> to vector<8x32xf32>
    %26 = vector.extract_strided_slice %13 {offsets = [0, 64], sizes = [8, 32], strides = [1, 1]} : vector<8x96xf32> to vector<8x32xf32>
    %27 = arith.addf %26, %10 : vector<8x32xf32>
    %28 = arith.mulf %23, %27 : vector<8x32xf32>
    %29 = arith.addf %25, %28 : vector<8x32xf32>
    %30 = math.tanh %29 : vector<8x32xf32>
    %cst_12 = arith.constant 1.000000e+00 : f32
    %31 = vector.broadcast %cst_12 : f32 to vector<8x32xf32>
    %32 = arith.subf %31, %24 : vector<8x32xf32>
    %33 = arith.mulf %32, %30 : vector<8x32xf32>
    %34 = arith.mulf %24, %11 : vector<8x32xf32>
    %35 = arith.addf %33, %34 : vector<8x32xf32>
    %c0_13 = arith.constant 0 : index
    %c0_14 = arith.constant 0 : index
    %36 = vector.load %arg20[%c0_13, %c0_14] : memref<64x32xf32, #tpu.memory_space<vmem>>, vector<8x32xf32>
    tpu.vector_store %arg20[%c0_13, %c0_14], %35 {strides = array<i32>} : memref<64x32xf32, #tpu.memory_space<vmem>>, vector<8x32xf32>,
    %37 = arith.truncf %35 : vector<8x32xf32> to vector<8x32xbf16>
    %cst_15 = arith.constant dense<0.000000e+00> : vector<8x96xf32>
    %38 = tpu.matmul %37, %7, %cst_15 {dimension_numbers = #tpu.dot_dimension_numbers<[1], [0], [0], [1], [0, 0, 1, 1], [], []>} : vector<8x32xbf16>, vector<32x96xbf16>, vector<8x96xf32> -> vector<8x96xf32>
    %39 = vector.extract_strided_slice %6 {offsets = [8, 0], sizes = [8, 96], strides = [1, 1]} : vector<64x96xf32> to vector<8x96xf32>
    %40 = vector.extract_strided_slice %39 {offsets = [0, 0], sizes = [8, 64], strides = [1, 1]} : vector<8x96xf32> to vector<8x64xf32>
    %41 = vector.extract_strided_slice %38 {offsets = [0, 0], sizes = [8, 64], strides = [1, 1]} : vector<8x96xf32> to vector<8x64xf32>
    %42 = arith.addf %40, %41 : vector<8x64xf32>
    %43 = arith.negf %42 : vector<8x64xf32>
    %44 = math.exp %43 : vector<8x64xf32>
    %cst_16 = arith.constant 1.000000e+00 : f32
    %45 = vector.broadcast %cst_16 : f32 to vector<8x64xf32>
    %46 = arith.addf %45, %44 : vector<8x64xf32>
    %47 = arith.divf %45, %46 : vector<8x64xf32>
    %48 = vector.extract_strided_slice %47 {offsets = [0, 0], sizes = [8, 32], strides = [1, 1]} : vector<8x64xf32> to vector<8x32xf32>
    %49 = vector.extract_strided_slice %47 {offsets = [0, 32], sizes = [8, 32], strides = [1, 1]} : vector<8x64xf32> to vector<8x32xf32>
    %50 = vector.extract_strided_slice %39 {offsets = [0, 64], sizes = [8, 32], strides = [1, 1]} : vector<8x96xf32> to vector<8x32xf32>
    %51 = vector.extract_strided_slice %38 {offsets = [0, 64], sizes = [8, 32], strides = [1, 1]} : vector<8x96xf32> to vector<8x32xf32>
    %52 = arith.addf %51, %10 : vector<8x32xf32>
    %53 = arith.mulf %48, %52 : vector<8x32xf32>
    %54 = arith.addf %50, %53 : vector<8x32xf32>
    %55 = math.tanh %54 : vector<8x32xf32>
    %cst_17 = arith.constant 1.000000e+00 : f32
    %56 = vector.broadcast %cst_17 : f32 to vector<8x32xf32>
    %57 = arith.subf %56, %49 : vector<8x32xf32>
    %58 = arith.mulf %57, %55 : vector<8x32xf32>
    %59 = arith.mulf %49, %35 : vector<8x32xf32>
    %60 = arith.addf %58, %59 : vector<8x32xf32>
    %c8 = arith.constant 8 : index
    %c0_18 = arith.constant 0 : index
    %61 = vector.load %arg20[%c8, %c0_18] : memref<64x32xf32, #tpu.memory_space<vmem>>, vector<8x32xf32>
    tpu.vector_store %arg20[%c8, %c0_18], %60 {strides = array<i32>} : memref<64x32xf32, #tpu.memory_space<vmem>>, vector<8x32xf32>,
    %62 = arith.truncf %60 : vector<8x32xf32> to vector<8x32xbf16>
    %cst_19 = arith.constant dense<0.000000e+00> : vector<8x96xf32>
    %63 = tpu.matmul %62, %7, %cst_19 {dimension_numbers = #tpu.dot_dimension_numbers<[1], [0], [0], [1], [0, 0, 1, 1], [], []>} : vector<8x32xbf16>, vector<32x96xbf16>, vector<8x96xf32> -> vector<8x96xf32>
    %64 = vector.extract_strided_slice %6 {offsets = [16, 0], sizes = [8, 96], strides = [1, 1]} : vector<64x96xf32> to vector<8x96xf32>
    %65 = vector.extract_strided_slice %64 {offsets = [0, 0], sizes = [8, 64], strides = [1, 1]} : vector<8x96xf32> to vector<8x64xf32>
    %66 = vector.extract_strided_slice %63 {offsets = [0, 0], sizes = [8, 64], strides = [1, 1]} : vector<8x96xf32> to vector<8x64xf32>
    %67 = arith.addf %65, %66 : vector<8x64xf32>
    %68 = arith.negf %67 : vector<8x64xf32>
    %69 = math.exp %68 : vector<8x64xf32>
    %cst_20 = arith.constant 1.000000e+00 : f32
    %70 = vector.broadcast %cst_20 : f32 to vector<8x64xf32>
    %71 = arith.addf %70, %69 : vector<8x64xf32>
    %72 = arith.divf %70, %71 : vector<8x64xf32>
    %73 = vector.extract_strided_slice %72 {offsets = [0, 0], sizes = [8, 32], strides = [1, 1]} : vector<8x64xf32> to vector<8x32xf32>
    %74 = vector.extract_strided_slice %72 {offsets = [0, 32], sizes = [8, 32], strides = [1, 1]} : vector<8x64xf32> to vector<8x32xf32>
    %75 = vector.extract_strided_slice %64 {offsets = [0, 64], sizes = [8, 32], strides = [1, 1]} : vector<8x96xf32> to vector<8x32xf32>
    %76 = vector.extract_strided_slice %63 {offsets = [0, 64], sizes = [8, 32], strides = [1, 1]} : vector<8x96xf32> to vector<8x32xf32>
    %77 = arith.addf %76, %10 : vector<8x32xf32>
    %78 = arith.mulf %73, %77 : vector<8x32xf32>
    %79 = arith.addf %75, %78 : vector<8x32xf32>
    %80 = math.tanh %79 : vector<8x32xf32>
    %cst_21 = arith.constant 1.000000e+00 : f32
    %81 = vector.broadcast %cst_21 : f32 to vector<8x32xf32>
    %82 = arith.subf %81, %74 : vector<8x32xf32>
    %83 = arith.mulf %82, %80 : vector<8x32xf32>
    %84 = arith.mulf %74, %60 : vector<8x32xf32>
    %85 = arith.addf %83, %84 : vector<8x32xf32>
    %c16 = arith.constant 16 : index
    %c0_22 = arith.constant 0 : index
    %86 = vector.load %arg20[%c16, %c0_22] : memref<64x32xf32, #tpu.memory_space<vmem>>, vector<8x32xf32>
    tpu.vector_store %arg20[%c16, %c0_22], %85 {strides = array<i32>} : memref<64x32xf32, #tpu.memory_space<vmem>>, vector<8x32xf32>,
    %87 = arith.truncf %85 : vector<8x32xf32> to vector<8x32xbf16>
    %cst_23 = arith.constant dense<0.000000e+00> : vector<8x96xf32>
    %88 = tpu.matmul %87, %7, %cst_23 {dimension_numbers = #tpu.dot_dimension_numbers<[1], [0], [0], [1], [0, 0, 1, 1], [], []>} : vector<8x32xbf16>, vector<32x96xbf16>, vector<8x96xf32> -> vector<8x96xf32>
    %89 = vector.extract_strided_slice %6 {offsets = [24, 0], sizes = [8, 96], strides = [1, 1]} : vector<64x96xf32> to vector<8x96xf32>
    %90 = vector.extract_strided_slice %89 {offsets = [0, 0], sizes = [8, 64], strides = [1, 1]} : vector<8x96xf32> to vector<8x64xf32>
    %91 = vector.extract_strided_slice %88 {offsets = [0, 0], sizes = [8, 64], strides = [1, 1]} : vector<8x96xf32> to vector<8x64xf32>
    %92 = arith.addf %90, %91 : vector<8x64xf32>
    %93 = arith.negf %92 : vector<8x64xf32>
    %94 = math.exp %93 : vector<8x64xf32>
    %cst_24 = arith.constant 1.000000e+00 : f32
    %95 = vector.broadcast %cst_24 : f32 to vector<8x64xf32>
    %96 = arith.addf %95, %94 : vector<8x64xf32>
    %97 = arith.divf %95, %96 : vector<8x64xf32>
    %98 = vector.extract_strided_slice %97 {offsets = [0, 0], sizes = [8, 32], strides = [1, 1]} : vector<8x64xf32> to vector<8x32xf32>
    %99 = vector.extract_strided_slice %97 {offsets = [0, 32], sizes = [8, 32], strides = [1, 1]} : vector<8x64xf32> to vector<8x32xf32>
    %100 = vector.extract_strided_slice %89 {offsets = [0, 64], sizes = [8, 32], strides = [1, 1]} : vector<8x96xf32> to vector<8x32xf32>
    %101 = vector.extract_strided_slice %88 {offsets = [0, 64], sizes = [8, 32], strides = [1, 1]} : vector<8x96xf32> to vector<8x32xf32>
    %102 = arith.addf %101, %10 : vector<8x32xf32>
    %103 = arith.mulf %98, %102 : vector<8x32xf32>
    %104 = arith.addf %100, %103 : vector<8x32xf32>
    %105 = math.tanh %104 : vector<8x32xf32>
    %cst_25 = arith.constant 1.000000e+00 : f32
    %106 = vector.broadcast %cst_25 : f32 to vector<8x32xf32>
    %107 = arith.subf %106, %99 : vector<8x32xf32>
    %108 = arith.mulf %107, %105 : vector<8x32xf32>
    %109 = arith.mulf %99, %85 : vector<8x32xf32>
    %110 = arith.addf %108, %109 : vector<8x32xf32>
    %c24 = arith.constant 24 : index
    %c0_26 = arith.constant 0 : index
    %111 = vector.load %arg20[%c24, %c0_26] : memref<64x32xf32, #tpu.memory_space<vmem>>, vector<8x32xf32>
    tpu.vector_store %arg20[%c24, %c0_26], %110 {strides = array<i32>} : memref<64x32xf32, #tpu.memory_space<vmem>>, vector<8x32xf32>,
    %112 = arith.truncf %110 : vector<8x32xf32> to vector<8x32xbf16>
    %cst_27 = arith.constant dense<0.000000e+00> : vector<8x96xf32>
    %113 = tpu.matmul %112, %7, %cst_27 {dimension_numbers = #tpu.dot_dimension_numbers<[1], [0], [0], [1], [0, 0, 1, 1], [], []>} : vector<8x32xbf16>, vector<32x96xbf16>, vector<8x96xf32> -> vector<8x96xf32>
    %114 = vector.extract_strided_slice %6 {offsets = [32, 0], sizes = [8, 96], strides = [1, 1]} : vector<64x96xf32> to vector<8x96xf32>
    %115 = vector.extract_strided_slice %114 {offsets = [0, 0], sizes = [8, 64], strides = [1, 1]} : vector<8x96xf32> to vector<8x64xf32>
    %116 = vector.extract_strided_slice %113 {offsets = [0, 0], sizes = [8, 64], strides = [1, 1]} : vector<8x96xf32> to vector<8x64xf32>
    %117 = arith.addf %115, %116 : vector<8x64xf32>
    %118 = arith.negf %117 : vector<8x64xf32>
    %119 = math.exp %118 : vector<8x64xf32>
    %cst_28 = arith.constant 1.000000e+00 : f32
    %120 = vector.broadcast %cst_28 : f32 to vector<8x64xf32>
    %121 = arith.addf %120, %119 : vector<8x64xf32>
    %122 = arith.divf %120, %121 : vector<8x64xf32>
    %123 = vector.extract_strided_slice %122 {offsets = [0, 0], sizes = [8, 32], strides = [1, 1]} : vector<8x64xf32> to vector<8x32xf32>
    %124 = vector.extract_strided_slice %122 {offsets = [0, 32], sizes = [8, 32], strides = [1, 1]} : vector<8x64xf32> to vector<8x32xf32>
    %125 = vector.extract_strided_slice %114 {offsets = [0, 64], sizes = [8, 32], strides = [1, 1]} : vector<8x96xf32> to vector<8x32xf32>
    %126 = vector.extract_strided_slice %113 {offsets = [0, 64], sizes = [8, 32], strides = [1, 1]} : vector<8x96xf32> to vector<8x32xf32>
    %127 = arith.addf %126, %10 : vector<8x32xf32>
    %128 = arith.mulf %123, %127 : vector<8x32xf32>
    %129 = arith.addf %125, %128 : vector<8x32xf32>
    %130 = math.tanh %129 : vector<8x32xf32>
    %cst_29 = arith.constant 1.000000e+00 : f32
    %131 = vector.broadcast %cst_29 : f32 to vector<8x32xf32>
    %132 = arith.subf %131, %124 : vector<8x32xf32>
    %133 = arith.mulf %132, %130 : vector<8x32xf32>
    %134 = arith.mulf %124, %110 : vector<8x32xf32>
    %135 = arith.addf %133, %134 : vector<8x32xf32>
    %c32 = arith.constant 32 : index
    %c0_30 = arith.constant 0 : index
    %136 = vector.load %arg20[%c32, %c0_30] : memref<64x32xf32, #tpu.memory_space<vmem>>, vector<8x32xf32>
    tpu.vector_store %arg20[%c32, %c0_30], %135 {strides = array<i32>} : memref<64x32xf32, #tpu.memory_space<vmem>>, vector<8x32xf32>,
    %137 = arith.truncf %135 : vector<8x32xf32> to vector<8x32xbf16>
    %cst_31 = arith.constant dense<0.000000e+00> : vector<8x96xf32>
    %138 = tpu.matmul %137, %7, %cst_31 {dimension_numbers = #tpu.dot_dimension_numbers<[1], [0], [0], [1], [0, 0, 1, 1], [], []>} : vector<8x32xbf16>, vector<32x96xbf16>, vector<8x96xf32> -> vector<8x96xf32>
    %139 = vector.extract_strided_slice %6 {offsets = [40, 0], sizes = [8, 96], strides = [1, 1]} : vector<64x96xf32> to vector<8x96xf32>
    %140 = vector.extract_strided_slice %139 {offsets = [0, 0], sizes = [8, 64], strides = [1, 1]} : vector<8x96xf32> to vector<8x64xf32>
    %141 = vector.extract_strided_slice %138 {offsets = [0, 0], sizes = [8, 64], strides = [1, 1]} : vector<8x96xf32> to vector<8x64xf32>
    %142 = arith.addf %140, %141 : vector<8x64xf32>
    %143 = arith.negf %142 : vector<8x64xf32>
    %144 = math.exp %143 : vector<8x64xf32>
    %cst_32 = arith.constant 1.000000e+00 : f32
    %145 = vector.broadcast %cst_32 : f32 to vector<8x64xf32>
    %146 = arith.addf %145, %144 : vector<8x64xf32>
    %147 = arith.divf %145, %146 : vector<8x64xf32>
    %148 = vector.extract_strided_slice %147 {offsets = [0, 0], sizes = [8, 32], strides = [1, 1]} : vector<8x64xf32> to vector<8x32xf32>
    %149 = vector.extract_strided_slice %147 {offsets = [0, 32], sizes = [8, 32], strides = [1, 1]} : vector<8x64xf32> to vector<8x32xf32>
    %150 = vector.extract_strided_slice %139 {offsets = [0, 64], sizes = [8, 32], strides = [1, 1]} : vector<8x96xf32> to vector<8x32xf32>
    %151 = vector.extract_strided_slice %138 {offsets = [0, 64], sizes = [8, 32], strides = [1, 1]} : vector<8x96xf32> to vector<8x32xf32>
    %152 = arith.addf %151, %10 : vector<8x32xf32>
    %153 = arith.mulf %148, %152 : vector<8x32xf32>
    %154 = arith.addf %150, %153 : vector<8x32xf32>
    %155 = math.tanh %154 : vector<8x32xf32>
    %cst_33 = arith.constant 1.000000e+00 : f32
    %156 = vector.broadcast %cst_33 : f32 to vector<8x32xf32>
    %157 = arith.subf %156, %149 : vector<8x32xf32>
    %158 = arith.mulf %157, %155 : vector<8x32xf32>
    %159 = arith.mulf %149, %135 : vector<8x32xf32>
    %160 = arith.addf %158, %159 : vector<8x32xf32>
    %c40 = arith.constant 40 : index
    %c0_34 = arith.constant 0 : index
    %161 = vector.load %arg20[%c40, %c0_34] : memref<64x32xf32, #tpu.memory_space<vmem>>, vector<8x32xf32>
    tpu.vector_store %arg20[%c40, %c0_34], %160 {strides = array<i32>} : memref<64x32xf32, #tpu.memory_space<vmem>>, vector<8x32xf32>,
    %162 = arith.truncf %160 : vector<8x32xf32> to vector<8x32xbf16>
    %cst_35 = arith.constant dense<0.000000e+00> : vector<8x96xf32>
    %163 = tpu.matmul %162, %7, %cst_35 {dimension_numbers = #tpu.dot_dimension_numbers<[1], [0], [0], [1], [0, 0, 1, 1], [], []>} : vector<8x32xbf16>, vector<32x96xbf16>, vector<8x96xf32> -> vector<8x96xf32>
    %164 = vector.extract_strided_slice %6 {offsets = [48, 0], sizes = [8, 96], strides = [1, 1]} : vector<64x96xf32> to vector<8x96xf32>
    %165 = vector.extract_strided_slice %164 {offsets = [0, 0], sizes = [8, 64], strides = [1, 1]} : vector<8x96xf32> to vector<8x64xf32>
    %166 = vector.extract_strided_slice %163 {offsets = [0, 0], sizes = [8, 64], strides = [1, 1]} : vector<8x96xf32> to vector<8x64xf32>
    %167 = arith.addf %165, %166 : vector<8x64xf32>
    %168 = arith.negf %167 : vector<8x64xf32>
    %169 = math.exp %168 : vector<8x64xf32>
    %cst_36 = arith.constant 1.000000e+00 : f32
    %170 = vector.broadcast %cst_36 : f32 to vector<8x64xf32>
    %171 = arith.addf %170, %169 : vector<8x64xf32>
    %172 = arith.divf %170, %171 : vector<8x64xf32>
    %173 = vector.extract_strided_slice %172 {offsets = [0, 0], sizes = [8, 32], strides = [1, 1]} : vector<8x64xf32> to vector<8x32xf32>
    %174 = vector.extract_strided_slice %172 {offsets = [0, 32], sizes = [8, 32], strides = [1, 1]} : vector<8x64xf32> to vector<8x32xf32>
    %175 = vector.extract_strided_slice %164 {offsets = [0, 64], sizes = [8, 32], strides = [1, 1]} : vector<8x96xf32> to vector<8x32xf32>
    %176 = vector.extract_strided_slice %163 {offsets = [0, 64], sizes = [8, 32], strides = [1, 1]} : vector<8x96xf32> to vector<8x32xf32>
    %177 = arith.addf %176, %10 : vector<8x32xf32>
    %178 = arith.mulf %173, %177 : vector<8x32xf32>
    %179 = arith.addf %175, %178 : vector<8x32xf32>
    %180 = math.tanh %179 : vector<8x32xf32>
    %cst_37 = arith.constant 1.000000e+00 : f32
    %181 = vector.broadcast %cst_37 : f32 to vector<8x32xf32>
    %182 = arith.subf %181, %174 : vector<8x32xf32>
    %183 = arith.mulf %182, %180 : vector<8x32xf32>
    %184 = arith.mulf %174, %160 : vector<8x32xf32>
    %185 = arith.addf %183, %184 : vector<8x32xf32>
    %c48 = arith.constant 48 : index
    %c0_38 = arith.constant 0 : index
    %186 = vector.load %arg20[%c48, %c0_38] : memref<64x32xf32, #tpu.memory_space<vmem>>, vector<8x32xf32>
    tpu.vector_store %arg20[%c48, %c0_38], %185 {strides = array<i32>} : memref<64x32xf32, #tpu.memory_space<vmem>>, vector<8x32xf32>,
    %187 = arith.truncf %185 : vector<8x32xf32> to vector<8x32xbf16>
    %cst_39 = arith.constant dense<0.000000e+00> : vector<8x96xf32>
    %188 = tpu.matmul %187, %7, %cst_39 {dimension_numbers = #tpu.dot_dimension_numbers<[1], [0], [0], [1], [0, 0, 1, 1], [], []>} : vector<8x32xbf16>, vector<32x96xbf16>, vector<8x96xf32> -> vector<8x96xf32>
    %189 = vector.extract_strided_slice %6 {offsets = [56, 0], sizes = [8, 96], strides = [1, 1]} : vector<64x96xf32> to vector<8x96xf32>
    %190 = vector.extract_strided_slice %189 {offsets = [0, 0], sizes = [8, 64], strides = [1, 1]} : vector<8x96xf32> to vector<8x64xf32>
    %191 = vector.extract_strided_slice %188 {offsets = [0, 0], sizes = [8, 64], strides = [1, 1]} : vector<8x96xf32> to vector<8x64xf32>
    %192 = arith.addf %190, %191 : vector<8x64xf32>
    %193 = arith.negf %192 : vector<8x64xf32>
    %194 = math.exp %193 : vector<8x64xf32>
    %cst_40 = arith.constant 1.000000e+00 : f32
    %195 = vector.broadcast %cst_40 : f32 to vector<8x64xf32>
    %196 = arith.addf %195, %194 : vector<8x64xf32>
    %197 = arith.divf %195, %196 : vector<8x64xf32>
    %198 = vector.extract_strided_slice %197 {offsets = [0, 0], sizes = [8, 32], strides = [1, 1]} : vector<8x64xf32> to vector<8x32xf32>
    %199 = vector.extract_strided_slice %197 {offsets = [0, 32], sizes = [8, 32], strides = [1, 1]} : vector<8x64xf32> to vector<8x32xf32>
    %200 = vector.extract_strided_slice %189 {offsets = [0, 64], sizes = [8, 32], strides = [1, 1]} : vector<8x96xf32> to vector<8x32xf32>
    %201 = vector.extract_strided_slice %188 {offsets = [0, 64], sizes = [8, 32], strides = [1, 1]} : vector<8x96xf32> to vector<8x32xf32>
    %202 = arith.addf %201, %10 : vector<8x32xf32>
    %203 = arith.mulf %198, %202 : vector<8x32xf32>
    %204 = arith.addf %200, %203 : vector<8x32xf32>
    %205 = math.tanh %204 : vector<8x32xf32>
    %cst_41 = arith.constant 1.000000e+00 : f32
    %206 = vector.broadcast %cst_41 : f32 to vector<8x32xf32>
    %207 = arith.subf %206, %199 : vector<8x32xf32>
    %208 = arith.mulf %207, %205 : vector<8x32xf32>
    %209 = arith.mulf %199, %185 : vector<8x32xf32>
    %210 = arith.addf %208, %209 : vector<8x32xf32>
    %c56 = arith.constant 56 : index
    %c0_42 = arith.constant 0 : index
    %211 = vector.load %arg20[%c56, %c0_42] : memref<64x32xf32, #tpu.memory_space<vmem>>, vector<8x32xf32>
    tpu.vector_store %arg20[%c56, %c0_42], %210 {strides = array<i32>} : memref<64x32xf32, #tpu.memory_space<vmem>>, vector<8x32xf32>,
    %c0_43 = arith.constant 0 : index
    %c0_44 = arith.constant 0 : index
    %212 = vector.load %arg20[%c0_43, %c0_44] : memref<64x32xf32, #tpu.memory_space<vmem>>, vector<64x32xf32>
    %213 = arith.truncf %212 : vector<64x32xf32> to vector<64x32xbf16>
    %c0_45 = arith.constant 0 : index
    %c0_46 = arith.constant 0 : index
    %214 = vector.load %arg5[%c0_45, %c0_46] : memref<32x48xbf16, #tpu.memory_space<vmem>>, vector<32x48xbf16>
    %cst_47 = arith.constant dense<0.000000e+00> : vector<64x48xf32>
    %215 = tpu.matmul %213, %214, %cst_47 {dimension_numbers = #tpu.dot_dimension_numbers<[1], [0], [0], [1], [0, 0, 1, 1], [], []>} : vector<64x32xbf16>, vector<32x48xbf16>, vector<64x48xf32> -> vector<64x48xf32>
    %c0_48 = arith.constant 0 : index
    %c0_49 = arith.constant 0 : index
    %216 = vector.load %arg7[%c0_48, %c0_49] : memref<1x48xf32, #tpu.memory_space<vmem>>, vector<1x48xf32>
    %217 = vector.broadcast %216 : vector<1x48xf32> to vector<64x48xf32>
    %218 = arith.addf %215, %217 : vector<64x48xf32>
    %c0_50 = arith.constant 0 : index
    %c0_51 = arith.constant 0 : index
    %219 = vector.load %arg6[%c0_50, %c0_51] : memref<16x48xbf16, #tpu.memory_space<vmem>>, vector<16x48xbf16>
    %c0_52 = arith.constant 0 : index
    %c0_53 = arith.constant 0 : index
    %220 = vector.load %arg8[%c0_52, %c0_53] : memref<1x16xf32, #tpu.memory_space<vmem>>, vector<1x16xf32>
    %221 = vector.shape_cast %220 : vector<1x16xf32> to vector<1x16xf32>
    %222 = vector.broadcast %221 : vector<1x16xf32> to vector<8x16xf32>
    %cst_54 = arith.constant 0.000000e+00 : f32
    %223 = vector.broadcast %cst_54 : f32 to vector<8x16xf32>
    %224 = arith.truncf %223 : vector<8x16xf32> to vector<8x16xbf16>
    %cst_55 = arith.constant dense<0.000000e+00> : vector<8x48xf32>
    %225 = tpu.matmul %224, %219, %cst_55 {dimension_numbers = #tpu.dot_dimension_numbers<[1], [0], [0], [1], [0, 0, 1, 1], [], []>} : vector<8x16xbf16>, vector<16x48xbf16>, vector<8x48xf32> -> vector<8x48xf32>
    %226 = vector.extract_strided_slice %218 {offsets = [0, 0], sizes = [8, 48], strides = [1, 1]} : vector<64x48xf32> to vector<8x48xf32>
    %227 = vector.extract_strided_slice %226 {offsets = [0, 0], sizes = [8, 32], strides = [1, 1]} : vector<8x48xf32> to vector<8x32xf32>
    %228 = vector.extract_strided_slice %225 {offsets = [0, 0], sizes = [8, 32], strides = [1, 1]} : vector<8x48xf32> to vector<8x32xf32>
    %229 = arith.addf %227, %228 : vector<8x32xf32>
    %230 = arith.negf %229 : vector<8x32xf32>
    %231 = math.exp %230 : vector<8x32xf32>
    %cst_56 = arith.constant 1.000000e+00 : f32
    %232 = vector.broadcast %cst_56 : f32 to vector<8x32xf32>
    %233 = arith.addf %232, %231 : vector<8x32xf32>
    %234 = arith.divf %232, %233 : vector<8x32xf32>
    %235 = vector.extract_strided_slice %234 {offsets = [0, 0], sizes = [8, 16], strides = [1, 1]} : vector<8x32xf32> to vector<8x16xf32>
    %236 = vector.extract_strided_slice %234 {offsets = [0, 16], sizes = [8, 16], strides = [1, 1]} : vector<8x32xf32> to vector<8x16xf32>
    %237 = vector.extract_strided_slice %226 {offsets = [0, 32], sizes = [8, 16], strides = [1, 1]} : vector<8x48xf32> to vector<8x16xf32>
    %238 = vector.extract_strided_slice %225 {offsets = [0, 32], sizes = [8, 16], strides = [1, 1]} : vector<8x48xf32> to vector<8x16xf32>
    %239 = arith.addf %238, %222 : vector<8x16xf32>
    %240 = arith.mulf %235, %239 : vector<8x16xf32>
    %241 = arith.addf %237, %240 : vector<8x16xf32>
    %242 = math.tanh %241 : vector<8x16xf32>
    %cst_57 = arith.constant 1.000000e+00 : f32
    %243 = vector.broadcast %cst_57 : f32 to vector<8x16xf32>
    %244 = arith.subf %243, %236 : vector<8x16xf32>
    %245 = arith.mulf %244, %242 : vector<8x16xf32>
    %246 = arith.mulf %236, %223 : vector<8x16xf32>
    %247 = arith.addf %245, %246 : vector<8x16xf32>
    %c0_58 = arith.constant 0 : index
    %c0_59 = arith.constant 0 : index
    %248 = vector.load %arg21[%c0_58, %c0_59] : memref<64x16xf32, #tpu.memory_space<vmem>>, vector<8x16xf32>
    tpu.vector_store %arg21[%c0_58, %c0_59], %247 {strides = array<i32>} : memref<64x16xf32, #tpu.memory_space<vmem>>, vector<8x16xf32>,
    %249 = arith.truncf %247 : vector<8x16xf32> to vector<8x16xbf16>
    %cst_60 = arith.constant dense<0.000000e+00> : vector<8x48xf32>
    %250 = tpu.matmul %249, %219, %cst_60 {dimension_numbers = #tpu.dot_dimension_numbers<[1], [0], [0], [1], [0, 0, 1, 1], [], []>} : vector<8x16xbf16>, vector<16x48xbf16>, vector<8x48xf32> -> vector<8x48xf32>
    %251 = vector.extract_strided_slice %218 {offsets = [8, 0], sizes = [8, 48], strides = [1, 1]} : vector<64x48xf32> to vector<8x48xf32>
    %252 = vector.extract_strided_slice %251 {offsets = [0, 0], sizes = [8, 32], strides = [1, 1]} : vector<8x48xf32> to vector<8x32xf32>
    %253 = vector.extract_strided_slice %250 {offsets = [0, 0], sizes = [8, 32], strides = [1, 1]} : vector<8x48xf32> to vector<8x32xf32>
    %254 = arith.addf %252, %253 : vector<8x32xf32>
    %255 = arith.negf %254 : vector<8x32xf32>
    %256 = math.exp %255 : vector<8x32xf32>
    %cst_61 = arith.constant 1.000000e+00 : f32
    %257 = vector.broadcast %cst_61 : f32 to vector<8x32xf32>
    %258 = arith.addf %257, %256 : vector<8x32xf32>
    %259 = arith.divf %257, %258 : vector<8x32xf32>
    %260 = vector.extract_strided_slice %259 {offsets = [0, 0], sizes = [8, 16], strides = [1, 1]} : vector<8x32xf32> to vector<8x16xf32>
    %261 = vector.extract_strided_slice %259 {offsets = [0, 16], sizes = [8, 16], strides = [1, 1]} : vector<8x32xf32> to vector<8x16xf32>
    %262 = vector.extract_strided_slice %251 {offsets = [0, 32], sizes = [8, 16], strides = [1, 1]} : vector<8x48xf32> to vector<8x16xf32>
    %263 = vector.extract_strided_slice %250 {offsets = [0, 32], sizes = [8, 16], strides = [1, 1]} : vector<8x48xf32> to vector<8x16xf32>
    %264 = arith.addf %263, %222 : vector<8x16xf32>
    %265 = arith.mulf %260, %264 : vector<8x16xf32>
    %266 = arith.addf %262, %265 : vector<8x16xf32>
    %267 = math.tanh %266 : vector<8x16xf32>
    %cst_62 = arith.constant 1.000000e+00 : f32
    %268 = vector.broadcast %cst_62 : f32 to vector<8x16xf32>
    %269 = arith.subf %268, %261 : vector<8x16xf32>
    %270 = arith.mulf %269, %267 : vector<8x16xf32>
    %271 = arith.mulf %261, %247 : vector<8x16xf32>
    %272 = arith.addf %270, %271 : vector<8x16xf32>
    %c8_63 = arith.constant 8 : index
    %c0_64 = arith.constant 0 : index
    %273 = vector.load %arg21[%c8_63, %c0_64] : memref<64x16xf32, #tpu.memory_space<vmem>>, vector<8x16xf32>
    tpu.vector_store %arg21[%c8_63, %c0_64], %272 {strides = array<i32>} : memref<64x16xf32, #tpu.memory_space<vmem>>, vector<8x16xf32>,
    %274 = arith.truncf %272 : vector<8x16xf32> to vector<8x16xbf16>
    %cst_65 = arith.constant dense<0.000000e+00> : vector<8x48xf32>
    %275 = tpu.matmul %274, %219, %cst_65 {dimension_numbers = #tpu.dot_dimension_numbers<[1], [0], [0], [1], [0, 0, 1, 1], [], []>} : vector<8x16xbf16>, vector<16x48xbf16>, vector<8x48xf32> -> vector<8x48xf32>
    %276 = vector.extract_strided_slice %218 {offsets = [16, 0], sizes = [8, 48], strides = [1, 1]} : vector<64x48xf32> to vector<8x48xf32>
    %277 = vector.extract_strided_slice %276 {offsets = [0, 0], sizes = [8, 32], strides = [1, 1]} : vector<8x48xf32> to vector<8x32xf32>
    %278 = vector.extract_strided_slice %275 {offsets = [0, 0], sizes = [8, 32], strides = [1, 1]} : vector<8x48xf32> to vector<8x32xf32>
    %279 = arith.addf %277, %278 : vector<8x32xf32>
    %280 = arith.negf %279 : vector<8x32xf32>
    %281 = math.exp %280 : vector<8x32xf32>
    %cst_66 = arith.constant 1.000000e+00 : f32
    %282 = vector.broadcast %cst_66 : f32 to vector<8x32xf32>
    %283 = arith.addf %282, %281 : vector<8x32xf32>
    %284 = arith.divf %282, %283 : vector<8x32xf32>
    %285 = vector.extract_strided_slice %284 {offsets = [0, 0], sizes = [8, 16], strides = [1, 1]} : vector<8x32xf32> to vector<8x16xf32>
    %286 = vector.extract_strided_slice %284 {offsets = [0, 16], sizes = [8, 16], strides = [1, 1]} : vector<8x32xf32> to vector<8x16xf32>
    %287 = vector.extract_strided_slice %276 {offsets = [0, 32], sizes = [8, 16], strides = [1, 1]} : vector<8x48xf32> to vector<8x16xf32>
    %288 = vector.extract_strided_slice %275 {offsets = [0, 32], sizes = [8, 16], strides = [1, 1]} : vector<8x48xf32> to vector<8x16xf32>
    %289 = arith.addf %288, %222 : vector<8x16xf32>
    %290 = arith.mulf %285, %289 : vector<8x16xf32>
    %291 = arith.addf %287, %290 : vector<8x16xf32>
    %292 = math.tanh %291 : vector<8x16xf32>
    %cst_67 = arith.constant 1.000000e+00 : f32
    %293 = vector.broadcast %cst_67 : f32 to vector<8x16xf32>
    %294 = arith.subf %293, %286 : vector<8x16xf32>
    %295 = arith.mulf %294, %292 : vector<8x16xf32>
    %296 = arith.mulf %286, %272 : vector<8x16xf32>
    %297 = arith.addf %295, %296 : vector<8x16xf32>
    %c16_68 = arith.constant 16 : index
    %c0_69 = arith.constant 0 : index
    %298 = vector.load %arg21[%c16_68, %c0_69] : memref<64x16xf32, #tpu.memory_space<vmem>>, vector<8x16xf32>
    tpu.vector_store %arg21[%c16_68, %c0_69], %297 {strides = array<i32>} : memref<64x16xf32, #tpu.memory_space<vmem>>, vector<8x16xf32>,
    %299 = arith.truncf %297 : vector<8x16xf32> to vector<8x16xbf16>
    %cst_70 = arith.constant dense<0.000000e+00> : vector<8x48xf32>
    %300 = tpu.matmul %299, %219, %cst_70 {dimension_numbers = #tpu.dot_dimension_numbers<[1], [0], [0], [1], [0, 0, 1, 1], [], []>} : vector<8x16xbf16>, vector<16x48xbf16>, vector<8x48xf32> -> vector<8x48xf32>
    %301 = vector.extract_strided_slice %218 {offsets = [24, 0], sizes = [8, 48], strides = [1, 1]} : vector<64x48xf32> to vector<8x48xf32>
    %302 = vector.extract_strided_slice %301 {offsets = [0, 0], sizes = [8, 32], strides = [1, 1]} : vector<8x48xf32> to vector<8x32xf32>
    %303 = vector.extract_strided_slice %300 {offsets = [0, 0], sizes = [8, 32], strides = [1, 1]} : vector<8x48xf32> to vector<8x32xf32>
    %304 = arith.addf %302, %303 : vector<8x32xf32>
    %305 = arith.negf %304 : vector<8x32xf32>
    %306 = math.exp %305 : vector<8x32xf32>
    %cst_71 = arith.constant 1.000000e+00 : f32
    %307 = vector.broadcast %cst_71 : f32 to vector<8x32xf32>
    %308 = arith.addf %307, %306 : vector<8x32xf32>
    %309 = arith.divf %307, %308 : vector<8x32xf32>
    %310 = vector.extract_strided_slice %309 {offsets = [0, 0], sizes = [8, 16], strides = [1, 1]} : vector<8x32xf32> to vector<8x16xf32>
    %311 = vector.extract_strided_slice %309 {offsets = [0, 16], sizes = [8, 16], strides = [1, 1]} : vector<8x32xf32> to vector<8x16xf32>
    %312 = vector.extract_strided_slice %301 {offsets = [0, 32], sizes = [8, 16], strides = [1, 1]} : vector<8x48xf32> to vector<8x16xf32>
    %313 = vector.extract_strided_slice %300 {offsets = [0, 32], sizes = [8, 16], strides = [1, 1]} : vector<8x48xf32> to vector<8x16xf32>
    %314 = arith.addf %313, %222 : vector<8x16xf32>
    %315 = arith.mulf %310, %314 : vector<8x16xf32>
    %316 = arith.addf %312, %315 : vector<8x16xf32>
    %317 = math.tanh %316 : vector<8x16xf32>
    %cst_72 = arith.constant 1.000000e+00 : f32
    %318 = vector.broadcast %cst_72 : f32 to vector<8x16xf32>
    %319 = arith.subf %318, %311 : vector<8x16xf32>
    %320 = arith.mulf %319, %317 : vector<8x16xf32>
    %321 = arith.mulf %311, %297 : vector<8x16xf32>
    %322 = arith.addf %320, %321 : vector<8x16xf32>
    %c24_73 = arith.constant 24 : index
    %c0_74 = arith.constant 0 : index
    %323 = vector.load %arg21[%c24_73, %c0_74] : memref<64x16xf32, #tpu.memory_space<vmem>>, vector<8x16xf32>
    tpu.vector_store %arg21[%c24_73, %c0_74], %322 {strides = array<i32>} : memref<64x16xf32, #tpu.memory_space<vmem>>, vector<8x16xf32>,
    %324 = arith.truncf %322 : vector<8x16xf32> to vector<8x16xbf16>
    %cst_75 = arith.constant dense<0.000000e+00> : vector<8x48xf32>
    %325 = tpu.matmul %324, %219, %cst_75 {dimension_numbers = #tpu.dot_dimension_numbers<[1], [0], [0], [1], [0, 0, 1, 1], [], []>} : vector<8x16xbf16>, vector<16x48xbf16>, vector<8x48xf32> -> vector<8x48xf32>
    %326 = vector.extract_strided_slice %218 {offsets = [32, 0], sizes = [8, 48], strides = [1, 1]} : vector<64x48xf32> to vector<8x48xf32>
    %327 = vector.extract_strided_slice %326 {offsets = [0, 0], sizes = [8, 32], strides = [1, 1]} : vector<8x48xf32> to vector<8x32xf32>
    %328 = vector.extract_strided_slice %325 {offsets = [0, 0], sizes = [8, 32], strides = [1, 1]} : vector<8x48xf32> to vector<8x32xf32>
    %329 = arith.addf %327, %328 : vector<8x32xf32>
    %330 = arith.negf %329 : vector<8x32xf32>
    %331 = math.exp %330 : vector<8x32xf32>
    %cst_76 = arith.constant 1.000000e+00 : f32
    %332 = vector.broadcast %cst_76 : f32 to vector<8x32xf32>
    %333 = arith.addf %332, %331 : vector<8x32xf32>
    %334 = arith.divf %332, %333 : vector<8x32xf32>
    %335 = vector.extract_strided_slice %334 {offsets = [0, 0], sizes = [8, 16], strides = [1, 1]} : vector<8x32xf32> to vector<8x16xf32>
    %336 = vector.extract_strided_slice %334 {offsets = [0, 16], sizes = [8, 16], strides = [1, 1]} : vector<8x32xf32> to vector<8x16xf32>
    %337 = vector.extract_strided_slice %326 {offsets = [0, 32], sizes = [8, 16], strides = [1, 1]} : vector<8x48xf32> to vector<8x16xf32>
    %338 = vector.extract_strided_slice %325 {offsets = [0, 32], sizes = [8, 16], strides = [1, 1]} : vector<8x48xf32> to vector<8x16xf32>
    %339 = arith.addf %338, %222 : vector<8x16xf32>
    %340 = arith.mulf %335, %339 : vector<8x16xf32>
    %341 = arith.addf %337, %340 : vector<8x16xf32>
    %342 = math.tanh %341 : vector<8x16xf32>
    %cst_77 = arith.constant 1.000000e+00 : f32
    %343 = vector.broadcast %cst_77 : f32 to vector<8x16xf32>
    %344 = arith.subf %343, %336 : vector<8x16xf32>
    %345 = arith.mulf %344, %342 : vector<8x16xf32>
    %346 = arith.mulf %336, %322 : vector<8x16xf32>
    %347 = arith.addf %345, %346 : vector<8x16xf32>
    %c32_78 = arith.constant 32 : index
    %c0_79 = arith.constant 0 : index
    %348 = vector.load %arg21[%c32_78, %c0_79] : memref<64x16xf32, #tpu.memory_space<vmem>>, vector<8x16xf32>
    tpu.vector_store %arg21[%c32_78, %c0_79], %347 {strides = array<i32>} : memref<64x16xf32, #tpu.memory_space<vmem>>, vector<8x16xf32>,
    %349 = arith.truncf %347 : vector<8x16xf32> to vector<8x16xbf16>
    %cst_80 = arith.constant dense<0.000000e+00> : vector<8x48xf32>
    %350 = tpu.matmul %349, %219, %cst_80 {dimension_numbers = #tpu.dot_dimension_numbers<[1], [0], [0], [1], [0, 0, 1, 1], [], []>} : vector<8x16xbf16>, vector<16x48xbf16>, vector<8x48xf32> -> vector<8x48xf32>
    %351 = vector.extract_strided_slice %218 {offsets = [40, 0], sizes = [8, 48], strides = [1, 1]} : vector<64x48xf32> to vector<8x48xf32>
    %352 = vector.extract_strided_slice %351 {offsets = [0, 0], sizes = [8, 32], strides = [1, 1]} : vector<8x48xf32> to vector<8x32xf32>
    %353 = vector.extract_strided_slice %350 {offsets = [0, 0], sizes = [8, 32], strides = [1, 1]} : vector<8x48xf32> to vector<8x32xf32>
    %354 = arith.addf %352, %353 : vector<8x32xf32>
    %355 = arith.negf %354 : vector<8x32xf32>
    %356 = math.exp %355 : vector<8x32xf32>
    %cst_81 = arith.constant 1.000000e+00 : f32
    %357 = vector.broadcast %cst_81 : f32 to vector<8x32xf32>
    %358 = arith.addf %357, %356 : vector<8x32xf32>
    %359 = arith.divf %357, %358 : vector<8x32xf32>
    %360 = vector.extract_strided_slice %359 {offsets = [0, 0], sizes = [8, 16], strides = [1, 1]} : vector<8x32xf32> to vector<8x16xf32>
    %361 = vector.extract_strided_slice %359 {offsets = [0, 16], sizes = [8, 16], strides = [1, 1]} : vector<8x32xf32> to vector<8x16xf32>
    %362 = vector.extract_strided_slice %351 {offsets = [0, 32], sizes = [8, 16], strides = [1, 1]} : vector<8x48xf32> to vector<8x16xf32>
    %363 = vector.extract_strided_slice %350 {offsets = [0, 32], sizes = [8, 16], strides = [1, 1]} : vector<8x48xf32> to vector<8x16xf32>
    %364 = arith.addf %363, %222 : vector<8x16xf32>
    %365 = arith.mulf %360, %364 : vector<8x16xf32>
    %366 = arith.addf %362, %365 : vector<8x16xf32>
    %367 = math.tanh %366 : vector<8x16xf32>
    %cst_82 = arith.constant 1.000000e+00 : f32
    %368 = vector.broadcast %cst_82 : f32 to vector<8x16xf32>
    %369 = arith.subf %368, %361 : vector<8x16xf32>
    %370 = arith.mulf %369, %367 : vector<8x16xf32>
    %371 = arith.mulf %361, %347 : vector<8x16xf32>
    %372 = arith.addf %370, %371 : vector<8x16xf32>
    %c40_83 = arith.constant 40 : index
    %c0_84 = arith.constant 0 : index
    %373 = vector.load %arg21[%c40_83, %c0_84] : memref<64x16xf32, #tpu.memory_space<vmem>>, vector<8x16xf32>
    tpu.vector_store %arg21[%c40_83, %c0_84], %372 {strides = array<i32>} : memref<64x16xf32, #tpu.memory_space<vmem>>, vector<8x16xf32>,
    %374 = arith.truncf %372 : vector<8x16xf32> to vector<8x16xbf16>
    %cst_85 = arith.constant dense<0.000000e+00> : vector<8x48xf32>
    %375 = tpu.matmul %374, %219, %cst_85 {dimension_numbers = #tpu.dot_dimension_numbers<[1], [0], [0], [1], [0, 0, 1, 1], [], []>} : vector<8x16xbf16>, vector<16x48xbf16>, vector<8x48xf32> -> vector<8x48xf32>
    %376 = vector.extract_strided_slice %218 {offsets = [48, 0], sizes = [8, 48], strides = [1, 1]} : vector<64x48xf32> to vector<8x48xf32>
    %377 = vector.extract_strided_slice %376 {offsets = [0, 0], sizes = [8, 32], strides = [1, 1]} : vector<8x48xf32> to vector<8x32xf32>
    %378 = vector.extract_strided_slice %375 {offsets = [0, 0], sizes = [8, 32], strides = [1, 1]} : vector<8x48xf32> to vector<8x32xf32>
    %379 = arith.addf %377, %378 : vector<8x32xf32>
    %380 = arith.negf %379 : vector<8x32xf32>
    %381 = math.exp %380 : vector<8x32xf32>
    %cst_86 = arith.constant 1.000000e+00 : f32
    %382 = vector.broadcast %cst_86 : f32 to vector<8x32xf32>
    %383 = arith.addf %382, %381 : vector<8x32xf32>
    %384 = arith.divf %382, %383 : vector<8x32xf32>
    %385 = vector.extract_strided_slice %384 {offsets = [0, 0], sizes = [8, 16], strides = [1, 1]} : vector<8x32xf32> to vector<8x16xf32>
    %386 = vector.extract_strided_slice %384 {offsets = [0, 16], sizes = [8, 16], strides = [1, 1]} : vector<8x32xf32> to vector<8x16xf32>
    %387 = vector.extract_strided_slice %376 {offsets = [0, 32], sizes = [8, 16], strides = [1, 1]} : vector<8x48xf32> to vector<8x16xf32>
    %388 = vector.extract_strided_slice %375 {offsets = [0, 32], sizes = [8, 16], strides = [1, 1]} : vector<8x48xf32> to vector<8x16xf32>
    %389 = arith.addf %388, %222 : vector<8x16xf32>
    %390 = arith.mulf %385, %389 : vector<8x16xf32>
    %391 = arith.addf %387, %390 : vector<8x16xf32>
    %392 = math.tanh %391 : vector<8x16xf32>
    %cst_87 = arith.constant 1.000000e+00 : f32
    %393 = vector.broadcast %cst_87 : f32 to vector<8x16xf32>
    %394 = arith.subf %393, %386 : vector<8x16xf32>
    %395 = arith.mulf %394, %392 : vector<8x16xf32>
    %396 = arith.mulf %386, %372 : vector<8x16xf32>
    %397 = arith.addf %395, %396 : vector<8x16xf32>
    %c48_88 = arith.constant 48 : index
    %c0_89 = arith.constant 0 : index
    %398 = vector.load %arg21[%c48_88, %c0_89] : memref<64x16xf32, #tpu.memory_space<vmem>>, vector<8x16xf32>
    tpu.vector_store %arg21[%c48_88, %c0_89], %397 {strides = array<i32>} : memref<64x16xf32, #tpu.memory_space<vmem>>, vector<8x16xf32>,
    %399 = arith.truncf %397 : vector<8x16xf32> to vector<8x16xbf16>
    %cst_90 = arith.constant dense<0.000000e+00> : vector<8x48xf32>
    %400 = tpu.matmul %399, %219, %cst_90 {dimension_numbers = #tpu.dot_dimension_numbers<[1], [0], [0], [1], [0, 0, 1, 1], [], []>} : vector<8x16xbf16>, vector<16x48xbf16>, vector<8x48xf32> -> vector<8x48xf32>
    %401 = vector.extract_strided_slice %218 {offsets = [56, 0], sizes = [8, 48], strides = [1, 1]} : vector<64x48xf32> to vector<8x48xf32>
    %402 = vector.extract_strided_slice %401 {offsets = [0, 0], sizes = [8, 32], strides = [1, 1]} : vector<8x48xf32> to vector<8x32xf32>
    %403 = vector.extract_strided_slice %400 {offsets = [0, 0], sizes = [8, 32], strides = [1, 1]} : vector<8x48xf32> to vector<8x32xf32>
    %404 = arith.addf %402, %403 : vector<8x32xf32>
    %405 = arith.negf %404 : vector<8x32xf32>
    %406 = math.exp %405 : vector<8x32xf32>
    %cst_91 = arith.constant 1.000000e+00 : f32
    %407 = vector.broadcast %cst_91 : f32 to vector<8x32xf32>
    %408 = arith.addf %407, %406 : vector<8x32xf32>
    %409 = arith.divf %407, %408 : vector<8x32xf32>
    %410 = vector.extract_strided_slice %409 {offsets = [0, 0], sizes = [8, 16], strides = [1, 1]} : vector<8x32xf32> to vector<8x16xf32>
    %411 = vector.extract_strided_slice %409 {offsets = [0, 16], sizes = [8, 16], strides = [1, 1]} : vector<8x32xf32> to vector<8x16xf32>
    %412 = vector.extract_strided_slice %401 {offsets = [0, 32], sizes = [8, 16], strides = [1, 1]} : vector<8x48xf32> to vector<8x16xf32>
    %413 = vector.extract_strided_slice %400 {offsets = [0, 32], sizes = [8, 16], strides = [1, 1]} : vector<8x48xf32> to vector<8x16xf32>
    %414 = arith.addf %413, %222 : vector<8x16xf32>
    %415 = arith.mulf %410, %414 : vector<8x16xf32>
    %416 = arith.addf %412, %415 : vector<8x16xf32>
    %417 = math.tanh %416 : vector<8x16xf32>
    %cst_92 = arith.constant 1.000000e+00 : f32
    %418 = vector.broadcast %cst_92 : f32 to vector<8x16xf32>
    %419 = arith.subf %418, %411 : vector<8x16xf32>
    %420 = arith.mulf %419, %417 : vector<8x16xf32>
    %421 = arith.mulf %411, %397 : vector<8x16xf32>
    %422 = arith.addf %420, %421 : vector<8x16xf32>
    %c56_93 = arith.constant 56 : index
    %c0_94 = arith.constant 0 : index
    %423 = vector.load %arg21[%c56_93, %c0_94] : memref<64x16xf32, #tpu.memory_space<vmem>>, vector<8x16xf32>
    tpu.vector_store %arg21[%c56_93, %c0_94], %422 {strides = array<i32>} : memref<64x16xf32, #tpu.memory_space<vmem>>, vector<8x16xf32>,
    %c0_95 = arith.constant 0 : index
    %c0_96 = arith.constant 0 : index
    %424 = vector.load %arg21[%c0_95, %c0_96] : memref<64x16xf32, #tpu.memory_space<vmem>>, vector<64x16xf32>
    %425 = arith.truncf %424 : vector<64x16xf32> to vector<64x16xbf16>
    %c0_97 = arith.constant 0 : index
    %c0_98 = arith.constant 0 : index
    %426 = vector.load %arg9[%c0_97, %c0_98] : memref<16x48xbf16, #tpu.memory_space<vmem>>, vector<16x48xbf16>
    %cst_99 = arith.constant dense<0.000000e+00> : vector<64x48xf32>
    %427 = tpu.matmul %425, %426, %cst_99 {dimension_numbers = #tpu.dot_dimension_numbers<[1], [0], [0], [1], [0, 0, 1, 1], [], []>} : vector<64x16xbf16>, vector<16x48xbf16>, vector<64x48xf32> -> vector<64x48xf32>
    %c0_100 = arith.constant 0 : index
    %c0_101 = arith.constant 0 : index
    %428 = vector.load %arg11[%c0_100, %c0_101] : memref<1x48xf32, #tpu.memory_space<vmem>>, vector<1x48xf32>
    %429 = vector.broadcast %428 : vector<1x48xf32> to vector<64x48xf32>
    %430 = arith.addf %427, %429 : vector<64x48xf32>
    %c0_102 = arith.constant 0 : index
    %c0_103 = arith.constant 0 : index
    %431 = vector.load %arg10[%c0_102, %c0_103] : memref<16x48xbf16, #tpu.memory_space<vmem>>, vector<16x48xbf16>
    %c0_104 = arith.constant 0 : index
    %c0_105 = arith.constant 0 : index
    %432 = vector.load %arg12[%c0_104, %c0_105] : memref<1x16xf32, #tpu.memory_space<vmem>>, vector<1x16xf32>
    %433 = vector.shape_cast %432 : vector<1x16xf32> to vector<1x16xf32>
    %434 = vector.broadcast %433 : vector<1x16xf32> to vector<8x16xf32>
    %cst_106 = arith.constant 0.000000e+00 : f32
    %435 = vector.broadcast %cst_106 : f32 to vector<8x16xf32>
    %436 = arith.truncf %435 : vector<8x16xf32> to vector<8x16xbf16>
    %cst_107 = arith.constant dense<0.000000e+00> : vector<8x48xf32>
    %437 = tpu.matmul %436, %431, %cst_107 {dimension_numbers = #tpu.dot_dimension_numbers<[1], [0], [0], [1], [0, 0, 1, 1], [], []>} : vector<8x16xbf16>, vector<16x48xbf16>, vector<8x48xf32> -> vector<8x48xf32>
    %438 = vector.extract_strided_slice %430 {offsets = [0, 0], sizes = [8, 48], strides = [1, 1]} : vector<64x48xf32> to vector<8x48xf32>
    %439 = vector.extract_strided_slice %438 {offsets = [0, 0], sizes = [8, 32], strides = [1, 1]} : vector<8x48xf32> to vector<8x32xf32>
    %440 = vector.extract_strided_slice %437 {offsets = [0, 0], sizes = [8, 32], strides = [1, 1]} : vector<8x48xf32> to vector<8x32xf32>
    %441 = arith.addf %439, %440 : vector<8x32xf32>
    %442 = arith.negf %441 : vector<8x32xf32>
    %443 = math.exp %442 : vector<8x32xf32>
    %cst_108 = arith.constant 1.000000e+00 : f32
    %444 = vector.broadcast %cst_108 : f32 to vector<8x32xf32>
    %445 = arith.addf %444, %443 : vector<8x32xf32>
    %446 = arith.divf %444, %445 : vector<8x32xf32>
    %447 = vector.extract_strided_slice %446 {offsets = [0, 0], sizes = [8, 16], strides = [1, 1]} : vector<8x32xf32> to vector<8x16xf32>
    %448 = vector.extract_strided_slice %446 {offsets = [0, 16], sizes = [8, 16], strides = [1, 1]} : vector<8x32xf32> to vector<8x16xf32>
    %449 = vector.extract_strided_slice %438 {offsets = [0, 32], sizes = [8, 16], strides = [1, 1]} : vector<8x48xf32> to vector<8x16xf32>
    %450 = vector.extract_strided_slice %437 {offsets = [0, 32], sizes = [8, 16], strides = [1, 1]} : vector<8x48xf32> to vector<8x16xf32>
    %451 = arith.addf %450, %434 : vector<8x16xf32>
    %452 = arith.mulf %447, %451 : vector<8x16xf32>
    %453 = arith.addf %449, %452 : vector<8x16xf32>
    %454 = math.tanh %453 : vector<8x16xf32>
    %cst_109 = arith.constant 1.000000e+00 : f32
    %455 = vector.broadcast %cst_109 : f32 to vector<8x16xf32>
    %456 = arith.subf %455, %448 : vector<8x16xf32>
    %457 = arith.mulf %456, %454 : vector<8x16xf32>
    %458 = arith.mulf %448, %435 : vector<8x16xf32>
    %459 = arith.addf %457, %458 : vector<8x16xf32>
    %c0_110 = arith.constant 0 : index
    %c0_111 = arith.constant 0 : index
    %460 = vector.load %arg22[%c0_110, %c0_111] : memref<64x16xf32, #tpu.memory_space<vmem>>, vector<8x16xf32>
    tpu.vector_store %arg22[%c0_110, %c0_111], %459 {strides = array<i32>} : memref<64x16xf32, #tpu.memory_space<vmem>>, vector<8x16xf32>,
    %461 = arith.truncf %459 : vector<8x16xf32> to vector<8x16xbf16>
    %cst_112 = arith.constant dense<0.000000e+00> : vector<8x48xf32>
    %462 = tpu.matmul %461, %431, %cst_112 {dimension_numbers = #tpu.dot_dimension_numbers<[1], [0], [0], [1], [0, 0, 1, 1], [], []>} : vector<8x16xbf16>, vector<16x48xbf16>, vector<8x48xf32> -> vector<8x48xf32>
    %463 = vector.extract_strided_slice %430 {offsets = [8, 0], sizes = [8, 48], strides = [1, 1]} : vector<64x48xf32> to vector<8x48xf32>
    %464 = vector.extract_strided_slice %463 {offsets = [0, 0], sizes = [8, 32], strides = [1, 1]} : vector<8x48xf32> to vector<8x32xf32>
    %465 = vector.extract_strided_slice %462 {offsets = [0, 0], sizes = [8, 32], strides = [1, 1]} : vector<8x48xf32> to vector<8x32xf32>
    %466 = arith.addf %464, %465 : vector<8x32xf32>
    %467 = arith.negf %466 : vector<8x32xf32>
    %468 = math.exp %467 : vector<8x32xf32>
    %cst_113 = arith.constant 1.000000e+00 : f32
    %469 = vector.broadcast %cst_113 : f32 to vector<8x32xf32>
    %470 = arith.addf %469, %468 : vector<8x32xf32>
    %471 = arith.divf %469, %470 : vector<8x32xf32>
    %472 = vector.extract_strided_slice %471 {offsets = [0, 0], sizes = [8, 16], strides = [1, 1]} : vector<8x32xf32> to vector<8x16xf32>
    %473 = vector.extract_strided_slice %471 {offsets = [0, 16], sizes = [8, 16], strides = [1, 1]} : vector<8x32xf32> to vector<8x16xf32>
    %474 = vector.extract_strided_slice %463 {offsets = [0, 32], sizes = [8, 16], strides = [1, 1]} : vector<8x48xf32> to vector<8x16xf32>
    %475 = vector.extract_strided_slice %462 {offsets = [0, 32], sizes = [8, 16], strides = [1, 1]} : vector<8x48xf32> to vector<8x16xf32>
    %476 = arith.addf %475, %434 : vector<8x16xf32>
    %477 = arith.mulf %472, %476 : vector<8x16xf32>
    %478 = arith.addf %474, %477 : vector<8x16xf32>
    %479 = math.tanh %478 : vector<8x16xf32>
    %cst_114 = arith.constant 1.000000e+00 : f32
    %480 = vector.broadcast %cst_114 : f32 to vector<8x16xf32>
    %481 = arith.subf %480, %473 : vector<8x16xf32>
    %482 = arith.mulf %481, %479 : vector<8x16xf32>
    %483 = arith.mulf %473, %459 : vector<8x16xf32>
    %484 = arith.addf %482, %483 : vector<8x16xf32>
    %c8_115 = arith.constant 8 : index
    %c0_116 = arith.constant 0 : index
    %485 = vector.load %arg22[%c8_115, %c0_116] : memref<64x16xf32, #tpu.memory_space<vmem>>, vector<8x16xf32>
    tpu.vector_store %arg22[%c8_115, %c0_116], %484 {strides = array<i32>} : memref<64x16xf32, #tpu.memory_space<vmem>>, vector<8x16xf32>,
    %486 = arith.truncf %484 : vector<8x16xf32> to vector<8x16xbf16>
    %cst_117 = arith.constant dense<0.000000e+00> : vector<8x48xf32>
    %487 = tpu.matmul %486, %431, %cst_117 {dimension_numbers = #tpu.dot_dimension_numbers<[1], [0], [0], [1], [0, 0, 1, 1], [], []>} : vector<8x16xbf16>, vector<16x48xbf16>, vector<8x48xf32> -> vector<8x48xf32>
    %488 = vector.extract_strided_slice %430 {offsets = [16, 0], sizes = [8, 48], strides = [1, 1]} : vector<64x48xf32> to vector<8x48xf32>
    %489 = vector.extract_strided_slice %488 {offsets = [0, 0], sizes = [8, 32], strides = [1, 1]} : vector<8x48xf32> to vector<8x32xf32>
    %490 = vector.extract_strided_slice %487 {offsets = [0, 0], sizes = [8, 32], strides = [1, 1]} : vector<8x48xf32> to vector<8x32xf32>
    %491 = arith.addf %489, %490 : vector<8x32xf32>
    %492 = arith.negf %491 : vector<8x32xf32>
    %493 = math.exp %492 : vector<8x32xf32>
    %cst_118 = arith.constant 1.000000e+00 : f32
    %494 = vector.broadcast %cst_118 : f32 to vector<8x32xf32>
    %495 = arith.addf %494, %493 : vector<8x32xf32>
    %496 = arith.divf %494, %495 : vector<8x32xf32>
    %497 = vector.extract_strided_slice %496 {offsets = [0, 0], sizes = [8, 16], strides = [1, 1]} : vector<8x32xf32> to vector<8x16xf32>
    %498 = vector.extract_strided_slice %496 {offsets = [0, 16], sizes = [8, 16], strides = [1, 1]} : vector<8x32xf32> to vector<8x16xf32>
    %499 = vector.extract_strided_slice %488 {offsets = [0, 32], sizes = [8, 16], strides = [1, 1]} : vector<8x48xf32> to vector<8x16xf32>
    %500 = vector.extract_strided_slice %487 {offsets = [0, 32], sizes = [8, 16], strides = [1, 1]} : vector<8x48xf32> to vector<8x16xf32>
    %501 = arith.addf %500, %434 : vector<8x16xf32>
    %502 = arith.mulf %497, %501 : vector<8x16xf32>
    %503 = arith.addf %499, %502 : vector<8x16xf32>
    %504 = math.tanh %503 : vector<8x16xf32>
    %cst_119 = arith.constant 1.000000e+00 : f32
    %505 = vector.broadcast %cst_119 : f32 to vector<8x16xf32>
    %506 = arith.subf %505, %498 : vector<8x16xf32>
    %507 = arith.mulf %506, %504 : vector<8x16xf32>
    %508 = arith.mulf %498, %484 : vector<8x16xf32>
    %509 = arith.addf %507, %508 : vector<8x16xf32>
    %c16_120 = arith.constant 16 : index
    %c0_121 = arith.constant 0 : index
    %510 = vector.load %arg22[%c16_120, %c0_121] : memref<64x16xf32, #tpu.memory_space<vmem>>, vector<8x16xf32>
    tpu.vector_store %arg22[%c16_120, %c0_121], %509 {strides = array<i32>} : memref<64x16xf32, #tpu.memory_space<vmem>>, vector<8x16xf32>,
    %511 = arith.truncf %509 : vector<8x16xf32> to vector<8x16xbf16>
    %cst_122 = arith.constant dense<0.000000e+00> : vector<8x48xf32>
    %512 = tpu.matmul %511, %431, %cst_122 {dimension_numbers = #tpu.dot_dimension_numbers<[1], [0], [0], [1], [0, 0, 1, 1], [], []>} : vector<8x16xbf16>, vector<16x48xbf16>, vector<8x48xf32> -> vector<8x48xf32>
    %513 = vector.extract_strided_slice %430 {offsets = [24, 0], sizes = [8, 48], strides = [1, 1]} : vector<64x48xf32> to vector<8x48xf32>
    %514 = vector.extract_strided_slice %513 {offsets = [0, 0], sizes = [8, 32], strides = [1, 1]} : vector<8x48xf32> to vector<8x32xf32>
    %515 = vector.extract_strided_slice %512 {offsets = [0, 0], sizes = [8, 32], strides = [1, 1]} : vector<8x48xf32> to vector<8x32xf32>
    %516 = arith.addf %514, %515 : vector<8x32xf32>
    %517 = arith.negf %516 : vector<8x32xf32>
    %518 = math.exp %517 : vector<8x32xf32>
    %cst_123 = arith.constant 1.000000e+00 : f32
    %519 = vector.broadcast %cst_123 : f32 to vector<8x32xf32>
    %520 = arith.addf %519, %518 : vector<8x32xf32>
    %521 = arith.divf %519, %520 : vector<8x32xf32>
    %522 = vector.extract_strided_slice %521 {offsets = [0, 0], sizes = [8, 16], strides = [1, 1]} : vector<8x32xf32> to vector<8x16xf32>
    %523 = vector.extract_strided_slice %521 {offsets = [0, 16], sizes = [8, 16], strides = [1, 1]} : vector<8x32xf32> to vector<8x16xf32>
    %524 = vector.extract_strided_slice %513 {offsets = [0, 32], sizes = [8, 16], strides = [1, 1]} : vector<8x48xf32> to vector<8x16xf32>
    %525 = vector.extract_strided_slice %512 {offsets = [0, 32], sizes = [8, 16], strides = [1, 1]} : vector<8x48xf32> to vector<8x16xf32>
    %526 = arith.addf %525, %434 : vector<8x16xf32>
    %527 = arith.mulf %522, %526 : vector<8x16xf32>
    %528 = arith.addf %524, %527 : vector<8x16xf32>
    %529 = math.tanh %528 : vector<8x16xf32>
    %cst_124 = arith.constant 1.000000e+00 : f32
    %530 = vector.broadcast %cst_124 : f32 to vector<8x16xf32>
    %531 = arith.subf %530, %523 : vector<8x16xf32>
    %532 = arith.mulf %531, %529 : vector<8x16xf32>
    %533 = arith.mulf %523, %509 : vector<8x16xf32>
    %534 = arith.addf %532, %533 : vector<8x16xf32>
    %c24_125 = arith.constant 24 : index
    %c0_126 = arith.constant 0 : index
    %535 = vector.load %arg22[%c24_125, %c0_126] : memref<64x16xf32, #tpu.memory_space<vmem>>, vector<8x16xf32>
    tpu.vector_store %arg22[%c24_125, %c0_126], %534 {strides = array<i32>} : memref<64x16xf32, #tpu.memory_space<vmem>>, vector<8x16xf32>,
    %536 = arith.truncf %534 : vector<8x16xf32> to vector<8x16xbf16>
    %cst_127 = arith.constant dense<0.000000e+00> : vector<8x48xf32>
    %537 = tpu.matmul %536, %431, %cst_127 {dimension_numbers = #tpu.dot_dimension_numbers<[1], [0], [0], [1], [0, 0, 1, 1], [], []>} : vector<8x16xbf16>, vector<16x48xbf16>, vector<8x48xf32> -> vector<8x48xf32>
    %538 = vector.extract_strided_slice %430 {offsets = [32, 0], sizes = [8, 48], strides = [1, 1]} : vector<64x48xf32> to vector<8x48xf32>
    %539 = vector.extract_strided_slice %538 {offsets = [0, 0], sizes = [8, 32], strides = [1, 1]} : vector<8x48xf32> to vector<8x32xf32>
    %540 = vector.extract_strided_slice %537 {offsets = [0, 0], sizes = [8, 32], strides = [1, 1]} : vector<8x48xf32> to vector<8x32xf32>
    %541 = arith.addf %539, %540 : vector<8x32xf32>
    %542 = arith.negf %541 : vector<8x32xf32>
    %543 = math.exp %542 : vector<8x32xf32>
    %cst_128 = arith.constant 1.000000e+00 : f32
    %544 = vector.broadcast %cst_128 : f32 to vector<8x32xf32>
    %545 = arith.addf %544, %543 : vector<8x32xf32>
    %546 = arith.divf %544, %545 : vector<8x32xf32>
    %547 = vector.extract_strided_slice %546 {offsets = [0, 0], sizes = [8, 16], strides = [1, 1]} : vector<8x32xf32> to vector<8x16xf32>
    %548 = vector.extract_strided_slice %546 {offsets = [0, 16], sizes = [8, 16], strides = [1, 1]} : vector<8x32xf32> to vector<8x16xf32>
    %549 = vector.extract_strided_slice %538 {offsets = [0, 32], sizes = [8, 16], strides = [1, 1]} : vector<8x48xf32> to vector<8x16xf32>
    %550 = vector.extract_strided_slice %537 {offsets = [0, 32], sizes = [8, 16], strides = [1, 1]} : vector<8x48xf32> to vector<8x16xf32>
    %551 = arith.addf %550, %434 : vector<8x16xf32>
    %552 = arith.mulf %547, %551 : vector<8x16xf32>
    %553 = arith.addf %549, %552 : vector<8x16xf32>
    %554 = math.tanh %553 : vector<8x16xf32>
    %cst_129 = arith.constant 1.000000e+00 : f32
    %555 = vector.broadcast %cst_129 : f32 to vector<8x16xf32>
    %556 = arith.subf %555, %548 : vector<8x16xf32>
    %557 = arith.mulf %556, %554 : vector<8x16xf32>
    %558 = arith.mulf %548, %534 : vector<8x16xf32>
    %559 = arith.addf %557, %558 : vector<8x16xf32>
    %c32_130 = arith.constant 32 : index
    %c0_131 = arith.constant 0 : index
    %560 = vector.load %arg22[%c32_130, %c0_131] : memref<64x16xf32, #tpu.memory_space<vmem>>, vector<8x16xf32>
    tpu.vector_store %arg22[%c32_130, %c0_131], %559 {strides = array<i32>} : memref<64x16xf32, #tpu.memory_space<vmem>>, vector<8x16xf32>,
    %561 = arith.truncf %559 : vector<8x16xf32> to vector<8x16xbf16>
    %cst_132 = arith.constant dense<0.000000e+00> : vector<8x48xf32>
    %562 = tpu.matmul %561, %431, %cst_132 {dimension_numbers = #tpu.dot_dimension_numbers<[1], [0], [0], [1], [0, 0, 1, 1], [], []>} : vector<8x16xbf16>, vector<16x48xbf16>, vector<8x48xf32> -> vector<8x48xf32>
    %563 = vector.extract_strided_slice %430 {offsets = [40, 0], sizes = [8, 48], strides = [1, 1]} : vector<64x48xf32> to vector<8x48xf32>
    %564 = vector.extract_strided_slice %563 {offsets = [0, 0], sizes = [8, 32], strides = [1, 1]} : vector<8x48xf32> to vector<8x32xf32>
    %565 = vector.extract_strided_slice %562 {offsets = [0, 0], sizes = [8, 32], strides = [1, 1]} : vector<8x48xf32> to vector<8x32xf32>
    %566 = arith.addf %564, %565 : vector<8x32xf32>
    %567 = arith.negf %566 : vector<8x32xf32>
    %568 = math.exp %567 : vector<8x32xf32>
    %cst_133 = arith.constant 1.000000e+00 : f32
    %569 = vector.broadcast %cst_133 : f32 to vector<8x32xf32>
    %570 = arith.addf %569, %568 : vector<8x32xf32>
    %571 = arith.divf %569, %570 : vector<8x32xf32>
    %572 = vector.extract_strided_slice %571 {offsets = [0, 0], sizes = [8, 16], strides = [1, 1]} : vector<8x32xf32> to vector<8x16xf32>
    %573 = vector.extract_strided_slice %571 {offsets = [0, 16], sizes = [8, 16], strides = [1, 1]} : vector<8x32xf32> to vector<8x16xf32>
    %574 = vector.extract_strided_slice %563 {offsets = [0, 32], sizes = [8, 16], strides = [1, 1]} : vector<8x48xf32> to vector<8x16xf32>
    %575 = vector.extract_strided_slice %562 {offsets = [0, 32], sizes = [8, 16], strides = [1, 1]} : vector<8x48xf32> to vector<8x16xf32>
    %576 = arith.addf %575, %434 : vector<8x16xf32>
    %577 = arith.mulf %572, %576 : vector<8x16xf32>
    %578 = arith.addf %574, %577 : vector<8x16xf32>
    %579 = math.tanh %578 : vector<8x16xf32>
    %cst_134 = arith.constant 1.000000e+00 : f32
    %580 = vector.broadcast %cst_134 : f32 to vector<8x16xf32>
    %581 = arith.subf %580, %573 : vector<8x16xf32>
    %582 = arith.mulf %581, %579 : vector<8x16xf32>
    %583 = arith.mulf %573, %559 : vector<8x16xf32>
    %584 = arith.addf %582, %583 : vector<8x16xf32>
    %c40_135 = arith.constant 40 : index
    %c0_136 = arith.constant 0 : index
    %585 = vector.load %arg22[%c40_135, %c0_136] : memref<64x16xf32, #tpu.memory_space<vmem>>, vector<8x16xf32>
    tpu.vector_store %arg22[%c40_135, %c0_136], %584 {strides = array<i32>} : memref<64x16xf32, #tpu.memory_space<vmem>>, vector<8x16xf32>,
    %586 = arith.truncf %584 : vector<8x16xf32> to vector<8x16xbf16>
    %cst_137 = arith.constant dense<0.000000e+00> : vector<8x48xf32>
    %587 = tpu.matmul %586, %431, %cst_137 {dimension_numbers = #tpu.dot_dimension_numbers<[1], [0], [0], [1], [0, 0, 1, 1], [], []>} : vector<8x16xbf16>, vector<16x48xbf16>, vector<8x48xf32> -> vector<8x48xf32>
    %588 = vector.extract_strided_slice %430 {offsets = [48, 0], sizes = [8, 48], strides = [1, 1]} : vector<64x48xf32> to vector<8x48xf32>
    %589 = vector.extract_strided_slice %588 {offsets = [0, 0], sizes = [8, 32], strides = [1, 1]} : vector<8x48xf32> to vector<8x32xf32>
    %590 = vector.extract_strided_slice %587 {offsets = [0, 0], sizes = [8, 32], strides = [1, 1]} : vector<8x48xf32> to vector<8x32xf32>
    %591 = arith.addf %589, %590 : vector<8x32xf32>
    %592 = arith.negf %591 : vector<8x32xf32>
    %593 = math.exp %592 : vector<8x32xf32>
    %cst_138 = arith.constant 1.000000e+00 : f32
    %594 = vector.broadcast %cst_138 : f32 to vector<8x32xf32>
    %595 = arith.addf %594, %593 : vector<8x32xf32>
    %596 = arith.divf %594, %595 : vector<8x32xf32>
    %597 = vector.extract_strided_slice %596 {offsets = [0, 0], sizes = [8, 16], strides = [1, 1]} : vector<8x32xf32> to vector<8x16xf32>
    %598 = vector.extract_strided_slice %596 {offsets = [0, 16], sizes = [8, 16], strides = [1, 1]} : vector<8x32xf32> to vector<8x16xf32>
    %599 = vector.extract_strided_slice %588 {offsets = [0, 32], sizes = [8, 16], strides = [1, 1]} : vector<8x48xf32> to vector<8x16xf32>
    %600 = vector.extract_strided_slice %587 {offsets = [0, 32], sizes = [8, 16], strides = [1, 1]} : vector<8x48xf32> to vector<8x16xf32>
    %601 = arith.addf %600, %434 : vector<8x16xf32>
    %602 = arith.mulf %597, %601 : vector<8x16xf32>
    %603 = arith.addf %599, %602 : vector<8x16xf32>
    %604 = math.tanh %603 : vector<8x16xf32>
    %cst_139 = arith.constant 1.000000e+00 : f32
    %605 = vector.broadcast %cst_139 : f32 to vector<8x16xf32>
    %606 = arith.subf %605, %598 : vector<8x16xf32>
    %607 = arith.mulf %606, %604 : vector<8x16xf32>
    %608 = arith.mulf %598, %584 : vector<8x16xf32>
    %609 = arith.addf %607, %608 : vector<8x16xf32>
    %c48_140 = arith.constant 48 : index
    %c0_141 = arith.constant 0 : index
    %610 = vector.load %arg22[%c48_140, %c0_141] : memref<64x16xf32, #tpu.memory_space<vmem>>, vector<8x16xf32>
    tpu.vector_store %arg22[%c48_140, %c0_141], %609 {strides = array<i32>} : memref<64x16xf32, #tpu.memory_space<vmem>>, vector<8x16xf32>,
    %611 = arith.truncf %609 : vector<8x16xf32> to vector<8x16xbf16>
    %cst_142 = arith.constant dense<0.000000e+00> : vector<8x48xf32>
    %612 = tpu.matmul %611, %431, %cst_142 {dimension_numbers = #tpu.dot_dimension_numbers<[1], [0], [0], [1], [0, 0, 1, 1], [], []>} : vector<8x16xbf16>, vector<16x48xbf16>, vector<8x48xf32> -> vector<8x48xf32>
    %613 = vector.extract_strided_slice %430 {offsets = [56, 0], sizes = [8, 48], strides = [1, 1]} : vector<64x48xf32> to vector<8x48xf32>
    %614 = vector.extract_strided_slice %613 {offsets = [0, 0], sizes = [8, 32], strides = [1, 1]} : vector<8x48xf32> to vector<8x32xf32>
    %615 = vector.extract_strided_slice %612 {offsets = [0, 0], sizes = [8, 32], strides = [1, 1]} : vector<8x48xf32> to vector<8x32xf32>
    %616 = arith.addf %614, %615 : vector<8x32xf32>
    %617 = arith.negf %616 : vector<8x32xf32>
    %618 = math.exp %617 : vector<8x32xf32>
    %cst_143 = arith.constant 1.000000e+00 : f32
    %619 = vector.broadcast %cst_143 : f32 to vector<8x32xf32>
    %620 = arith.addf %619, %618 : vector<8x32xf32>
    %621 = arith.divf %619, %620 : vector<8x32xf32>
    %622 = vector.extract_strided_slice %621 {offsets = [0, 0], sizes = [8, 16], strides = [1, 1]} : vector<8x32xf32> to vector<8x16xf32>
    %623 = vector.extract_strided_slice %621 {offsets = [0, 16], sizes = [8, 16], strides = [1, 1]} : vector<8x32xf32> to vector<8x16xf32>
    %624 = vector.extract_strided_slice %613 {offsets = [0, 32], sizes = [8, 16], strides = [1, 1]} : vector<8x48xf32> to vector<8x16xf32>
    %625 = vector.extract_strided_slice %612 {offsets = [0, 32], sizes = [8, 16], strides = [1, 1]} : vector<8x48xf32> to vector<8x16xf32>
    %626 = arith.addf %625, %434 : vector<8x16xf32>
    %627 = arith.mulf %622, %626 : vector<8x16xf32>
    %628 = arith.addf %624, %627 : vector<8x16xf32>
    %629 = math.tanh %628 : vector<8x16xf32>
    %cst_144 = arith.constant 1.000000e+00 : f32
    %630 = vector.broadcast %cst_144 : f32 to vector<8x16xf32>
    %631 = arith.subf %630, %623 : vector<8x16xf32>
    %632 = arith.mulf %631, %629 : vector<8x16xf32>
    %633 = arith.mulf %623, %609 : vector<8x16xf32>
    %634 = arith.addf %632, %633 : vector<8x16xf32>
    %c56_145 = arith.constant 56 : index
    %c0_146 = arith.constant 0 : index
    %635 = vector.load %arg22[%c56_145, %c0_146] : memref<64x16xf32, #tpu.memory_space<vmem>>, vector<8x16xf32>
    tpu.vector_store %arg22[%c56_145, %c0_146], %634 {strides = array<i32>} : memref<64x16xf32, #tpu.memory_space<vmem>>, vector<8x16xf32>,
    %c0_147 = arith.constant 0 : index
    %c0_148 = arith.constant 0 : index
    %636 = vector.load %arg22[%c0_147, %c0_148] : memref<64x16xf32, #tpu.memory_space<vmem>>, vector<64x16xf32>
    %637 = arith.truncf %636 : vector<64x16xf32> to vector<64x16xbf16>
    %c0_149 = arith.constant 0 : index
    %c0_150 = arith.constant 0 : index
    %638 = vector.load %arg13[%c0_149, %c0_150] : memref<16x96xbf16, #tpu.memory_space<vmem>>, vector<16x96xbf16>
    %cst_151 = arith.constant dense<0.000000e+00> : vector<64x96xf32>
    %639 = tpu.matmul %637, %638, %cst_151 {dimension_numbers = #tpu.dot_dimension_numbers<[1], [0], [0], [1], [0, 0, 1, 1], [], []>} : vector<64x16xbf16>, vector<16x96xbf16>, vector<64x96xf32> -> vector<64x96xf32>
    %c0_152 = arith.constant 0 : index
    %c0_153 = arith.constant 0 : index
    %640 = vector.load %arg15[%c0_152, %c0_153] : memref<1x96xf32, #tpu.memory_space<vmem>>, vector<1x96xf32>
    %641 = vector.broadcast %640 : vector<1x96xf32> to vector<64x96xf32>
    %642 = arith.addf %639, %641 : vector<64x96xf32>
    %c0_154 = arith.constant 0 : index
    %c0_155 = arith.constant 0 : index
    %643 = vector.load %arg14[%c0_154, %c0_155] : memref<32x96xbf16, #tpu.memory_space<vmem>>, vector<32x96xbf16>
    %c0_156 = arith.constant 0 : index
    %c0_157 = arith.constant 0 : index
    %644 = vector.load %arg16[%c0_156, %c0_157] : memref<1x32xf32, #tpu.memory_space<vmem>>, vector<1x32xf32>
    %645 = vector.shape_cast %644 : vector<1x32xf32> to vector<1x32xf32>
    %646 = vector.broadcast %645 : vector<1x32xf32> to vector<8x32xf32>
    %cst_158 = arith.constant 0.000000e+00 : f32
    %647 = vector.broadcast %cst_158 : f32 to vector<8x32xf32>
    %648 = arith.truncf %647 : vector<8x32xf32> to vector<8x32xbf16>
    %cst_159 = arith.constant dense<0.000000e+00> : vector<8x96xf32>
    %649 = tpu.matmul %648, %643, %cst_159 {dimension_numbers = #tpu.dot_dimension_numbers<[1], [0], [0], [1], [0, 0, 1, 1], [], []>} : vector<8x32xbf16>, vector<32x96xbf16>, vector<8x96xf32> -> vector<8x96xf32>
    %650 = vector.extract_strided_slice %642 {offsets = [0, 0], sizes = [8, 96], strides = [1, 1]} : vector<64x96xf32> to vector<8x96xf32>
    %651 = vector.extract_strided_slice %650 {offsets = [0, 0], sizes = [8, 64], strides = [1, 1]} : vector<8x96xf32> to vector<8x64xf32>
    %652 = vector.extract_strided_slice %649 {offsets = [0, 0], sizes = [8, 64], strides = [1, 1]} : vector<8x96xf32> to vector<8x64xf32>
    %653 = arith.addf %651, %652 : vector<8x64xf32>
    %654 = arith.negf %653 : vector<8x64xf32>
    %655 = math.exp %654 : vector<8x64xf32>
    %cst_160 = arith.constant 1.000000e+00 : f32
    %656 = vector.broadcast %cst_160 : f32 to vector<8x64xf32>
    %657 = arith.addf %656, %655 : vector<8x64xf32>
    %658 = arith.divf %656, %657 : vector<8x64xf32>
    %659 = vector.extract_strided_slice %658 {offsets = [0, 0], sizes = [8, 32], strides = [1, 1]} : vector<8x64xf32> to vector<8x32xf32>
    %660 = vector.extract_strided_slice %658 {offsets = [0, 32], sizes = [8, 32], strides = [1, 1]} : vector<8x64xf32> to vector<8x32xf32>
    %661 = vector.extract_strided_slice %650 {offsets = [0, 64], sizes = [8, 32], strides = [1, 1]} : vector<8x96xf32> to vector<8x32xf32>
    %662 = vector.extract_strided_slice %649 {offsets = [0, 64], sizes = [8, 32], strides = [1, 1]} : vector<8x96xf32> to vector<8x32xf32>
    %663 = arith.addf %662, %646 : vector<8x32xf32>
    %664 = arith.mulf %659, %663 : vector<8x32xf32>
    %665 = arith.addf %661, %664 : vector<8x32xf32>
    %666 = math.tanh %665 : vector<8x32xf32>
    %cst_161 = arith.constant 1.000000e+00 : f32
    %667 = vector.broadcast %cst_161 : f32 to vector<8x32xf32>
    %668 = arith.subf %667, %660 : vector<8x32xf32>
    %669 = arith.mulf %668, %666 : vector<8x32xf32>
    %670 = arith.mulf %660, %647 : vector<8x32xf32>
    %671 = arith.addf %669, %670 : vector<8x32xf32>
    %c0_162 = arith.constant 0 : index
    %c0_163 = arith.constant 0 : index
    %672 = vector.load %arg23[%c0_162, %c0_163] : memref<64x32xf32, #tpu.memory_space<vmem>>, vector<8x32xf32>
    tpu.vector_store %arg23[%c0_162, %c0_163], %671 {strides = array<i32>} : memref<64x32xf32, #tpu.memory_space<vmem>>, vector<8x32xf32>,
    %673 = arith.truncf %671 : vector<8x32xf32> to vector<8x32xbf16>
    %cst_164 = arith.constant dense<0.000000e+00> : vector<8x96xf32>
    %674 = tpu.matmul %673, %643, %cst_164 {dimension_numbers = #tpu.dot_dimension_numbers<[1], [0], [0], [1], [0, 0, 1, 1], [], []>} : vector<8x32xbf16>, vector<32x96xbf16>, vector<8x96xf32> -> vector<8x96xf32>
    %675 = vector.extract_strided_slice %642 {offsets = [8, 0], sizes = [8, 96], strides = [1, 1]} : vector<64x96xf32> to vector<8x96xf32>
    %676 = vector.extract_strided_slice %675 {offsets = [0, 0], sizes = [8, 64], strides = [1, 1]} : vector<8x96xf32> to vector<8x64xf32>
    %677 = vector.extract_strided_slice %674 {offsets = [0, 0], sizes = [8, 64], strides = [1, 1]} : vector<8x96xf32> to vector<8x64xf32>
    %678 = arith.addf %676, %677 : vector<8x64xf32>
    %679 = arith.negf %678 : vector<8x64xf32>
    %680 = math.exp %679 : vector<8x64xf32>
    %cst_165 = arith.constant 1.000000e+00 : f32
    %681 = vector.broadcast %cst_165 : f32 to vector<8x64xf32>
    %682 = arith.addf %681, %680 : vector<8x64xf32>
    %683 = arith.divf %681, %682 : vector<8x64xf32>
    %684 = vector.extract_strided_slice %683 {offsets = [0, 0], sizes = [8, 32], strides = [1, 1]} : vector<8x64xf32> to vector<8x32xf32>
    %685 = vector.extract_strided_slice %683 {offsets = [0, 32], sizes = [8, 32], strides = [1, 1]} : vector<8x64xf32> to vector<8x32xf32>
    %686 = vector.extract_strided_slice %675 {offsets = [0, 64], sizes = [8, 32], strides = [1, 1]} : vector<8x96xf32> to vector<8x32xf32>
    %687 = vector.extract_strided_slice %674 {offsets = [0, 64], sizes = [8, 32], strides = [1, 1]} : vector<8x96xf32> to vector<8x32xf32>
    %688 = arith.addf %687, %646 : vector<8x32xf32>
    %689 = arith.mulf %684, %688 : vector<8x32xf32>
    %690 = arith.addf %686, %689 : vector<8x32xf32>
    %691 = math.tanh %690 : vector<8x32xf32>
    %cst_166 = arith.constant 1.000000e+00 : f32
    %692 = vector.broadcast %cst_166 : f32 to vector<8x32xf32>
    %693 = arith.subf %692, %685 : vector<8x32xf32>
    %694 = arith.mulf %693, %691 : vector<8x32xf32>
    %695 = arith.mulf %685, %671 : vector<8x32xf32>
    %696 = arith.addf %694, %695 : vector<8x32xf32>
    %c8_167 = arith.constant 8 : index
    %c0_168 = arith.constant 0 : index
    %697 = vector.load %arg23[%c8_167, %c0_168] : memref<64x32xf32, #tpu.memory_space<vmem>>, vector<8x32xf32>
    tpu.vector_store %arg23[%c8_167, %c0_168], %696 {strides = array<i32>} : memref<64x32xf32, #tpu.memory_space<vmem>>, vector<8x32xf32>,
    %698 = arith.truncf %696 : vector<8x32xf32> to vector<8x32xbf16>
    %cst_169 = arith.constant dense<0.000000e+00> : vector<8x96xf32>
    %699 = tpu.matmul %698, %643, %cst_169 {dimension_numbers = #tpu.dot_dimension_numbers<[1], [0], [0], [1], [0, 0, 1, 1], [], []>} : vector<8x32xbf16>, vector<32x96xbf16>, vector<8x96xf32> -> vector<8x96xf32>
    %700 = vector.extract_strided_slice %642 {offsets = [16, 0], sizes = [8, 96], strides = [1, 1]} : vector<64x96xf32> to vector<8x96xf32>
    %701 = vector.extract_strided_slice %700 {offsets = [0, 0], sizes = [8, 64], strides = [1, 1]} : vector<8x96xf32> to vector<8x64xf32>
    %702 = vector.extract_strided_slice %699 {offsets = [0, 0], sizes = [8, 64], strides = [1, 1]} : vector<8x96xf32> to vector<8x64xf32>
    %703 = arith.addf %701, %702 : vector<8x64xf32>
    %704 = arith.negf %703 : vector<8x64xf32>
    %705 = math.exp %704 : vector<8x64xf32>
    %cst_170 = arith.constant 1.000000e+00 : f32
    %706 = vector.broadcast %cst_170 : f32 to vector<8x64xf32>
    %707 = arith.addf %706, %705 : vector<8x64xf32>
    %708 = arith.divf %706, %707 : vector<8x64xf32>
    %709 = vector.extract_strided_slice %708 {offsets = [0, 0], sizes = [8, 32], strides = [1, 1]} : vector<8x64xf32> to vector<8x32xf32>
    %710 = vector.extract_strided_slice %708 {offsets = [0, 32], sizes = [8, 32], strides = [1, 1]} : vector<8x64xf32> to vector<8x32xf32>
    %711 = vector.extract_strided_slice %700 {offsets = [0, 64], sizes = [8, 32], strides = [1, 1]} : vector<8x96xf32> to vector<8x32xf32>
    %712 = vector.extract_strided_slice %699 {offsets = [0, 64], sizes = [8, 32], strides = [1, 1]} : vector<8x96xf32> to vector<8x32xf32>
    %713 = arith.addf %712, %646 : vector<8x32xf32>
    %714 = arith.mulf %709, %713 : vector<8x32xf32>
    %715 = arith.addf %711, %714 : vector<8x32xf32>
    %716 = math.tanh %715 : vector<8x32xf32>
    %cst_171 = arith.constant 1.000000e+00 : f32
    %717 = vector.broadcast %cst_171 : f32 to vector<8x32xf32>
    %718 = arith.subf %717, %710 : vector<8x32xf32>
    %719 = arith.mulf %718, %716 : vector<8x32xf32>
    %720 = arith.mulf %710, %696 : vector<8x32xf32>
    %721 = arith.addf %719, %720 : vector<8x32xf32>
    %c16_172 = arith.constant 16 : index
    %c0_173 = arith.constant 0 : index
    %722 = vector.load %arg23[%c16_172, %c0_173] : memref<64x32xf32, #tpu.memory_space<vmem>>, vector<8x32xf32>
    tpu.vector_store %arg23[%c16_172, %c0_173], %721 {strides = array<i32>} : memref<64x32xf32, #tpu.memory_space<vmem>>, vector<8x32xf32>,
    %723 = arith.truncf %721 : vector<8x32xf32> to vector<8x32xbf16>
    %cst_174 = arith.constant dense<0.000000e+00> : vector<8x96xf32>
    %724 = tpu.matmul %723, %643, %cst_174 {dimension_numbers = #tpu.dot_dimension_numbers<[1], [0], [0], [1], [0, 0, 1, 1], [], []>} : vector<8x32xbf16>, vector<32x96xbf16>, vector<8x96xf32> -> vector<8x96xf32>
    %725 = vector.extract_strided_slice %642 {offsets = [24, 0], sizes = [8, 96], strides = [1, 1]} : vector<64x96xf32> to vector<8x96xf32>
    %726 = vector.extract_strided_slice %725 {offsets = [0, 0], sizes = [8, 64], strides = [1, 1]} : vector<8x96xf32> to vector<8x64xf32>
    %727 = vector.extract_strided_slice %724 {offsets = [0, 0], sizes = [8, 64], strides = [1, 1]} : vector<8x96xf32> to vector<8x64xf32>
    %728 = arith.addf %726, %727 : vector<8x64xf32>
    %729 = arith.negf %728 : vector<8x64xf32>
    %730 = math.exp %729 : vector<8x64xf32>
    %cst_175 = arith.constant 1.000000e+00 : f32
    %731 = vector.broadcast %cst_175 : f32 to vector<8x64xf32>
    %732 = arith.addf %731, %730 : vector<8x64xf32>
    %733 = arith.divf %731, %732 : vector<8x64xf32>
    %734 = vector.extract_strided_slice %733 {offsets = [0, 0], sizes = [8, 32], strides = [1, 1]} : vector<8x64xf32> to vector<8x32xf32>
    %735 = vector.extract_strided_slice %733 {offsets = [0, 32], sizes = [8, 32], strides = [1, 1]} : vector<8x64xf32> to vector<8x32xf32>
    %736 = vector.extract_strided_slice %725 {offsets = [0, 64], sizes = [8, 32], strides = [1, 1]} : vector<8x96xf32> to vector<8x32xf32>
    %737 = vector.extract_strided_slice %724 {offsets = [0, 64], sizes = [8, 32], strides = [1, 1]} : vector<8x96xf32> to vector<8x32xf32>
    %738 = arith.addf %737, %646 : vector<8x32xf32>
    %739 = arith.mulf %734, %738 : vector<8x32xf32>
    %740 = arith.addf %736, %739 : vector<8x32xf32>
    %741 = math.tanh %740 : vector<8x32xf32>
    %cst_176 = arith.constant 1.000000e+00 : f32
    %742 = vector.broadcast %cst_176 : f32 to vector<8x32xf32>
    %743 = arith.subf %742, %735 : vector<8x32xf32>
    %744 = arith.mulf %743, %741 : vector<8x32xf32>
    %745 = arith.mulf %735, %721 : vector<8x32xf32>
    %746 = arith.addf %744, %745 : vector<8x32xf32>
    %c24_177 = arith.constant 24 : index
    %c0_178 = arith.constant 0 : index
    %747 = vector.load %arg23[%c24_177, %c0_178] : memref<64x32xf32, #tpu.memory_space<vmem>>, vector<8x32xf32>
    tpu.vector_store %arg23[%c24_177, %c0_178], %746 {strides = array<i32>} : memref<64x32xf32, #tpu.memory_space<vmem>>, vector<8x32xf32>,
    %748 = arith.truncf %746 : vector<8x32xf32> to vector<8x32xbf16>
    %cst_179 = arith.constant dense<0.000000e+00> : vector<8x96xf32>
    %749 = tpu.matmul %748, %643, %cst_179 {dimension_numbers = #tpu.dot_dimension_numbers<[1], [0], [0], [1], [0, 0, 1, 1], [], []>} : vector<8x32xbf16>, vector<32x96xbf16>, vector<8x96xf32> -> vector<8x96xf32>
    %750 = vector.extract_strided_slice %642 {offsets = [32, 0], sizes = [8, 96], strides = [1, 1]} : vector<64x96xf32> to vector<8x96xf32>
    %751 = vector.extract_strided_slice %750 {offsets = [0, 0], sizes = [8, 64], strides = [1, 1]} : vector<8x96xf32> to vector<8x64xf32>
    %752 = vector.extract_strided_slice %749 {offsets = [0, 0], sizes = [8, 64], strides = [1, 1]} : vector<8x96xf32> to vector<8x64xf32>
    %753 = arith.addf %751, %752 : vector<8x64xf32>
    %754 = arith.negf %753 : vector<8x64xf32>
    %755 = math.exp %754 : vector<8x64xf32>
    %cst_180 = arith.constant 1.000000e+00 : f32
    %756 = vector.broadcast %cst_180 : f32 to vector<8x64xf32>
    %757 = arith.addf %756, %755 : vector<8x64xf32>
    %758 = arith.divf %756, %757 : vector<8x64xf32>
    %759 = vector.extract_strided_slice %758 {offsets = [0, 0], sizes = [8, 32], strides = [1, 1]} : vector<8x64xf32> to vector<8x32xf32>
    %760 = vector.extract_strided_slice %758 {offsets = [0, 32], sizes = [8, 32], strides = [1, 1]} : vector<8x64xf32> to vector<8x32xf32>
    %761 = vector.extract_strided_slice %750 {offsets = [0, 64], sizes = [8, 32], strides = [1, 1]} : vector<8x96xf32> to vector<8x32xf32>
    %762 = vector.extract_strided_slice %749 {offsets = [0, 64], sizes = [8, 32], strides = [1, 1]} : vector<8x96xf32> to vector<8x32xf32>
    %763 = arith.addf %762, %646 : vector<8x32xf32>
    %764 = arith.mulf %759, %763 : vector<8x32xf32>
    %765 = arith.addf %761, %764 : vector<8x32xf32>
    %766 = math.tanh %765 : vector<8x32xf32>
    %cst_181 = arith.constant 1.000000e+00 : f32
    %767 = vector.broadcast %cst_181 : f32 to vector<8x32xf32>
    %768 = arith.subf %767, %760 : vector<8x32xf32>
    %769 = arith.mulf %768, %766 : vector<8x32xf32>
    %770 = arith.mulf %760, %746 : vector<8x32xf32>
    %771 = arith.addf %769, %770 : vector<8x32xf32>
    %c32_182 = arith.constant 32 : index
    %c0_183 = arith.constant 0 : index
    %772 = vector.load %arg23[%c32_182, %c0_183] : memref<64x32xf32, #tpu.memory_space<vmem>>, vector<8x32xf32>
    tpu.vector_store %arg23[%c32_182, %c0_183], %771 {strides = array<i32>} : memref<64x32xf32, #tpu.memory_space<vmem>>, vector<8x32xf32>,
    %773 = arith.truncf %771 : vector<8x32xf32> to vector<8x32xbf16>
    %cst_184 = arith.constant dense<0.000000e+00> : vector<8x96xf32>
    %774 = tpu.matmul %773, %643, %cst_184 {dimension_numbers = #tpu.dot_dimension_numbers<[1], [0], [0], [1], [0, 0, 1, 1], [], []>} : vector<8x32xbf16>, vector<32x96xbf16>, vector<8x96xf32> -> vector<8x96xf32>
    %775 = vector.extract_strided_slice %642 {offsets = [40, 0], sizes = [8, 96], strides = [1, 1]} : vector<64x96xf32> to vector<8x96xf32>
    %776 = vector.extract_strided_slice %775 {offsets = [0, 0], sizes = [8, 64], strides = [1, 1]} : vector<8x96xf32> to vector<8x64xf32>
    %777 = vector.extract_strided_slice %774 {offsets = [0, 0], sizes = [8, 64], strides = [1, 1]} : vector<8x96xf32> to vector<8x64xf32>
    %778 = arith.addf %776, %777 : vector<8x64xf32>
    %779 = arith.negf %778 : vector<8x64xf32>
    %780 = math.exp %779 : vector<8x64xf32>
    %cst_185 = arith.constant 1.000000e+00 : f32
    %781 = vector.broadcast %cst_185 : f32 to vector<8x64xf32>
    %782 = arith.addf %781, %780 : vector<8x64xf32>
    %783 = arith.divf %781, %782 : vector<8x64xf32>
    %784 = vector.extract_strided_slice %783 {offsets = [0, 0], sizes = [8, 32], strides = [1, 1]} : vector<8x64xf32> to vector<8x32xf32>
    %785 = vector.extract_strided_slice %783 {offsets = [0, 32], sizes = [8, 32], strides = [1, 1]} : vector<8x64xf32> to vector<8x32xf32>
    %786 = vector.extract_strided_slice %775 {offsets = [0, 64], sizes = [8, 32], strides = [1, 1]} : vector<8x96xf32> to vector<8x32xf32>
    %787 = vector.extract_strided_slice %774 {offsets = [0, 64], sizes = [8, 32], strides = [1, 1]} : vector<8x96xf32> to vector<8x32xf32>
    %788 = arith.addf %787, %646 : vector<8x32xf32>
    %789 = arith.mulf %784, %788 : vector<8x32xf32>
    %790 = arith.addf %786, %789 : vector<8x32xf32>
    %791 = math.tanh %790 : vector<8x32xf32>
    %cst_186 = arith.constant 1.000000e+00 : f32
    %792 = vector.broadcast %cst_186 : f32 to vector<8x32xf32>
    %793 = arith.subf %792, %785 : vector<8x32xf32>
    %794 = arith.mulf %793, %791 : vector<8x32xf32>
    %795 = arith.mulf %785, %771 : vector<8x32xf32>
    %796 = arith.addf %794, %795 : vector<8x32xf32>
    %c40_187 = arith.constant 40 : index
    %c0_188 = arith.constant 0 : index
    %797 = vector.load %arg23[%c40_187, %c0_188] : memref<64x32xf32, #tpu.memory_space<vmem>>, vector<8x32xf32>
    tpu.vector_store %arg23[%c40_187, %c0_188], %796 {strides = array<i32>} : memref<64x32xf32, #tpu.memory_space<vmem>>, vector<8x32xf32>,
    %798 = arith.truncf %796 : vector<8x32xf32> to vector<8x32xbf16>
    %cst_189 = arith.constant dense<0.000000e+00> : vector<8x96xf32>
    %799 = tpu.matmul %798, %643, %cst_189 {dimension_numbers = #tpu.dot_dimension_numbers<[1], [0], [0], [1], [0, 0, 1, 1], [], []>} : vector<8x32xbf16>, vector<32x96xbf16>, vector<8x96xf32> -> vector<8x96xf32>
    %800 = vector.extract_strided_slice %642 {offsets = [48, 0], sizes = [8, 96], strides = [1, 1]} : vector<64x96xf32> to vector<8x96xf32>
    %801 = vector.extract_strided_slice %800 {offsets = [0, 0], sizes = [8, 64], strides = [1, 1]} : vector<8x96xf32> to vector<8x64xf32>
    %802 = vector.extract_strided_slice %799 {offsets = [0, 0], sizes = [8, 64], strides = [1, 1]} : vector<8x96xf32> to vector<8x64xf32>
    %803 = arith.addf %801, %802 : vector<8x64xf32>
    %804 = arith.negf %803 : vector<8x64xf32>
    %805 = math.exp %804 : vector<8x64xf32>
    %cst_190 = arith.constant 1.000000e+00 : f32
    %806 = vector.broadcast %cst_190 : f32 to vector<8x64xf32>
    %807 = arith.addf %806, %805 : vector<8x64xf32>
    %808 = arith.divf %806, %807 : vector<8x64xf32>
    %809 = vector.extract_strided_slice %808 {offsets = [0, 0], sizes = [8, 32], strides = [1, 1]} : vector<8x64xf32> to vector<8x32xf32>
    %810 = vector.extract_strided_slice %808 {offsets = [0, 32], sizes = [8, 32], strides = [1, 1]} : vector<8x64xf32> to vector<8x32xf32>
    %811 = vector.extract_strided_slice %800 {offsets = [0, 64], sizes = [8, 32], strides = [1, 1]} : vector<8x96xf32> to vector<8x32xf32>
    %812 = vector.extract_strided_slice %799 {offsets = [0, 64], sizes = [8, 32], strides = [1, 1]} : vector<8x96xf32> to vector<8x32xf32>
    %813 = arith.addf %812, %646 : vector<8x32xf32>
    %814 = arith.mulf %809, %813 : vector<8x32xf32>
    %815 = arith.addf %811, %814 : vector<8x32xf32>
    %816 = math.tanh %815 : vector<8x32xf32>
    %cst_191 = arith.constant 1.000000e+00 : f32
    %817 = vector.broadcast %cst_191 : f32 to vector<8x32xf32>
    %818 = arith.subf %817, %810 : vector<8x32xf32>
    %819 = arith.mulf %818, %816 : vector<8x32xf32>
    %820 = arith.mulf %810, %796 : vector<8x32xf32>
    %821 = arith.addf %819, %820 : vector<8x32xf32>
    %c48_192 = arith.constant 48 : index
    %c0_193 = arith.constant 0 : index
    %822 = vector.load %arg23[%c48_192, %c0_193] : memref<64x32xf32, #tpu.memory_space<vmem>>, vector<8x32xf32>
    tpu.vector_store %arg23[%c48_192, %c0_193], %821 {strides = array<i32>} : memref<64x32xf32, #tpu.memory_space<vmem>>, vector<8x32xf32>,
    %823 = arith.truncf %821 : vector<8x32xf32> to vector<8x32xbf16>
    %cst_194 = arith.constant dense<0.000000e+00> : vector<8x96xf32>
    %824 = tpu.matmul %823, %643, %cst_194 {dimension_numbers = #tpu.dot_dimension_numbers<[1], [0], [0], [1], [0, 0, 1, 1], [], []>} : vector<8x32xbf16>, vector<32x96xbf16>, vector<8x96xf32> -> vector<8x96xf32>
    %825 = vector.extract_strided_slice %642 {offsets = [56, 0], sizes = [8, 96], strides = [1, 1]} : vector<64x96xf32> to vector<8x96xf32>
    %826 = vector.extract_strided_slice %825 {offsets = [0, 0], sizes = [8, 64], strides = [1, 1]} : vector<8x96xf32> to vector<8x64xf32>
    %827 = vector.extract_strided_slice %824 {offsets = [0, 0], sizes = [8, 64], strides = [1, 1]} : vector<8x96xf32> to vector<8x64xf32>
    %828 = arith.addf %826, %827 : vector<8x64xf32>
    %829 = arith.negf %828 : vector<8x64xf32>
    %830 = math.exp %829 : vector<8x64xf32>
    %cst_195 = arith.constant 1.000000e+00 : f32
    %831 = vector.broadcast %cst_195 : f32 to vector<8x64xf32>
    %832 = arith.addf %831, %830 : vector<8x64xf32>
    %833 = arith.divf %831, %832 : vector<8x64xf32>
    %834 = vector.extract_strided_slice %833 {offsets = [0, 0], sizes = [8, 32], strides = [1, 1]} : vector<8x64xf32> to vector<8x32xf32>
    %835 = vector.extract_strided_slice %833 {offsets = [0, 32], sizes = [8, 32], strides = [1, 1]} : vector<8x64xf32> to vector<8x32xf32>
    %836 = vector.extract_strided_slice %825 {offsets = [0, 64], sizes = [8, 32], strides = [1, 1]} : vector<8x96xf32> to vector<8x32xf32>
    %837 = vector.extract_strided_slice %824 {offsets = [0, 64], sizes = [8, 32], strides = [1, 1]} : vector<8x96xf32> to vector<8x32xf32>
    %838 = arith.addf %837, %646 : vector<8x32xf32>
    %839 = arith.mulf %834, %838 : vector<8x32xf32>
    %840 = arith.addf %836, %839 : vector<8x32xf32>
    %841 = math.tanh %840 : vector<8x32xf32>
    %cst_196 = arith.constant 1.000000e+00 : f32
    %842 = vector.broadcast %cst_196 : f32 to vector<8x32xf32>
    %843 = arith.subf %842, %835 : vector<8x32xf32>
    %844 = arith.mulf %843, %841 : vector<8x32xf32>
    %845 = arith.mulf %835, %821 : vector<8x32xf32>
    %846 = arith.addf %844, %845 : vector<8x32xf32>
    %c56_197 = arith.constant 56 : index
    %c0_198 = arith.constant 0 : index
    %847 = vector.load %arg23[%c56_197, %c0_198] : memref<64x32xf32, #tpu.memory_space<vmem>>, vector<8x32xf32>
    tpu.vector_store %arg23[%c56_197, %c0_198], %846 {strides = array<i32>} : memref<64x32xf32, #tpu.memory_space<vmem>>, vector<8x32xf32>,
    %c0_199 = arith.constant 0 : index
    %c0_200 = arith.constant 0 : index
    %848 = vector.load %arg23[%c0_199, %c0_200] : memref<64x32xf32, #tpu.memory_space<vmem>>, vector<64x32xf32>
    %849 = arith.truncf %848 : vector<64x32xf32> to vector<64x32xbf16>
    %c0_201 = arith.constant 0 : index
    %c0_202 = arith.constant 0 : index
    %850 = vector.load %arg17[%c0_201, %c0_202] : memref<32x4xbf16, #tpu.memory_space<vmem>>, vector<32x4xbf16>
    %cst_203 = arith.constant dense<0.000000e+00> : vector<64x4xf32>
    %851 = tpu.matmul %849, %850, %cst_203 {dimension_numbers = #tpu.dot_dimension_numbers<[1], [0], [0], [1], [0, 0, 1, 1], [], []>} : vector<64x32xbf16>, vector<32x4xbf16>, vector<64x4xf32> -> vector<64x4xf32>
    %c0_204 = arith.constant 0 : index
    %c0_205 = arith.constant 0 : index
    %852 = vector.load %arg18[%c0_204, %c0_205] : memref<1x4xf32, #tpu.memory_space<vmem>>, vector<1x4xf32>
    %853 = vector.broadcast %852 : vector<1x4xf32> to vector<64x4xf32>
    %854 = arith.addf %851, %853 : vector<64x4xf32>
    %c0_206 = arith.constant 0 : index
    %c0_207 = arith.constant 0 : index
    %855 = vector.load %arg19[%c0_206, %c0_207] : memref<64x4xf32, #tpu.memory_space<vmem>>, vector<64x4xf32>
    tpu.vector_store %arg19[%c0_206, %c0_207], %854 {strides = array<i32>} : memref<64x4xf32, #tpu.memory_space<vmem>>, vector<64x4xf32>,
    return
  }
}

</mosaic_0001>

<bundles_post_ra>
// kernel: lstm_simple_forward.1
= control target key start
LH: loop header
LB: loop body
LE: loop exit
PB: predicated region body
PF: predicated region fallthrough
CT: control target
= control target key end

     0   :  { %vm96_vm0 = vcmask 1041408   ;;  %vm83_vm1 = vcmask 31744   ;;  %v3901_v10 = vmov 0.0   ;;  %vm3902_vm2 = vmmov 0   ;;  %s3906_s23 = smov 32   ;;  %s4862_s1 = inlined_call_operand.vmem [shape: bf16[4,96], index: 1, kind: input, shape index: {}]   ;;  %s4863_s0 = inlined_call_operand.vmem [shape: f32[64,4], index: 0, kind: input, shape index: {}]   ;;  %s4864_s2 = inlined_call_operand.vmem [shape: bf16[32,96], index: 2, kind: input, shape index: {}]   ;;  %s4865_s4 = inlined_call_operand.vmem [shape: f32[1,32], index: 4, kind: input, shape index: {}]   ;;  %s4866_s3 = inlined_call_operand.vmem [shape: f32[1,96], index: 3, kind: input, shape index: {}]   ;;  %s4867_s6 = inlined_call_operand.vmem [shape: bf16[16,48], index: 6, kind: input, shape index: {}]   ;;  %s4868_s5 = inlined_call_operand.vmem [shape: bf16[32,48], index: 5, kind: input, shape index: {}]   ;;  %s4869_s8 = inlined_call_operand.vmem [shape: f32[1,16], index: 8, kind: input, shape index: {}]   ;;  %s4870_s7 = inlined_call_operand.vmem [shape: f32[1,48], index: 7, kind: input, shape index: {}]   ;;  %s4871_s10 = inlined_call_operand.vmem [shape: bf16[16,48], index: 10, kind: input, shape index: {}]   ;;  %s4872_s9 = inlined_call_operand.vmem [shape: bf16[16,48], index: 9, kind: input, shape index: {}]   ;;  %s4873_s12 = inlined_call_operand.vmem [shape: f32[1,16], index: 12, kind: input, shape index: {}]   ;;  %s4874_s11 = inlined_call_operand.vmem [shape: f32[1,48], index: 11, kind: input, shape index: {}]   ;;  %s4875_s14 = inlined_call_operand.vmem [shape: bf16[32,96], index: 14, kind: input, shape index: {}]   ;;  %s4876_s13 = inlined_call_operand.vmem [shape: bf16[16,96], index: 13, kind: input, shape index: {}]   ;;  %s4877_s16 = inlined_call_operand.vmem [shape: f32[1,32], index: 16, kind: input, shape index: {}]   ;;  %s4878_s15 = inlined_call_operand.vmem [shape: f32[1,96], index: 15, kind: input, shape index: {}]   ;;  %s4879_s17 = inlined_call_operand.vmem [shape: bf16[32,4], index: 17, kind: input, shape index: {}]   ;;  %s4880_s18 = inlined_call_operand.vmem [shape: f32[1,4], index: 18, kind: input, shape index: {}]   ;;  %s4881_s19 = inlined_call_operand.vmem [shape: f32[64,4], index: 19, kind: output, shape index: {}]  }
   0x1   :  { %4884 = sst [smem:[#allocation6_spill]] %s4862_s1  ;;  %v3904_v18 = vmov 0   ;;  %v3200_v19 = vld [vmem:[%s4866_s3] ss:$0 sm:$0xff]  ;;  %s3905_s3 = smov 96   ;;  %vm187_vm3 = vcmask 261120  }
   0x2   :  { %4885 = sst [smem:[#allocation7_spill]] %s4863_s0  ;;  %s4888_s20 = sld [smem:[#allocation6_spill]]  ;;  %vm945_vm4 = vcmask 130048  }
   0x3   :  { %4886 = sst [smem:[#allocation8_spill]] %s4864_s2  ;;  %s4889_s22 = sld [smem:[#allocation7_spill]] }
   0x4   :  { %4887 = sst [smem:[#allocation9_spill]] %s4865_s4  ;;  %s4890_s29 = sld [smem:[#allocation8_spill]] }
   0x5   :  { %s4891_s26 = sld [smem:[#allocation9_spill]]  ;;  %s3907_s4 = smov 112  }
   0x8   :  { %v75_v0 = vld [vmem:[%s4888_s20] sm:$0x3] }
   0x9   :  { %v67_v1 = vld [vmem:[%s4889_s22 + $0x20] sm:$0xff]  ;;  %v68_v2 = vld [vmem:[%s4889_s22 + $0x28] sm:$0xff]  ;;  %3689 = vmatprep.subr.msk.bf16.mxu1 %vm96_vm0, %v75_v0  ;;  %v98_v3 = vsel %vm96_vm0, %v75_v0, 0  ;;  %v69_v5 = vld [vmem:[%s4889_s22 + $0x30] sm:$0xff]  ;;  %3688 = vmatprep.subr.msk.bf16.mxu0 %vm96_vm0, %v75_v0 }
   0xa   :  { %v73_v4 = vpack.c.bf16 %v68_v2, %v67_v1  ;;  %v70_v6 = vld [vmem:[%s4889_s22 + $0x38] sm:$0xff]  ;;  %3687 = vmatpush3.bf16.msra.mxu1 %v98_v3  ;;  %v4026_v8 = vld [vmem:[%s4890_s29] sm:$0xff]   ;;  %3409 = vmatpush3.bf16.msra.mxu0 %v98_v3  ;;  %v64_v11 = vld [vmem:[%s4889_s22 + $0x8] sm:$0xff] }
   0xb   :  { %v74_v7 = vpack.c.bf16 %v70_v6, %v69_v5  ;;  %v63_v9 = vld [vmem:[%s4889_s22] sm:$0xff]  ;;  %3418 = vmatprep.subr.bf16.mxu1 %v3901_v10  ;;  %v65_v13 = vld [vmem:[%s4889_s22 + $0x10] sm:$0xff]  ;;  %v66_v14 = vld [vmem:[%s4889_s22 + $0x18] sm:$0xff]  ;;  %3434 = vmatprep.subr.bf16.mxu0 %v3901_v10  ;;  %s3903_s22 = smov 64  }
   0xc   :  { %3414 = vmatprep.mubr.msk.bf16.mxu1 %vm83_vm1, %v73_v4  ;;  %v71_v12 = vpack.c.bf16 %v64_v11, %v63_v9  ;;  %v72_v15 = vpack.c.bf16 %v66_v14, %v65_v13  ;;  %v3205_v16 = vld [vmem:[%s4891_s26] ss:$0 sm:$0xff]  ;;  %v4052_v17 = vld [vmem:[%s4890_s29 + $0x8] sm:$0xff]  }
   0xd   :  { %3415 = vmatmul.mubr.msk.bf16.vlgmr.msra.gmra.mrb[0].mxu1 %vm83_vm1, %v74_v7  ;;  %238 = vrot.lane.b32.xlu0 %v3205_v16, %s3903_s22 }
   0xe   :  { %3419 = vmatpush3.bf16.msra.mxu1 %v4026_v8  ;;  %3410 = vmatprep.mubr.msk.bf16.mxu0 %vm83_vm1, %v71_v12 }
   0xf   :  { %3420 = vmatprep.subr.bf16.mxu1 %v3901_v10  ;;  %3411 = vmatmul.mubr.msk.bf16.vlgmr.msra.gmra.mrb[0].mxu0 %vm83_vm1, %v72_v15 }
  0x10   :  { %3422 = vmatprep.mubr.msk.bf16.mxu1 %vm3902_vm2, %v3901_v10  ;;  %3435 = vmatpush3.bf16.msra.mxu0 %v4026_v8 }
  0x11   :  { %3438 = vmatprep.mubr.msk.bf16.mxu0 %vm3902_vm2, %v3901_v10  ;;  %3436 = vmatprep.subr.bf16.mxu0 %v3901_v10 }
  0x12   :  { %3421 = vmatpush3.bf16.msra.mxu1 %v4052_v17 }
  0x13   :  { %3426 = vmatprep.subr.bf16.mxu1 %v3901_v10 }
  0x14   :  { %3437 = vmatpush3.bf16.msra.mxu0 %v4052_v17 }
  0x15   :  { %3423 = vmatmul.mubr.bf16.vlgmr.msra.gmra.mrb[4].mxu1 %v3904_v18  ;;  %3450 = vmatprep.subr.bf16.mxu0 %v3901_v10 }
  0x16   :  { %3427 = vmatpush3.bf16.msra.mxu1 %v4026_v8  ;;  %3430 = vmatprep.mubr.msk.bf16.mxu1 %vm3902_vm2, %v3901_v10 }
  0x17   :  { %3428 = vmatprep.subr.bf16.mxu1 %v3901_v10 }
  0x1a   :  { %3429 = vmatpush3.bf16.msra.mxu1 %v4052_v17 }
  0x1b   :  { %3442 = vmatprep.subr.bf16.mxu1 %v3901_v10 }
  0x7f   :  { %v4089_v34 = vpop.permute.xlu0 %238 }
  0xe0   :  { %v3416_v20 = vpop.f32.mrb[0].mxu1 }
  0xe1   :  { %v4077_v21 = vadd.f32 %v3416_v20, %v3200_v19  ;;  %v150_v22 = vpop.f32.mrb[1].mxu1 }
  0xe2   :  { %v4079_v23 = vadd.f32 %v3200_v19, %v150_v22  ;;  %v3417_v24 = vpop.f32.mrb[2].mxu1  ;;  %v3412_v25 = vpop.f32.mrb[0].mxu0 }
  0xe3   :  { %v4081_v26 = vadd.f32 %v3417_v24, %v3200_v19  ;;  %v153_v27 = vpop.f32.mrb[3].mxu1  ;;  %v4083_v28 = vadd.f32 %v3412_v25, %v3200_v19  ;;  %v134_v29 = vpop.f32.mrb[1].mxu0 }
  0xe4   :  { %v4085_v30 = vadd.f32 %v3200_v19, %v153_v27  ;;  %v3413_v31 = vpop.f32.mrb[2].mxu0  ;;  %v135_v41 = vadd.f32 %v3200_v19, %v134_v29 }
  0xe5   :  { %v4087_v32 = vadd.f32 %v3413_v31, %v3200_v19  ;;  %v137_v33 = vpop.f32.mrb[3].mxu0 }
  0xe6   :  { %v138_v35 = vadd.f32 %v3200_v19, %v137_v33 }
  0xe8   :  { %v225_v36 = vpop.f32.mrb[4].mxu1 }
  0xe9   :  { %v241_v37 = vadd.f32 %v4089_v34, %v225_v36  ;;  %v3424_v38 = vpop.f32.mrb[5].mxu1  ;;  %v231_v42 = vadd.f32 %v225_v36, %v135_v41 }
  0xea   :  { %v228_v39 = vpop.f32.mrb[6].mxu1 }
  0xeb   :  { %243 = vrot.lane.b32.xlu0 %v241_v37, %s3903_s22  ;;  %v3425_v40 = vpop.f32.mrb[7].mxu1  ;;  %v3208_v43 = vmul.f32 -1.442695, %v231_v42 }
  0xed   :  { %3709 = vpow2.f32 %v3208_v43 }
  0xf7   :  { %v3710_v44 = vpop.eup %3709 }
  0xf8   :  { %v235_v45 = vadd.f32 1.0, %v3710_v44 }
  0xfa   :  { %3711 = vrcp.f32 %v235_v45 }
 0x104   :  { %v3712_v46 = vpop.eup %3711 }
 0x105   :  { %v253_v52 = vsub.f32 1.0, %v3712_v46  ;;  %v259_v54 = vmul.f32 0.0, %v3712_v46 }
 0x15d   :  { %v244_v47 = vpop.permute.xlu0 %243 }
 0x15e   :  { %v246_v48 = vmul.f32 %v3712_v46, %v244_v47 }
 0x160   :  { %248 = vrot.lane.b32.xlu1 %v246_v48, %s3903_s22 }
 0x1d2   :  { %v249_v49 = vpop.permute.xlu1 %248 }
 0x1d3   :  { %v251_v50 = vadd.f32 %v249_v49, %v135_v41 }
 0x1d5   :  { %3713 = vtanh.f32 %v251_v50 }
 0x1df   :  { %v3714_v51 = vpop.eup %3713 }
 0x1e0   :  { %255 = vrot.lane.b32.xlu1 %v3714_v51, %s3905_s3 }
 0x252   :  { %v256_v53 = vpop.permute.xlu1 %255 }
 0x253   :  { %v258_v55 = vmul.f32 %v256_v53, %v253_v52 }
 0x255   :  { %v4095_v56 = vadd.f32 %v259_v54, %v258_v55 }
 0x257   :  { %v266_v57 = vpack.c.bf16 %v4095_v56, %v4095_v56 }
 0x259   :  { %268 = vrot.lane.b32.xlu0 %v266_v57, %s3905_s3 }
 0x2cb   :  { %v269_v58 = vpop.permute.xlu0 %268 }
 0x2cc   :  { %3431 = vmatmul.mubr.msk.bf16.vlgmr.msra.gmra.mrb[8].mxu1 %vm187_vm3, %v269_v58 }
 0x2cd   :  { %3443 = vmatpush3.bf16.msra.mxu1 %v4026_v8  ;;  %3446 = vmatprep.mubr.msk.bf16.mxu1 %vm3902_vm2, %v3901_v10 }
 0x2ce   :  { %3444 = vmatprep.subr.bf16.mxu1 %v3901_v10 }
 0x2d1   :  { %3445 = vmatpush3.bf16.msra.mxu1 %v4052_v17 }
 0x2d2   :  { %3458 = vmatprep.subr.bf16.mxu1 %v3901_v10 }
 0x39f   :  { %v307_v59 = vpop.f32.mrb[8].mxu1 }
 0x3a0   :  { %v320_v60 = vadd.f32 %v307_v59, %v4089_v34  ;;  %v3432_v61 = vpop.f32.mrb[9].mxu1  ;;  %v313_v0 = vadd.f32 %v307_v59, %v138_v35 }
 0x3a1   :  { %v310_v62 = vpop.f32.mrb[10].mxu1 }
 0x3a2   :  { %322 = vrot.lane.b32.xlu1 %v320_v60, %s3903_s22  ;;  %v3433_v63 = vpop.f32.mrb[11].mxu1  ;;  %v3210_v1 = vmul.f32 -1.442695, %v313_v0 }
 0x3a4   :  { %3715 = vpow2.f32 %v3210_v1 }
 0x3ae   :  { %v3716_v2 = vpop.eup %3715 }
 0x3af   :  { %v317_v3 = vadd.f32 1.0, %v3716_v2 }
 0x3b1   :  { %3717 = vrcp.f32 %v317_v3 }
 0x3bb   :  { %v3718_v4 = vpop.eup %3717 }
 0x3bc   :  { %v332_v12 = vsub.f32 1.0, %v3718_v4  ;;  %v338_v14 = vmul.f32 %v3718_v4, %v4095_v56 }
 0x414   :  { %v323_v5 = vpop.permute.xlu1 %322 }
 0x415   :  { %v325_v6 = vmul.f32 %v3718_v4, %v323_v5 }
 0x417   :  { %327 = vrot.lane.b32.xlu0 %v325_v6, %s3903_s22 }
 0x489   :  { %v328_v7 = vpop.permute.xlu0 %327 }
 0x48a   :  { %v330_v9 = vadd.f32 %v328_v7, %v138_v35 }
 0x48c   :  { %3719 = vtanh.f32 %v330_v9 }
 0x496   :  { %v3720_v11 = vpop.eup %3719 }
 0x497   :  { %334 = vrot.lane.b32.xlu1 %v3720_v11, %s3905_s3 }
 0x509   :  { %v335_v13 = vpop.permute.xlu1 %334 }
 0x50a   :  { %v337_v15 = vmul.f32 %v335_v13, %v332_v12 }
 0x50c   :  { %v4112_v16 = vadd.f32 %v338_v14, %v337_v15 }
 0x50e   :  { %v345_v19 = vpack.c.bf16 %v4112_v16, %v4112_v16 }
 0x510   :  { %347 = vrot.lane.b32.xlu0 %v345_v19, %s3905_s3 }
 0x582   :  { %v348_v20 = vpop.permute.xlu0 %347 }
 0x583   :  { %3439 = vmatmul.mubr.msk.bf16.vlgmr.msra.gmra.mrb[4].mxu0 %vm187_vm3, %v348_v20 }
 0x584   :  { %3451 = vmatpush3.bf16.msra.mxu0 %v4026_v8  ;;  %3454 = vmatprep.mubr.msk.bf16.mxu0 %vm3902_vm2, %v3901_v10 }
 0x585   :  { %3452 = vmatprep.subr.bf16.mxu0 %v3901_v10 }
 0x588   :  { %3453 = vmatpush3.bf16.msra.mxu0 %v4052_v17 }
 0x589   :  { %3466 = vmatprep.subr.bf16.mxu0 %v3901_v10 }
 0x656   :  { %v386_v22 = vpop.f32.mrb[4].mxu0 }
 0x657   :  { %v399_v24 = vadd.f32 %v386_v22, %v4089_v34  ;;  %v3440_v25 = vpop.f32.mrb[5].mxu0  ;;  %v392_v31 = vadd.f32 %v386_v22, %v4083_v28 }
 0x658   :  { %v389_v27 = vpop.f32.mrb[6].mxu0 }
 0x659   :  { %401 = vrot.lane.b32.xlu1 %v399_v24, %s3903_s22  ;;  %v3441_v29 = vpop.f32.mrb[7].mxu0  ;;  %v3212_v33 = vmul.f32 -1.442695, %v392_v31 }
 0x65b   :  { %3721 = vpow2.f32 %v3212_v33 }
 0x665   :  { %v3722_v35 = vpop.eup %3721 }
 0x666   :  { %v396_v36 = vadd.f32 1.0, %v3722_v35 }
 0x668   :  { %3723 = vrcp.f32 %v396_v36 }
 0x672   :  { %v3724_v37 = vpop.eup %3723 }
 0x673   :  { %v411_v43 = vsub.f32 1.0, %v3724_v37  ;;  %v417_v45 = vmul.f32 %v3724_v37, %v4112_v16 }
 0x6cb   :  { %v402_v38 = vpop.permute.xlu1 %401 }
 0x6cc   :  { %v404_v39 = vmul.f32 %v3724_v37, %v402_v38 }
 0x6ce   :  { %406 = vrot.lane.b32.xlu0 %v404_v39, %s3903_s22 }
 0x740   :  { %v407_v40 = vpop.permute.xlu0 %406 }
 0x741   :  { %v409_v41 = vadd.f32 %v407_v40, %v4083_v28 }
 0x743   :  { %3725 = vtanh.f32 %v409_v41 }
 0x74d   :  { %v3726_v42 = vpop.eup %3725 }
 0x74e   :  { %413 = vrot.lane.b32.xlu1 %v3726_v42, %s3905_s3 }
 0x7c0   :  { %v414_v44 = vpop.permute.xlu1 %413 }
 0x7c1   :  { %v416_v46 = vmul.f32 %v414_v44, %v411_v43 }
 0x7c3   :  { %v4131_v47 = vadd.f32 %v417_v45, %v416_v46 }
 0x7c5   :  { %v424_v48 = vpack.c.bf16 %v4131_v47, %v4131_v47 }
 0x7c7   :  { %426 = vrot.lane.b32.xlu0 %v424_v48, %s3905_s3 }
 0x839   :  { %v427_v49 = vpop.permute.xlu0 %426 }
 0x83a   :  { %3447 = vmatmul.mubr.msk.bf16.vlgmr.msra.gmra.mrb[12].mxu1 %vm187_vm3, %v427_v49 }
 0x83b   :  { %3459 = vmatpush3.bf16.msra.mxu1 %v4026_v8  ;;  %3462 = vmatprep.mubr.msk.bf16.mxu1 %vm3902_vm2, %v3901_v10 }
 0x83c   :  { %3460 = vmatprep.subr.bf16.mxu1 %v3901_v10 }
 0x83f   :  { %3461 = vmatpush3.bf16.msra.mxu1 %v4052_v17 }
 0x840   :  { %3474 = vmatprep.subr.bf16.mxu1 %v3901_v10 }
 0x90d   :  { %v465_v28 = vpop.f32.mrb[12].mxu1 }
 0x90e   :  { %v478_v50 = vadd.f32 %v465_v28, %v4089_v34  ;;  %v3448_v51 = vpop.f32.mrb[13].mxu1  ;;  %v471_v54 = vadd.f32 %v465_v28, %v4087_v32 }
 0x90f   :  { %v468_v52 = vpop.f32.mrb[14].mxu1 }
 0x910   :  { %480 = vrot.lane.b32.xlu1 %v478_v50, %s3903_s22  ;;  %v3449_v53 = vpop.f32.mrb[15].mxu1  ;;  %v3214_v55 = vmul.f32 -1.442695, %v471_v54 }
 0x912   :  { %3727 = vpow2.f32 %v3214_v55 }
 0x91c   :  { %v3728_v57 = vpop.eup %3727 }
 0x91d   :  { %v475_v58 = vadd.f32 1.0, %v3728_v57 }
 0x91f   :  { %3729 = vrcp.f32 %v475_v58 }
 0x929   :  { %v3730_v59 = vpop.eup %3729 }
 0x92a   :  { %v490_v1 = vsub.f32 1.0, %v3730_v59  ;;  %v496_v3 = vmul.f32 %v3730_v59, %v4131_v47 }
 0x982   :  { %v481_v60 = vpop.permute.xlu1 %480 }
 0x983   :  { %v483_v61 = vmul.f32 %v3730_v59, %v481_v60 }
 0x985   :  { %485 = vrot.lane.b32.xlu0 %v483_v61, %s3903_s22 }
 0x9f7   :  { %v486_v62 = vpop.permute.xlu0 %485 }
 0x9f8   :  { %v488_v63 = vadd.f32 %v486_v62, %v4087_v32 }
 0x9fa   :  { %3731 = vtanh.f32 %v488_v63 }
 0xa04   :  { %v3732_v0 = vpop.eup %3731 }
 0xa05   :  { %492 = vrot.lane.b32.xlu1 %v3732_v0, %s3905_s3 }
 0xa77   :  { %v493_v2 = vpop.permute.xlu1 %492 }
 0xa78   :  { %v495_v4 = vmul.f32 %v493_v2, %v490_v1 }
 0xa7a   :  { %v4150_v5 = vadd.f32 %v496_v3, %v495_v4 }
 0xa7c   :  { %v503_v6 = vpack.c.bf16 %v4150_v5, %v4150_v5 }
 0xa7e   :  { %505 = vrot.lane.b32.xlu0 %v503_v6, %s3905_s3 }
 0xaf0   :  { %v506_v7 = vpop.permute.xlu0 %505 }
 0xaf1   :  { %3455 = vmatmul.mubr.msk.bf16.vlgmr.msra.gmra.mrb[8].mxu0 %vm187_vm3, %v506_v7 }
 0xaf2   :  { %3467 = vmatpush3.bf16.msra.mxu0 %v4026_v8  ;;  %3470 = vmatprep.mubr.msk.bf16.mxu0 %vm3902_vm2, %v3901_v10 }
 0xaf3   :  { %3468 = vmatprep.subr.bf16.mxu0 %v3901_v10 }
 0xaf6   :  { %3469 = vmatpush3.bf16.msra.mxu0 %v4052_v17 }
 0xbc4   :  { %v544_v32 = vpop.f32.mrb[8].mxu0 }
 0xbc5   :  { %v557_v9 = vadd.f32 %v544_v32, %v4089_v34  ;;  %v3456_v11 = vpop.f32.mrb[9].mxu0  ;;  %v550_v14 = vadd.f32 %v544_v32, %v4079_v23 }
 0xbc6   :  { %v547_v12 = vpop.f32.mrb[10].mxu0 }
 0xbc7   :  { %559 = vrot.lane.b32.xlu1 %v557_v9, %s3903_s22  ;;  %v3457_v13 = vpop.f32.mrb[11].mxu0  ;;  %v3216_v15 = vmul.f32 -1.442695, %v550_v14 }
 0xbc9   :  { %3733 = vpow2.f32 %v3216_v15 }
 0xbd3   :  { %v3734_v19 = vpop.eup %3733 }
 0xbd4   :  { %v554_v20 = vadd.f32 1.0, %v3734_v19 }
 0xbd6   :  { %3735 = vrcp.f32 %v554_v20  ;;  %v3700_v20 = vld [vmem:[%s4868_s5] sm:$0xff]  }
 0xbd7   :  { %3482 = vmatprep.subr.bf16.mxu0 %v3700_v20 }
 0xbe0   :  { %v3736_v22 = vpop.eup %3735 }
 0xbe1   :  { %v569_v33 = vsub.f32 1.0, %v3736_v22  ;;  %v575_v36 = vmul.f32 %v3736_v22, %v4150_v5 }
 0xc39   :  { %v560_v24 = vpop.permute.xlu1 %559 }
 0xc3a   :  { %v562_v25 = vmul.f32 %v3736_v22, %v560_v24  ;;  %v3701_v22 = vld [vmem:[%s4868_s5 + $0x8] sm:$0xff]  }
 0xc3c   :  { %564 = vrot.lane.b32.xlu0 %v562_v25, %s3903_s22  ;;  %v3230_v25 = vld [vmem:[%s4869_s8] ss:$0 sm:$0xff] }
 0xcae   :  { %v565_v27 = vpop.permute.xlu0 %564 }
 0xcaf   :  { %v567_v29 = vadd.f32 %v565_v27, %v4079_v23  ;;  %v4229_v27 = vld [vmem:[%s4867_s6] sm:$0xff]  }
 0xcb1   :  { %3737 = vtanh.f32 %v567_v29 }
 0xcbb   :  { %v3738_v31 = vpop.eup %3737 }
 0xcbc   :  { %571 = vrot.lane.b32.xlu1 %v3738_v31, %s3905_s3 }
 0xd2e   :  { %v572_v35 = vpop.permute.xlu1 %571 }
 0xd2f   :  { %v574_v37 = vmul.f32 %v572_v35, %v569_v33 }
 0xd31   :  { %v4168_v38 = vadd.f32 %v575_v36, %v574_v37 }
 0xd33   :  { %v582_v39 = vpack.c.bf16 %v4168_v38, %v4168_v38 }
 0xd35   :  { %584 = vrot.lane.b32.xlu0 %v582_v39, %s3905_s3 }
 0xda7   :  { %v585_v40 = vpop.permute.xlu0 %584 }
 0xda8   :  { %3463 = vmatmul.mubr.msk.bf16.vlgmr.msra.gmra.mrb[16].mxu1 %vm187_vm3, %v585_v40 }
 0xda9   :  { %3475 = vmatpush3.bf16.msra.mxu1 %v4026_v8  ;;  %3478 = vmatprep.mubr.msk.bf16.mxu1 %vm3902_vm2, %v3901_v10 }
 0xdaa   :  { %3476 = vmatprep.subr.bf16.mxu1 %v3901_v10 }
 0xdad   :  { %3477 = vmatpush3.bf16.msra.mxu1 %v4052_v17 }
 0xdae   :  { %3494 = vmatprep.subr.bf16.mxu1 %v3901_v10 }
 0xe7b   :  { %v623_v23 = vpop.f32.mrb[16].mxu1 }
 0xe7c   :  { %v636_v41 = vadd.f32 %v623_v23, %v4089_v34  ;;  %v3464_v42 = vpop.f32.mrb[17].mxu1  ;;  %v629_v45 = vadd.f32 %v623_v23, %v4085_v30 }
 0xe7d   :  { %v626_v43 = vpop.f32.mrb[18].mxu1 }
 0xe7e   :  { %638 = vrot.lane.b32.xlu1 %v636_v41, %s3903_s22  ;;  %v3465_v44 = vpop.f32.mrb[19].mxu1  ;;  %v3218_v8 = vmul.f32 -1.442695, %v629_v45 }
 0xe80   :  { %3739 = vpow2.f32 %v3218_v8 }
 0xe8a   :  { %v3740_v46 = vpop.eup %3739 }
 0xe8b   :  { %v633_v48 = vadd.f32 1.0, %v3740_v46 }
 0xe8d   :  { %3741 = vrcp.f32 %v633_v48 }
 0xe97   :  { %v3742_v49 = vpop.eup %3741 }
 0xe98   :  { %v648_v53 = vsub.f32 1.0, %v3742_v49  ;;  %v654_v55 = vmul.f32 %v3742_v49, %v4168_v38 }
 0xef0   :  { %v639_v28 = vpop.permute.xlu1 %638 }
 0xef1   :  { %v641_v17 = vmul.f32 %v3742_v49, %v639_v28 }
 0xef3   :  { %643 = vrot.lane.b32.xlu0 %v641_v17, %s3903_s22 }
 0xf65   :  { %v644_v50 = vpop.permute.xlu0 %643 }
 0xf66   :  { %v646_v51 = vadd.f32 %v644_v50, %v4085_v30 }
 0xf68   :  { %3743 = vtanh.f32 %v646_v51  ;;  %v4260_v51 = vld [vmem:[%s4870_s7] ss:$0 sm:$0xff] }
 0xf72   :  { %v3744_v52 = vpop.eup %3743 }
 0xf73   :  { %650 = vrot.lane.b32.xlu1 %v3744_v52, %s3905_s3 }
 0xfe5   :  { %v651_v54 = vpop.permute.xlu1 %650 }
 0xfe6   :  { %v653_v57 = vmul.f32 %v651_v54, %v648_v53 }
 0xfe8   :  { %v4187_v58 = vadd.f32 %v654_v55, %v653_v57 }
 0xfea   :  { %v661_v59 = vpack.c.bf16 %v4187_v58, %v4187_v58 }
 0xfec   :  { %663 = vrot.lane.b32.xlu0 %v661_v59, %s3905_s3 }
0x105e   :  { %v664_v60 = vpop.permute.xlu0 %663 }
0x105f   :  { %3471 = vmatmul.mubr.msk.bf16.vlgmr.msra.gmra.mrb[12].mxu0 %vm187_vm3, %v664_v60 }
0x1060   :  { %3483 = vmatpush3.bf16.msra.mxu0 %v3700_v20 }
0x1061   :  { %3484 = vmatprep.subr.bf16.mxu0 %v3701_v22 }
0x1064   :  { %3485 = vmatpush3.bf16.msra.mxu0 %v3701_v22 }
0x1065   :  { %3506 = vmatprep.subr.bf16.mxu0 %v3901_v10 }
0x1132   :  { %v702_v30 = vpop.f32.mrb[12].mxu0 }
0x1133   :  { %v715_v61 = vadd.f32 %v702_v30, %v4089_v34  ;;  %v3472_v62 = vpop.f32.mrb[13].mxu0  ;;  %v708_v1 = vadd.f32 %v702_v30, %v4077_v21 }
0x1134   :  { %v705_v63 = vpop.f32.mrb[14].mxu0 }
0x1135   :  { %717 = vrot.lane.b32.xlu1 %v715_v61, %s3903_s22  ;;  %v3473_v0 = vpop.f32.mrb[15].mxu0  ;;  %v3220_v2 = vmul.f32 -1.442695, %v708_v1 }
0x1137   :  { %3745 = vpow2.f32 %v3220_v2 }
0x1141   :  { %v3746_v3 = vpop.eup %3745 }
0x1142   :  { %v712_v4 = vadd.f32 1.0, %v3746_v3 }
0x1144   :  { %3747 = vrcp.f32 %v712_v4 }
0x114e   :  { %v3748_v6 = vpop.eup %3747 }
0x114f   :  { %v727_v13 = vsub.f32 1.0, %v3748_v6  ;;  %v733_v15 = vmul.f32 %v3748_v6, %v4187_v58 }
0x11a7   :  { %v718_v7 = vpop.permute.xlu1 %717 }
0x11a8   :  { %v720_v32 = vmul.f32 %v3748_v6, %v718_v7 }
0x11aa   :  { %722 = vrot.lane.b32.xlu0 %v720_v32, %s3903_s22 }
0x121c   :  { %v723_v9 = vpop.permute.xlu0 %722 }
0x121d   :  { %v725_v11 = vadd.f32 %v723_v9, %v4077_v21 }
0x121f   :  { %3749 = vtanh.f32 %v725_v11 }
0x1229   :  { %v3750_v12 = vpop.eup %3749 }
0x122a   :  { %729 = vrot.lane.b32.xlu1 %v3750_v12, %s3905_s3 }
0x122e   :  { %262 = vrot.lane.b32.xlu1 %v4095_v56, %s3905_s3 }
0x1232   :  { %420 = vrot.lane.b32.xlu1 %v4131_v47, %s3905_s3 }
0x1236   :  { %995 = vrot.lane.b32.xlu1 %v3230_v25, %s3906_s23 }
0x129c   :  { %v730_v14 = vpop.permute.xlu1 %729 }
0x129d   :  { %v732_v19 = vmul.f32 %v730_v14, %v727_v13 }
0x129f   :  { %v4207_v21 = vadd.f32 %v733_v15, %v732_v19 }
0x12a0   :  { %v263_v24 = vpop.permute.xlu1 %262 }
0x12a1   :  { %265 = vst.msk [vmem:[#allocation2] sm:$0xff] %vm187_vm3, %v263_v24  ;;  %v740_v56 = vpack.c.bf16 %v4207_v21, %v4207_v21 }
0x12a3   :  { %742 = vrot.lane.b32.xlu0 %v740_v56, %s3905_s3 }
0x12a4   :  { %v421_v47 = vpop.permute.xlu1 %420 }
0x12a5   :  { %423 = vst.msk [vmem:[#allocation2 + $0x10] sm:$0xff] %vm187_vm3, %v421_v47 }
0x12a7   :  { %341 = vrot.lane.b32.xlu0 %v4112_v16, %s3905_s3 }
0x12a8   :  { %v4247_v43 = vpop.permute.xlu1 %995 }
0x12ab   :  { %499 = vrot.lane.b32.xlu0 %v4150_v5, %s3905_s3  ;;  %v819_v5 = vld [vmem:[#allocation2] sm:$0xff] }
0x12ac   :  { %v821_v36 = vld [vmem:[#allocation2 + $0x10] sm:$0xff] }
0x1315   :  { %v743_v29 = vpop.permute.xlu0 %742 }
0x1316   :  { %3479 = vmatmul.mubr.msk.bf16.vlgmr.msra.gmra.mrb[20].mxu1 %vm187_vm3, %v743_v29 }
0x1317   :  { %3495 = vmatpush3.bf16.msra.mxu1 %v4229_v27  ;;  %3496 = vmatprep.mubr.msk.bf16.mxu1 %vm3902_vm2, %v3901_v10 }
0x1318   :  { %3500 = vmatprep.subr.bf16.mxu1 %v3901_v10 }
0x1319   :  { %v342_v16 = vpop.permute.xlu0 %341 }
0x131a   :  { %344 = vst.msk [vmem:[#allocation2 + $0x8] sm:$0xff] %vm187_vm3, %v342_v16 }
0x131d   :  { %v500_v31 = vpop.permute.xlu0 %499 }
0x131e   :  { %502 = vst.msk [vmem:[#allocation2 + $0x18] sm:$0xff] %vm187_vm3, %v500_v31  ;;  %3497 = vmatmul.mubr.bf16.vlgmr.msra.gmra.mrb[24].mxu1 %v3904_v18 }
0x131f   :  { %3501 = vmatpush3.bf16.msra.mxu1 %v4229_v27  ;;  %3502 = vmatprep.mubr.msk.bf16.mxu1 %vm3902_vm2, %v3901_v10 }
0x1320   :  { %3512 = vmatprep.subr.bf16.mxu1 %v3901_v10 }
0x1321   :  { %v820_v33 = vld [vmem:[#allocation2 + $0x8] sm:$0xff] }
0x1322   :  { %v827_v35 = vpack.c.bf16 %v820_v33, %v819_v5 }
0x1324   :  { %3486 = vmatprep.mubr.msk.bf16.mxu0 %vm187_vm3, %v827_v35 }
0x1325   :  { %v822_v37 = vld [vmem:[#allocation2 + $0x18] sm:$0xff] }
0x1326   :  { %v828_v39 = vpack.c.bf16 %v822_v37, %v821_v36 }
0x1328   :  { %3487 = vmatmul.mubr.msk.bf16.vlgmr.msra.gmra.mrb[16].mxu0 %vm187_vm3, %v828_v39 }
0x1329   :  { %3507 = vmatpush3.bf16.msra.mxu0 %v4229_v27 }
0x132a   :  { %3518 = vmatprep.subr.bf16.mxu0 %v3901_v10 }
0x13e9   :  { %v781_v40 = vpop.f32.mrb[20].mxu1 }
0x13ea   :  { %v3480_v23 = vpop.f32.mrb[21].mxu1  ;;  %v794_v0 = vadd.f32 %v781_v40, %v4089_v34  ;;  %v787_v1 = vadd.f32 %v781_v40, %v4081_v26 }
0x13eb   :  { %v784_v41 = vpop.f32.mrb[22].mxu1 }
0x13ec   :  { %v3481_v42 = vpop.f32.mrb[23].mxu1  ;;  %v3222_v2 = vmul.f32 -1.442695, %v787_v1 }
0x13f1   :  { %v982_v44 = vpop.f32.mrb[24].mxu1 }
0x13f2   :  { %v998_v45 = vadd.f32 %v4247_v43, %v982_v44  ;;  %v3498_v8 = vpop.f32.mrb[25].mxu1 }
0x13f3   :  { %v985_v46 = vpop.f32.mrb[26].mxu1 }
0x13f4   :  { %1000 = vrot.lane.b32.xlu0 %v998_v45, %s3905_s3  ;;  %v3499_v48 = vpop.f32.mrb[27].mxu1 }
0x13fb   :  { %v4251_v49 = vpop.f32.mrb[16].mxu0 }
0x13fc   :  { %v900_v28 = vpop.f32.mrb[17].mxu0 }
0x13fd   :  { %v4253_v17 = vpop.f32.mrb[18].mxu0  ;;  %v901_v52 = vadd.f32 %v4260_v51, %v900_v28 }
0x13fe   :  { %v4255_v50 = vpop.f32.mrb[19].mxu0 }
0x13ff   :  { %v988_v53 = vadd.f32 %v982_v44, %v901_v52 }
0x1401   :  { %v3232_v54 = vmul.f32 -1.442695, %v988_v53 }
0x1403   :  { %3751 = vpow2.f32 %v3232_v54 }
0x140d   :  { %v3752_v55 = vpop.eup %3751 }
0x140e   :  { %v992_v57 = vadd.f32 1.0, %v3752_v55 }
0x1410   :  { %3753 = vrcp.f32 %v992_v57 }
0x141a   :  { %v3754_v59 = vpop.eup %3753 }
0x141b   :  { %v1010_v6 = vsub.f32 1.0, %v3754_v59  ;;  %v1016_v32 = vmul.f32 0.0, %v3754_v59 }
0x1466   :  { %v1001_v60 = vpop.permute.xlu0 %1000 }
0x1467   :  { %v1003_v30 = vmul.f32 %v3754_v59, %v1001_v60 }
0x1469   :  { %1005 = vrot.lane.b32.xlu1 %v1003_v30, %s3906_s23 }
0x14db   :  { %v1006_v61 = vpop.permute.xlu1 %1005 }
0x14dc   :  { %v1008_v62 = vadd.f32 %v1006_v61, %v901_v52 }
0x14de   :  { %3755 = vtanh.f32 %v1008_v62 }
0x14df   :  { %3757 = vpow2.f32 %v3222_v2 }
0x14e8   :  { %v3756_v63 = vpop.eup %3755 }
0x14e9   :  { %1012 = vrot.lane.b32.xlu0 %v3756_v63, %s3907_s4  ;;  %v3758_v3 = vpop.eup %3757 }
0x14ea   :  { %v791_v4 = vadd.f32 1.0, %v3758_v3 }
0x14ec   :  { %3759 = vrcp.f32 %v791_v4 }
0x14ed   :  { %796 = vrot.lane.b32.xlu0 %v794_v0, %s3903_s22 }
0x14f6   :  { %v3760_v12 = vpop.eup %3759 }
0x14f7   :  { %v806_v44 = vsub.f32 1.0, %v3760_v12  ;;  %v812_v8 = vmul.f32 %v3760_v12, %v4207_v21 }
0x155b   :  { %v1013_v7 = vpop.permute.xlu0 %1012 }
0x155c   :  { %v1015_v9 = vmul.f32 %v1013_v7, %v1010_v6 }
0x155e   :  { %v4268_v11 = vadd.f32 %v1016_v32, %v1015_v9  ;;  %v909_v9 = vadd.f32 %v4251_v49, %v4260_v51 }
0x155f   :  { %v797_v13 = vpop.permute.xlu0 %796 }
0x1560   :  { %v799_v14 = vmul.f32 %v3760_v12, %v797_v13  ;;  %v1023_v34 = vpack.c.bf16 %v4268_v11, %v4268_v11 }
0x1562   :  { %1025 = vrot.lane.b32.xlu1 %v1023_v34, %s3907_s4  ;;  %801 = vrot.lane.b32.xlu0 %v799_v14, %s3903_s22 }
0x15d4   :  { %v1026_v15 = vpop.permute.xlu1 %1025  ;;  %v802_v19 = vpop.permute.xlu0 %801 }
0x15d5   :  { %v804_v20 = vadd.f32 %v802_v19, %v4081_v26  ;;  %3503 = vmatmul.mubr.msk.bf16.vlgmr.msra.gmra.mrb[28].mxu1 %vm945_vm4, %v1026_v15 }
0x15d6   :  { %3513 = vmatpush3.bf16.msra.mxu1 %v4229_v27  ;;  %3514 = vmatprep.mubr.msk.bf16.mxu1 %vm3902_vm2, %v3901_v10 }
0x15d7   :  { %3761 = vtanh.f32 %v804_v20  ;;  %3524 = vmatprep.subr.bf16.mxu1 %v3901_v10 }
0x15e1   :  { %v3762_v22 = vpop.eup %3761 }
0x15e2   :  { %808 = vrot.lane.b32.xlu0 %v3762_v22, %s3905_s3 }
0x15e6   :  { %578 = vrot.lane.b32.xlu0 %v4168_v38, %s3905_s3  ;;  %v904_v38 = vadd.f32 %v4260_v51, %v4255_v50 }
0x15ea   :  { %736 = vrot.lane.b32.xlu0 %v4207_v21, %s3905_s3 }
0x1654   :  { %v809_v26 = vpop.permute.xlu0 %808 }
0x1655   :  { %v811_v45 = vmul.f32 %v809_v26, %v806_v44 }
0x1657   :  { %v813_v46 = vadd.f32 %v812_v8, %v811_v45 }
0x1658   :  { %v579_v24 = vpop.permute.xlu0 %578 }
0x1659   :  { %581 = vst.msk [vmem:[#allocation2 + $0x20] sm:$0xff] %vm187_vm3, %v579_v24 }
0x165c   :  { %v737_v56 = vpop.permute.xlu0 %736 }
0x165d   :  { %739 = vst.msk [vmem:[#allocation2 + $0x30] sm:$0xff] %vm187_vm3, %v737_v56 }
0x1664   :  { %v825_v60 = vld [vmem:[#allocation2 + $0x30] sm:$0xff] }
0x16a8   :  { %v1064_v47 = vpop.f32.mrb[28].mxu1 }
0x16a9   :  { %v1077_v25 = vadd.f32 %v1064_v47, %v4247_v43  ;;  %v3504_v29 = vpop.f32.mrb[29].mxu1  ;;  %v1070_v5 = vadd.f32 %v1064_v47, %v904_v38 }
0x16aa   :  { %v1067_v16 = vpop.f32.mrb[30].mxu1 }
0x16ab   :  { %1079 = vrot.lane.b32.xlu1 %v1077_v25, %s3905_s3  ;;  %v3505_v31 = vpop.f32.mrb[31].mxu1  ;;  %v3234_v33 = vmul.f32 -1.442695, %v1070_v5 }
0x16ad   :  { %3763 = vpow2.f32 %v3234_v33 }
0x16b7   :  { %v3764_v35 = vpop.eup %3763 }
0x16b8   :  { %v1074_v36 = vadd.f32 1.0, %v3764_v35 }
0x16ba   :  { %3765 = vrcp.f32 %v1074_v36 }
0x16c4   :  { %v3766_v37 = vpop.eup %3765 }
0x16c5   :  { %v1089_v48 = vsub.f32 1.0, %v3766_v37  ;;  %v1095_v50 = vmul.f32 %v3766_v37, %v4268_v11 }
0x171d   :  { %v1080_v39 = vpop.permute.xlu1 %1079 }
0x171e   :  { %v1082_v40 = vmul.f32 %v3766_v37, %v1080_v39  ;;  %v912_v37 = vadd.f32 %v4253_v17, %v4260_v51 }
0x1720   :  { %1084 = vrot.lane.b32.xlu1 %v1082_v40, %s3906_s23 }
0x1792   :  { %v1085_v23 = vpop.permute.xlu1 %1084 }
0x1793   :  { %v1087_v41 = vadd.f32 %v1085_v23, %v904_v38 }
0x1795   :  { %3767 = vtanh.f32 %v1087_v41 }
0x179f   :  { %v3768_v42 = vpop.eup %3767 }
0x17a0   :  { %1091 = vrot.lane.b32.xlu1 %v3768_v42, %s3907_s4 }
0x17a4   :  { %657 = vrot.lane.b32.xlu1 %v4187_v58, %s3905_s3  ;;  %v823_v58 = vld [vmem:[#allocation2 + $0x20] sm:$0xff] }
0x17a8   :  { %815 = vrot.lane.b32.xlu1 %v813_v46, %s3905_s3 }
0x1812   :  { %v1092_v28 = vpop.permute.xlu1 %1091 }
0x1813   :  { %v1094_v52 = vmul.f32 %v1092_v28, %v1089_v48 }
0x1815   :  { %v4298_v53 = vadd.f32 %v1095_v50, %v1094_v52 }
0x1816   :  { %v658_v54 = vpop.permute.xlu1 %657 }
0x1817   :  { %660 = vst.msk [vmem:[#allocation2 + $0x28] sm:$0xff] %vm187_vm3, %v658_v54  ;;  %v1102_v55 = vpack.c.bf16 %v4298_v53, %v4298_v53 }
0x1819   :  { %1104 = vrot.lane.b32.xlu0 %v1102_v55, %s3907_s4 }
0x181a   :  { %v816_v21 = vpop.permute.xlu1 %815 }
0x181b   :  { %818 = vst.msk [vmem:[#allocation2 + $0x38] sm:$0xff] %vm187_vm3, %v816_v21 }
0x181e   :  { %v824_v57 = vld [vmem:[#allocation2 + $0x28] sm:$0xff] }
0x181f   :  { %v829_v59 = vpack.c.bf16 %v824_v57, %v823_v58 }
0x1821   :  { %3490 = vmatprep.mubr.msk.bf16.mxu0 %vm187_vm3, %v829_v59 }
0x1822   :  { %v826_v30 = vld [vmem:[#allocation2 + $0x38] sm:$0xff] }
0x1823   :  { %v830_v61 = vpack.c.bf16 %v826_v30, %v825_v60 }
0x1825   :  { %3491 = vmatmul.mubr.msk.bf16.gmra.mrb[20].mxu0 %vm187_vm3, %v830_v61 }
0x1826   :  { %3508 = vmatprep.mubr.msk.bf16.mxu0 %vm3902_vm2, %v3901_v10 }
0x188b   :  { %v1105_v62 = vpop.permute.xlu0 %1104 }
0x188c   :  { %3509 = vmatmul.mubr.msk.bf16.vlgmr.msra.gmra.mrb[24].mxu0 %vm945_vm4, %v1105_v62 }
0x188d   :  { %3519 = vmatpush3.bf16.msra.mxu0 %v4229_v27  ;;  %3520 = vmatprep.mubr.msk.bf16.mxu0 %vm3902_vm2, %v3901_v10 }
0x188e   :  { %3530 = vmatprep.subr.bf16.mxu0 %v3901_v10 }
0x18f8   :  { %v4314_v63 = vpop.f32.mrb[20].mxu0 }
0x18f9   :  { %v4316_v0 = vpop.f32.mrb[21].mxu0 }
0x18fa   :  { %v4318_v1 = vpop.f32.mrb[22].mxu0  ;;  %v917_v61 = vadd.f32 %v4260_v51, %v4316_v0 }
0x18fb   :  { %v4320_v2 = vpop.f32.mrb[23].mxu0 }
0x195f   :  { %v1143_v3 = vpop.f32.mrb[24].mxu0 }
0x1960   :  { %v1156_v4 = vadd.f32 %v1143_v3, %v4247_v43  ;;  %v3510_v6 = vpop.f32.mrb[25].mxu0  ;;  %v1149_v12 = vadd.f32 %v1143_v3, %v909_v9 }
0x1961   :  { %v1146_v7 = vpop.f32.mrb[26].mxu0 }
0x1962   :  { %1158 = vrot.lane.b32.xlu1 %v1156_v4, %s3905_s3  ;;  %v3511_v32 = vpop.f32.mrb[27].mxu0  ;;  %v3236_v13 = vmul.f32 -1.442695, %v1149_v12 }
0x1964   :  { %3769 = vpow2.f32 %v3236_v13 }
0x196e   :  { %v3770_v14 = vpop.eup %3769 }
0x196f   :  { %v1153_v34 = vadd.f32 1.0, %v3770_v14 }
0x1971   :  { %3771 = vrcp.f32 %v1153_v34 }
0x197b   :  { %v3772_v15 = vpop.eup %3771 }
0x197c   :  { %v1168_v56 = vsub.f32 1.0, %v3772_v15  ;;  %v1174_v49 = vmul.f32 %v3772_v15, %v4298_v53 }
0x19d4   :  { %v1159_v19 = vpop.permute.xlu1 %1158 }
0x19d5   :  { %v1161_v20 = vmul.f32 %v3772_v15, %v1159_v19 }
0x19d7   :  { %1163 = vrot.lane.b32.xlu0 %v1161_v20, %s3906_s23 }
0x1a49   :  { %v1164_v22 = vpop.permute.xlu0 %1163 }
0x1a4a   :  { %v1166_v26 = vadd.f32 %v1164_v22, %v909_v9 }
0x1a4c   :  { %3773 = vtanh.f32 %v1166_v26 }
0x1a56   :  { %v3774_v24 = vpop.eup %3773 }
0x1a57   :  { %1170 = vrot.lane.b32.xlu1 %v3774_v24, %s3907_s4 }
0x1ac9   :  { %v1171_v47 = vpop.permute.xlu1 %1170 }
0x1aca   :  { %v1173_v25 = vmul.f32 %v1171_v47, %v1168_v56 }
0x1acc   :  { %v4329_v29 = vadd.f32 %v1174_v49, %v1173_v25 }
0x1ace   :  { %v1181_v16 = vpack.c.bf16 %v4329_v29, %v4329_v29 }
0x1ad0   :  { %1183 = vrot.lane.b32.xlu0 %v1181_v16, %s3907_s4  ;;  %v920_v16 = vadd.f32 %v4260_v51, %v4320_v2 }
0x1b42   :  { %v1184_v31 = vpop.permute.xlu0 %1183 }
0x1b43   :  { %3515 = vmatmul.mubr.msk.bf16.vlgmr.msra.gmra.mrb[32].mxu1 %vm945_vm4, %v1184_v31 }
0x1b44   :  { %3525 = vmatpush3.bf16.msra.mxu1 %v4229_v27  ;;  %3526 = vmatprep.mubr.msk.bf16.mxu1 %vm3902_vm2, %v3901_v10 }
0x1b45   :  { %3536 = vmatprep.subr.bf16.mxu1 %v3901_v10 }
0x1c16   :  { %v1222_v38 = vpop.f32.mrb[32].mxu1 }
0x1c17   :  { %v1235_v5 = vadd.f32 %v1222_v38, %v4247_v43  ;;  %v3516_v33 = vpop.f32.mrb[33].mxu1  ;;  %v1228_v39 = vadd.f32 %v1222_v38, %v912_v37 }
0x1c18   :  { %v1225_v35 = vpop.f32.mrb[34].mxu1 }
0x1c19   :  { %1237 = vrot.lane.b32.xlu1 %v1235_v5, %s3905_s3  ;;  %v3517_v36 = vpop.f32.mrb[35].mxu1  ;;  %v3238_v40 = vmul.f32 -1.442695, %v1228_v39 }
0x1c1b   :  { %3775 = vpow2.f32 %v3238_v40 }
0x1c25   :  { %v3776_v23 = vpop.eup %3775 }
0x1c26   :  { %v1232_v41 = vadd.f32 1.0, %v3776_v23 }
0x1c28   :  { %3777 = vrcp.f32 %v1232_v41 }
0x1c32   :  { %v3778_v42 = vpop.eup %3777 }
0x1c33   :  { %v1247_v28 = vsub.f32 1.0, %v3778_v42  ;;  %v1253_v17 = vmul.f32 %v3778_v42, %v4329_v29 }
0x1c8b   :  { %v1238_v44 = vpop.permute.xlu1 %1237 }
0x1c8c   :  { %v1240_v45 = vmul.f32 %v3778_v42, %v1238_v44 }
0x1c8e   :  { %1242 = vrot.lane.b32.xlu0 %v1240_v45, %s3906_s23 }
0x1d00   :  { %v1243_v8 = vpop.permute.xlu0 %1242 }
0x1d01   :  { %v1245_v46 = vadd.f32 %v1243_v8, %v912_v37 }
0x1d03   :  { %3779 = vtanh.f32 %v1245_v46 }
0x1d0d   :  { %v3780_v48 = vpop.eup %3779 }
0x1d0e   :  { %1249 = vrot.lane.b32.xlu1 %v3780_v48, %s3907_s4 }
0x1d80   :  { %v1250_v50 = vpop.permute.xlu1 %1249 }
0x1d81   :  { %v1252_v52 = vmul.f32 %v1250_v50, %v1247_v28 }
0x1d83   :  { %v4346_v54 = vadd.f32 %v1253_v17, %v1252_v52  ;;  %v925_v52 = vadd.f32 %v4314_v63, %v4260_v51 }
0x1d85   :  { %v1260_v55 = vpack.c.bf16 %v4346_v54, %v4346_v54 }
0x1d87   :  { %1262 = vrot.lane.b32.xlu0 %v1260_v55, %s3907_s4 }
0x1df9   :  { %v1263_v21 = vpop.permute.xlu0 %1262 }
0x1dfa   :  { %3521 = vmatmul.mubr.msk.bf16.vlgmr.msra.gmra.mrb[28].mxu0 %vm945_vm4, %v1263_v21 }
0x1dfb   :  { %3531 = vmatpush3.bf16.msra.mxu0 %v4229_v27  ;;  %3532 = vmatprep.mubr.msk.bf16.mxu0 %vm3902_vm2, %v3901_v10 }
0x1ecd   :  { %v1301_v58 = vpop.f32.mrb[28].mxu0 }
0x1ece   :  { %v1314_v57 = vadd.f32 %v1301_v58, %v4247_v43  ;;  %v3522_v59 = vpop.f32.mrb[29].mxu0  ;;  %v1307_v62 = vadd.f32 %v1301_v58, %v917_v61 }
0x1ecf   :  { %v1304_v60 = vpop.f32.mrb[30].mxu0 }
0x1ed0   :  { %1316 = vrot.lane.b32.xlu1 %v1314_v57, %s3905_s3  ;;  %v3523_v30 = vpop.f32.mrb[31].mxu0  ;;  %v3240_v3 = vmul.f32 -1.442695, %v1307_v62 }
0x1ed2   :  { %3781 = vpow2.f32 %v3240_v3 }
0x1edc   :  { %v3782_v4 = vpop.eup %3781 }
0x1edd   :  { %v1311_v6 = vadd.f32 1.0, %v3782_v4 }
0x1edf   :  { %3783 = vrcp.f32 %v1311_v6 }
0x1ee9   :  { %v3784_v7 = vpop.eup %3783 }
0x1eea   :  { %v1326_v34 = vsub.f32 1.0, %v3784_v7  ;;  %v1332_v0 = vmul.f32 %v3784_v7, %v4346_v54 }
0x1f42   :  { %v1317_v32 = vpop.permute.xlu1 %1316 }
0x1f43   :  { %v1319_v9 = vmul.f32 %v3784_v7, %v1317_v32 }
0x1f45   :  { %1321 = vrot.lane.b32.xlu0 %v1319_v9, %s3906_s23  ;;  %v3703_v9 = vld [vmem:[%s4872_s9] sm:$0xff]  }
0x1f46   :  { %3542 = vmatprep.subr.bf16.mxu0 %v3703_v9 }
0x1fb7   :  { %v1322_v12 = vpop.permute.xlu0 %1321 }
0x1fb8   :  { %v1324_v13 = vadd.f32 %v1322_v12, %v917_v61 }
0x1fba   :  { %3785 = vtanh.f32 %v1324_v13  ;;  %v3253_v13 = vld [vmem:[%s4873_s12] ss:$0 sm:$0xff] }
0x1fc4   :  { %v3786_v14 = vpop.eup %3785 }
0x1fc5   :  { %1328 = vrot.lane.b32.xlu1 %v3786_v14, %s3907_s4  ;;  %v4418_v14 = vld [vmem:[%s4871_s10] sm:$0xff]  }
0x2037   :  { %v1329_v15 = vpop.permute.xlu1 %1328 }
0x2038   :  { %v1331_v19 = vmul.f32 %v1329_v15, %v1326_v34 }
0x203a   :  { %v4362_v20 = vadd.f32 %v1332_v0, %v1331_v19 }
0x203c   :  { %v1339_v22 = vpack.c.bf16 %v4362_v20, %v4362_v20 }
0x203e   :  { %1341 = vrot.lane.b32.xlu0 %v1339_v22, %s3907_s4 }
0x20b0   :  { %v1342_v26 = vpop.permute.xlu0 %1341 }
0x20b1   :  { %3527 = vmatmul.mubr.msk.bf16.vlgmr.msra.gmra.mrb[36].mxu1 %vm945_vm4, %v1342_v26 }
0x20b2   :  { %3537 = vmatpush3.bf16.msra.mxu1 %v4229_v27  ;;  %3538 = vmatprep.mubr.msk.bf16.mxu1 %vm3902_vm2, %v3901_v10 }
0x20b3   :  { %3552 = vmatprep.subr.bf16.mxu1 %v3901_v10 }
0x2184   :  { %v1380_v24 = vpop.f32.mrb[36].mxu1 }
0x2185   :  { %v1393_v56 = vadd.f32 %v1380_v24, %v4247_v43  ;;  %v3528_v47 = vpop.f32.mrb[37].mxu1  ;;  %v1386_v31 = vadd.f32 %v1380_v24, %v920_v16 }
0x2186   :  { %v1383_v49 = vpop.f32.mrb[38].mxu1 }
0x2187   :  { %1395 = vrot.lane.b32.xlu1 %v1393_v56, %s3905_s3  ;;  %v3529_v25 = vpop.f32.mrb[39].mxu1  ;;  %v3242_v38 = vmul.f32 -1.442695, %v1386_v31 }
0x2189   :  { %3787 = vpow2.f32 %v3242_v38 }
0x2193   :  { %v3788_v27 = vpop.eup %3787 }
0x2194   :  { %v1390_v5 = vadd.f32 1.0, %v3788_v27 }
0x2196   :  { %3789 = vrcp.f32 %v1390_v5 }
0x21a0   :  { %v3790_v33 = vpop.eup %3789 }
0x21a1   :  { %v1405_v23 = vsub.f32 1.0, %v3790_v33  ;;  %v1411_v2 = vmul.f32 %v3790_v33, %v4362_v20 }
0x21f9   :  { %v1396_v35 = vpop.permute.xlu1 %1395 }
0x21fa   :  { %v1398_v36 = vmul.f32 %v3790_v33, %v1396_v35 }
0x21fc   :  { %1400 = vrot.lane.b32.xlu0 %v1398_v36, %s3906_s23 }
0x226e   :  { %v1401_v37 = vpop.permute.xlu0 %1400 }
0x226f   :  { %v1403_v39 = vadd.f32 %v1401_v37, %v920_v16 }
0x2271   :  { %3791 = vtanh.f32 %v1403_v39 }
0x227b   :  { %v3792_v40 = vpop.eup %3791 }
0x227c   :  { %1407 = vrot.lane.b32.xlu1 %v3792_v40, %s3907_s4  ;;  %v4447_v40 = vld [vmem:[%s4874_s11] ss:$0 sm:$0xff] }
0x22ee   :  { %v1408_v41 = vpop.permute.xlu1 %1407 }
0x22ef   :  { %v1410_v42 = vmul.f32 %v1408_v41, %v1405_v23 }
0x22f1   :  { %v4379_v44 = vadd.f32 %v1411_v2, %v1410_v42 }
0x22f3   :  { %v1418_v45 = vpack.c.bf16 %v4379_v44, %v4379_v44 }
0x22f5   :  { %1420 = vrot.lane.b32.xlu0 %v1418_v45, %s3907_s4 }
0x2367   :  { %v1421_v8 = vpop.permute.xlu0 %1420 }
0x2368   :  { %3533 = vmatmul.mubr.msk.bf16.vlgmr.msra.gmra.mrb[32].mxu0 %vm945_vm4, %v1421_v8 }
0x2369   :  { %3543 = vmatpush3.bf16.msra.mxu0 %v3703_v9 }
0x236a   :  { %3564 = vmatprep.subr.bf16.mxu0 %v3901_v10 }
0x243b   :  { %v1459_v46 = vpop.f32.mrb[32].mxu0 }
0x243c   :  { %v1472_v48 = vadd.f32 %v1459_v46, %v4247_v43  ;;  %v3534_v28 = vpop.f32.mrb[33].mxu0  ;;  %v1465_v55 = vadd.f32 %v1459_v46, %v925_v52 }
0x243d   :  { %v1462_v50 = vpop.f32.mrb[34].mxu0 }
0x243e   :  { %1474 = vrot.lane.b32.xlu1 %v1472_v48, %s3905_s3  ;;  %v3535_v17 = vpop.f32.mrb[35].mxu0  ;;  %v3244_v21 = vmul.f32 -1.442695, %v1465_v55  ;;  %v928_v55 = vadd.f32 %v4318_v1, %v4260_v51 }
0x2440   :  { %3793 = vpow2.f32 %v3244_v21 }
0x244a   :  { %v3794_v58 = vpop.eup %3793 }
0x244b   :  { %v1469_v57 = vadd.f32 1.0, %v3794_v58 }
0x244d   :  { %3795 = vrcp.f32 %v1469_v57 }
0x2457   :  { %v3796_v59 = vpop.eup %3795 }
0x2458   :  { %v1484_v63 = vsub.f32 1.0, %v3796_v59  ;;  %v1490_v6 = vmul.f32 %v3796_v59, %v4379_v44 }
0x24b0   :  { %v1475_v60 = vpop.permute.xlu1 %1474 }
0x24b1   :  { %v1477_v30 = vmul.f32 %v3796_v59, %v1475_v60 }
0x24b3   :  { %1479 = vrot.lane.b32.xlu0 %v1477_v30, %s3906_s23 }
0x2525   :  { %v1480_v61 = vpop.permute.xlu0 %1479 }
0x2526   :  { %v1482_v62 = vadd.f32 %v1480_v61, %v925_v52 }
0x2528   :  { %3797 = vtanh.f32 %v1482_v62 }
0x2532   :  { %v3798_v3 = vpop.eup %3797 }
0x2533   :  { %1486 = vrot.lane.b32.xlu1 %v3798_v3, %s3907_s4 }
0x2537   :  { %1019 = vrot.lane.b32.xlu1 %v4268_v11, %s3907_s4 }
0x253b   :  { %1177 = vrot.lane.b32.xlu1 %v4329_v29, %s3907_s4 }
0x253f   :  { %1741 = vrot.lane.b32.xlu1 %v3253_v13, %s3906_s23 }
0x25a5   :  { %v1487_v4 = vpop.permute.xlu1 %1486 }
0x25a6   :  { %v1489_v7 = vmul.f32 %v1487_v4, %v1484_v63 }
0x25a8   :  { %v4396_v32 = vadd.f32 %v1490_v6, %v1489_v7 }
0x25a9   :  { %v1020_v12 = vpop.permute.xlu1 %1019 }
0x25aa   :  { %1022 = vst.msk [vmem:[#allocation3] sm:$0xff] %vm945_vm4, %v1020_v12  ;;  %v1497_v11 = vpack.c.bf16 %v4396_v32, %v4396_v32 }
0x25ac   :  { %1499 = vrot.lane.b32.xlu0 %v1497_v11, %s3907_s4 }
0x25ad   :  { %v1178_v29 = vpop.permute.xlu1 %1177 }
0x25ae   :  { %1180 = vst.msk [vmem:[#allocation3 + $0x10] sm:$0xff] %vm945_vm4, %v1178_v29 }
0x25b0   :  { %1098 = vrot.lane.b32.xlu0 %v4298_v53, %s3907_s4 }
0x25b1   :  { %v4436_v16 = vpop.permute.xlu1 %1741 }
0x25b4   :  { %1256 = vrot.lane.b32.xlu0 %v4346_v54, %s3907_s4  ;;  %v1576_v54 = vld [vmem:[#allocation3] sm:$0xff] }
0x25b5   :  { %v1578_v22 = vld [vmem:[#allocation3 + $0x10] sm:$0xff] }
0x261e   :  { %v1500_v34 = vpop.permute.xlu0 %1499 }
0x261f   :  { %3539 = vmatmul.mubr.msk.bf16.vlgmr.msra.gmra.mrb[40].mxu1 %vm945_vm4, %v1500_v34 }
0x2620   :  { %3553 = vmatpush3.bf16.msra.mxu1 %v4418_v14  ;;  %3554 = vmatprep.mubr.msk.bf16.mxu1 %vm3902_vm2, %v3901_v10 }
0x2621   :  { %3558 = vmatprep.subr.bf16.mxu1 %v3901_v10 }
0x2622   :  { %v1099_v53 = vpop.permute.xlu0 %1098 }
0x2623   :  { %1101 = vst.msk [vmem:[#allocation3 + $0x8] sm:$0xff] %vm945_vm4, %v1099_v53 }
0x2626   :  { %v1257_v15 = vpop.permute.xlu0 %1256 }
0x2627   :  { %1259 = vst.msk [vmem:[#allocation3 + $0x18] sm:$0xff] %vm945_vm4, %v1257_v15  ;;  %3555 = vmatmul.mubr.bf16.vlgmr.msra.gmra.mrb[44].mxu1 %v3904_v18 }
0x2628   :  { %3559 = vmatpush3.bf16.msra.mxu1 %v4418_v14  ;;  %3560 = vmatprep.mubr.msk.bf16.mxu1 %vm3902_vm2, %v3901_v10 }
0x2629   :  { %3570 = vmatprep.subr.bf16.mxu1 %v3901_v10 }
0x262a   :  { %v1577_v0 = vld [vmem:[#allocation3 + $0x8] sm:$0xff] }
0x262b   :  { %v1584_v19 = vpack.c.bf16 %v1577_v0, %v1576_v54 }
0x262d   :  { %3544 = vmatprep.mubr.msk.bf16.mxu0 %vm945_vm4, %v1584_v19 }
0x262e   :  { %v1579_v26 = vld [vmem:[#allocation3 + $0x18] sm:$0xff] }
0x262f   :  { %v1585_v24 = vpack.c.bf16 %v1579_v26, %v1578_v22 }
0x2631   :  { %3545 = vmatmul.mubr.msk.bf16.vlgmr.msra.gmra.mrb[36].mxu0 %vm945_vm4, %v1585_v24 }
0x2632   :  { %3565 = vmatpush3.bf16.msra.mxu0 %v4418_v14 }
0x2633   :  { %3576 = vmatprep.subr.bf16.mxu0 %v3901_v10 }
0x26f2   :  { %v1538_v56 = vpop.f32.mrb[40].mxu1 }
0x26f3   :  { %v3540_v47 = vpop.f32.mrb[41].mxu1  ;;  %v1551_v52 = vadd.f32 %v1538_v56, %v4247_v43  ;;  %v1544_v21 = vadd.f32 %v1538_v56, %v928_v55 }
0x26f4   :  { %v1541_v49 = vpop.f32.mrb[42].mxu1 }
0x26f5   :  { %v3541_v25 = vpop.f32.mrb[43].mxu1  ;;  %v3246_v58 = vmul.f32 -1.442695, %v1544_v21 }
0x26fa   :  { %v1728_v31 = vpop.f32.mrb[44].mxu1 }
0x26fb   :  { %v1744_v38 = vadd.f32 %v4436_v16, %v1728_v31  ;;  %v3556_v27 = vpop.f32.mrb[45].mxu1 }
0x26fc   :  { %v1731_v5 = vpop.f32.mrb[46].mxu1 }
0x26fd   :  { %1746 = vrot.lane.b32.xlu0 %v1744_v38, %s3905_s3  ;;  %v3557_v33 = vpop.f32.mrb[47].mxu1 }
0x2704   :  { %v4440_v35 = vpop.f32.mrb[36].mxu0 }
0x2705   :  { %v1649_v36 = vpop.f32.mrb[37].mxu0 }
0x2706   :  { %v4442_v37 = vpop.f32.mrb[38].mxu0  ;;  %v1650_v23 = vadd.f32 %v4447_v40, %v1649_v36 }
0x2707   :  { %v1652_v39 = vpop.f32.mrb[39].mxu0 }
0x2708   :  { %v1734_v41 = vadd.f32 %v1728_v31, %v1650_v23 }
0x270a   :  { %v3255_v2 = vmul.f32 -1.442695, %v1734_v41 }
0x270c   :  { %3799 = vpow2.f32 %v3255_v2 }
0x2716   :  { %v3800_v42 = vpop.eup %3799 }
0x2717   :  { %v1738_v45 = vadd.f32 1.0, %v3800_v42 }
0x2719   :  { %3801 = vrcp.f32 %v1738_v45 }
0x2723   :  { %v3802_v8 = vpop.eup %3801 }
0x2724   :  { %v1756_v60 = vsub.f32 1.0, %v3802_v8  ;;  %v1762_v61 = vmul.f32 0.0, %v3802_v8 }
0x276f   :  { %v1747_v46 = vpop.permute.xlu0 %1746 }
0x2770   :  { %v1749_v48 = vmul.f32 %v3802_v8, %v1747_v46 }
0x2772   :  { %1751 = vrot.lane.b32.xlu1 %v1749_v48, %s3906_s23 }
0x27e4   :  { %v1752_v28 = vpop.permute.xlu1 %1751 }
0x27e5   :  { %v1754_v50 = vadd.f32 %v1752_v28, %v1650_v23 }
0x27e7   :  { %3803 = vtanh.f32 %v1754_v50 }
0x27e8   :  { %3805 = vpow2.f32 %v3246_v58 }
0x27f1   :  { %v3804_v17 = vpop.eup %3803 }
0x27f2   :  { %1758 = vrot.lane.b32.xlu0 %v3804_v17, %s3907_s4  ;;  %v3806_v57 = vpop.eup %3805 }
0x27f3   :  { %v1548_v59 = vadd.f32 1.0, %v3806_v57 }
0x27f5   :  { %3807 = vrcp.f32 %v1548_v59 }
0x27f6   :  { %1553 = vrot.lane.b32.xlu0 %v1551_v52, %s3905_s3 }
0x27ff   :  { %v3808_v63 = vpop.eup %3807 }
0x2800   :  { %v1563_v38 = vsub.f32 1.0, %v3808_v63  ;;  %v1569_v5 = vmul.f32 %v3808_v63, %v4396_v32 }
0x2864   :  { %v1759_v30 = vpop.permute.xlu0 %1758 }
0x2865   :  { %v1761_v62 = vmul.f32 %v1759_v30, %v1756_v60 }
0x2867   :  { %v4456_v3 = vadd.f32 %v1762_v61, %v1761_v62  ;;  %v1658_v62 = vadd.f32 %v4440_v35, %v4447_v40 }
0x2868   :  { %v1554_v4 = vpop.permute.xlu0 %1553 }
0x2869   :  { %v1556_v43 = vmul.f32 %v3808_v63, %v1554_v4  ;;  %v1769_v6 = vpack.c.bf16 %v4456_v3, %v4456_v3 }
0x286b   :  { %1771 = vrot.lane.b32.xlu1 %v1769_v6, %s3907_s4  ;;  %1558 = vrot.lane.b32.xlu0 %v1556_v43, %s3906_s23 }
0x28dd   :  { %v1772_v51 = vpop.permute.xlu1 %1771  ;;  %v1559_v1 = vpop.permute.xlu0 %1558 }
0x28de   :  { %v1561_v7 = vadd.f32 %v1559_v1, %v928_v55  ;;  %3561 = vmatmul.mubr.msk.bf16.vlgmr.msra.gmra.mrb[48].mxu1 %vm945_vm4, %v1772_v51 }
0x28df   :  { %3571 = vmatpush3.bf16.msra.mxu1 %v4418_v14  ;;  %3572 = vmatprep.mubr.msk.bf16.mxu1 %vm3902_vm2, %v3901_v10 }
0x28e0   :  { %3809 = vtanh.f32 %v1561_v7  ;;  %3582 = vmatprep.subr.bf16.mxu1 %v3901_v10 }
0x28ea   :  { %v3810_v9 = vpop.eup %3809 }
0x28eb   :  { %1565 = vrot.lane.b32.xlu0 %v3810_v9, %s3907_s4 }
0x28ef   :  { %1335 = vrot.lane.b32.xlu0 %v4362_v20, %s3907_s4  ;;  %v1653_v20 = vadd.f32 %v4447_v40, %v1652_v39 }
0x28f3   :  { %1493 = vrot.lane.b32.xlu0 %v4396_v32, %s3907_s4 }
0x295d   :  { %v1566_v12 = vpop.permute.xlu0 %1565 }
0x295e   :  { %v1568_v27 = vmul.f32 %v1566_v12, %v1563_v38 }
0x2960   :  { %v1570_v33 = vadd.f32 %v1569_v5, %v1568_v27 }
0x2961   :  { %v1336_v11 = vpop.permute.xlu0 %1335 }
0x2962   :  { %1338 = vst.msk [vmem:[#allocation3 + $0x20] sm:$0xff] %vm945_vm4, %v1336_v11 }
0x2965   :  { %v1494_v29 = vpop.permute.xlu0 %1493 }
0x2966   :  { %1496 = vst.msk [vmem:[#allocation3 + $0x30] sm:$0xff] %vm945_vm4, %v1494_v29 }
0x296d   :  { %v1582_v48 = vld [vmem:[#allocation3 + $0x30] sm:$0xff] }
0x29b1   :  { %v1810_v13 = vpop.f32.mrb[48].mxu1 }
0x29b2   :  { %v1823_v34 = vadd.f32 %v1810_v13, %v4436_v16  ;;  %v3562_v53 = vpop.f32.mrb[49].mxu1  ;;  %v1816_v0 = vadd.f32 %v1810_v13, %v1653_v20 }
0x29b3   :  { %v1813_v15 = vpop.f32.mrb[50].mxu1 }
0x29b4   :  { %1825 = vrot.lane.b32.xlu1 %v1823_v34, %s3905_s3  ;;  %v3563_v54 = vpop.f32.mrb[51].mxu1  ;;  %v3257_v19 = vmul.f32 -1.442695, %v1816_v0 }
0x29b6   :  { %3811 = vpow2.f32 %v3257_v19 }
0x29c0   :  { %v3812_v22 = vpop.eup %3811 }
0x29c1   :  { %v1820_v26 = vadd.f32 1.0, %v3812_v22 }
0x29c3   :  { %3813 = vrcp.f32 %v1820_v26 }
0x29cd   :  { %v3814_v24 = vpop.eup %3813 }
0x29ce   :  { %v1835_v36 = vsub.f32 1.0, %v3814_v24  ;;  %v1841_v23 = vmul.f32 %v3814_v24, %v4456_v3 }
0x2a26   :  { %v1826_v56 = vpop.permute.xlu1 %1825 }
0x2a27   :  { %v1828_v47 = vmul.f32 %v3814_v24, %v1826_v56  ;;  %v1661_v24 = vadd.f32 %v4442_v37, %v4447_v40 }
0x2a29   :  { %1830 = vrot.lane.b32.xlu1 %v1828_v47, %s3906_s23 }
0x2a9b   :  { %v1831_v49 = vpop.permute.xlu1 %1830 }
0x2a9c   :  { %v1833_v25 = vadd.f32 %v1831_v49, %v1653_v20 }
0x2a9e   :  { %3815 = vtanh.f32 %v1833_v25 }
0x2aa8   :  { %v3816_v31 = vpop.eup %3815 }
0x2aa9   :  { %1837 = vrot.lane.b32.xlu1 %v3816_v31, %s3907_s4 }
0x2aad   :  { %1414 = vrot.lane.b32.xlu1 %v4379_v44, %s3907_s4  ;;  %v1580_v44 = vld [vmem:[#allocation3 + $0x20] sm:$0xff] }
0x2ab1   :  { %1572 = vrot.lane.b32.xlu1 %v1570_v33, %s3907_s4 }
0x2b1b   :  { %v1838_v39 = vpop.permute.xlu1 %1837 }
0x2b1c   :  { %v1840_v41 = vmul.f32 %v1838_v39, %v1835_v36 }
0x2b1e   :  { %v4484_v2 = vadd.f32 %v1841_v23, %v1840_v41 }
0x2b1f   :  { %v1415_v42 = vpop.permute.xlu1 %1414 }
0x2b20   :  { %1417 = vst.msk [vmem:[#allocation3 + $0x28] sm:$0xff] %vm945_vm4, %v1415_v42  ;;  %v1848_v45 = vpack.c.bf16 %v4484_v2, %v4484_v2 }
0x2b22   :  { %1850 = vrot.lane.b32.xlu0 %v1848_v45, %s3907_s4 }
0x2b23   :  { %v1573_v32 = vpop.permute.xlu1 %1572 }
0x2b24   :  { %1575 = vst.msk [vmem:[#allocation3 + $0x38] sm:$0xff] %vm945_vm4, %v1573_v32 }
0x2b27   :  { %v1581_v8 = vld [vmem:[#allocation3 + $0x28] sm:$0xff] }
0x2b28   :  { %v1586_v46 = vpack.c.bf16 %v1581_v8, %v1580_v44 }
0x2b2a   :  { %3548 = vmatprep.mubr.msk.bf16.mxu0 %vm945_vm4, %v1586_v46 }
0x2b2b   :  { %v1583_v28 = vld [vmem:[#allocation3 + $0x38] sm:$0xff] }
0x2b2c   :  { %v1587_v50 = vpack.c.bf16 %v1583_v28, %v1582_v48 }
0x2b2e   :  { %3549 = vmatmul.mubr.msk.bf16.gmra.mrb[40].mxu0 %vm945_vm4, %v1587_v50 }
0x2b2f   :  { %3566 = vmatprep.mubr.msk.bf16.mxu0 %vm3902_vm2, %v3901_v10 }
0x2b94   :  { %v1851_v17 = vpop.permute.xlu0 %1850 }
0x2b95   :  { %3567 = vmatmul.mubr.msk.bf16.vlgmr.msra.gmra.mrb[44].mxu0 %vm945_vm4, %v1851_v17 }
0x2b96   :  { %3577 = vmatpush3.bf16.msra.mxu0 %v4418_v14  ;;  %3578 = vmatprep.mubr.msk.bf16.mxu0 %vm3902_vm2, %v3901_v10 }
0x2b97   :  { %3588 = vmatprep.subr.bf16.mxu0 %v3901_v10 }
0x2c01   :  { %v4500_v52 = vpop.f32.mrb[40].mxu0 }
0x2c02   :  { %v4502_v55 = vpop.f32.mrb[41].mxu0 }
0x2c03   :  { %v4504_v21 = vpop.f32.mrb[42].mxu0  ;;  %v1666_v50 = vadd.f32 %v4447_v40, %v4502_v55 }
0x2c04   :  { %v4506_v58 = vpop.f32.mrb[43].mxu0 }
0x2c68   :  { %v1889_v57 = vpop.f32.mrb[44].mxu0 }
0x2c69   :  { %v1902_v59 = vadd.f32 %v1889_v57, %v4436_v16  ;;  %v3568_v60 = vpop.f32.mrb[45].mxu0  ;;  %v1895_v63 = vadd.f32 %v1889_v57, %v1658_v62 }
0x2c6a   :  { %v1892_v30 = vpop.f32.mrb[46].mxu0 }
0x2c6b   :  { %1904 = vrot.lane.b32.xlu1 %v1902_v59, %s3905_s3  ;;  %v3569_v61 = vpop.f32.mrb[47].mxu0  ;;  %v3259_v4 = vmul.f32 -1.442695, %v1895_v63 }
0x2c6d   :  { %3817 = vpow2.f32 %v3259_v4 }
0x2c77   :  { %v3818_v43 = vpop.eup %3817 }
0x2c78   :  { %v1899_v6 = vadd.f32 1.0, %v3818_v43 }
0x2c7a   :  { %3819 = vrcp.f32 %v1899_v6 }
0x2c84   :  { %v3820_v51 = vpop.eup %3819 }
0x2c85   :  { %v1914_v29 = vsub.f32 1.0, %v3820_v51  ;;  %v1920_v35 = vmul.f32 %v3820_v51, %v4484_v2 }
0x2cdd   :  { %v1905_v1 = vpop.permute.xlu1 %1904 }
0x2cde   :  { %v1907_v7 = vmul.f32 %v3820_v51, %v1905_v1 }
0x2ce0   :  { %1909 = vrot.lane.b32.xlu0 %v1907_v7, %s3906_s23 }
0x2d52   :  { %v1910_v9 = vpop.permute.xlu0 %1909 }
0x2d53   :  { %v1912_v12 = vadd.f32 %v1910_v9, %v1658_v62 }
0x2d55   :  { %3821 = vtanh.f32 %v1912_v12 }
0x2d5f   :  { %v3822_v11 = vpop.eup %3821 }
0x2d60   :  { %1916 = vrot.lane.b32.xlu1 %v3822_v11, %s3907_s4 }
0x2dd2   :  { %v1917_v13 = vpop.permute.xlu1 %1916 }
0x2dd3   :  { %v1919_v34 = vmul.f32 %v1917_v13, %v1914_v29 }
0x2dd5   :  { %v4515_v53 = vadd.f32 %v1920_v35, %v1919_v34 }
0x2dd7   :  { %v1927_v15 = vpack.c.bf16 %v4515_v53, %v4515_v53 }
0x2dd9   :  { %1929 = vrot.lane.b32.xlu0 %v1927_v15, %s3907_s4  ;;  %v1669_v15 = vadd.f32 %v4447_v40, %v4506_v58 }
0x2e4b   :  { %v1930_v54 = vpop.permute.xlu0 %1929 }
0x2e4c   :  { %3573 = vmatmul.mubr.msk.bf16.vlgmr.msra.gmra.mrb[52].mxu1 %vm945_vm4, %v1930_v54 }
0x2e4d   :  { %3583 = vmatpush3.bf16.msra.mxu1 %v4418_v14  ;;  %3584 = vmatprep.mubr.msk.bf16.mxu1 %vm3902_vm2, %v3901_v10 }
0x2e4e   :  { %3594 = vmatprep.subr.bf16.mxu1 %v3901_v10 }
0x2f1f   :  { %v1968_v20 = vpop.f32.mrb[52].mxu1 }
0x2f20   :  { %v1981_v0 = vadd.f32 %v1968_v20, %v4436_v16  ;;  %v3574_v19 = vpop.f32.mrb[53].mxu1  ;;  %v1974_v56 = vadd.f32 %v1968_v20, %v1661_v24 }
0x2f21   :  { %v1971_v22 = vpop.f32.mrb[54].mxu1 }
0x2f22   :  { %1983 = vrot.lane.b32.xlu1 %v1981_v0, %s3905_s3  ;;  %v3575_v26 = vpop.f32.mrb[55].mxu1  ;;  %v3261_v47 = vmul.f32 -1.442695, %v1974_v56 }
0x2f24   :  { %3823 = vpow2.f32 %v3261_v47 }
0x2f2e   :  { %v3824_v49 = vpop.eup %3823 }
0x2f2f   :  { %v1978_v25 = vadd.f32 1.0, %v3824_v49 }
0x2f31   :  { %3825 = vrcp.f32 %v1978_v25 }
0x2f3b   :  { %v3826_v31 = vpop.eup %3825 }
0x2f3c   :  { %v1993_v39 = vsub.f32 1.0, %v3826_v31  ;;  %v1999_v37 = vmul.f32 %v3826_v31, %v4515_v53 }
0x2f94   :  { %v1984_v38 = vpop.permute.xlu1 %1983 }
0x2f95   :  { %v1986_v27 = vmul.f32 %v3826_v31, %v1984_v38 }
0x2f97   :  { %1988 = vrot.lane.b32.xlu0 %v1986_v27, %s3906_s23 }
0x3009   :  { %v1989_v5 = vpop.permute.xlu0 %1988 }
0x300a   :  { %v1991_v33 = vadd.f32 %v1989_v5, %v1661_v24 }
0x300c   :  { %3827 = vtanh.f32 %v1991_v33 }
0x3016   :  { %v3828_v36 = vpop.eup %3827 }
0x3017   :  { %1995 = vrot.lane.b32.xlu1 %v3828_v36, %s3907_s4 }
0x3089   :  { %v1996_v23 = vpop.permute.xlu1 %1995 }
0x308a   :  { %v1998_v41 = vmul.f32 %v1996_v23, %v1993_v39 }
0x308c   :  { %v4532_v42 = vadd.f32 %v1999_v37, %v1998_v41  ;;  %v1674_v41 = vadd.f32 %v4500_v52, %v4447_v40 }
0x308e   :  { %v2006_v45 = vpack.c.bf16 %v4532_v42, %v4532_v42 }
0x3090   :  { %2008 = vrot.lane.b32.xlu0 %v2006_v45, %s3907_s4 }
0x3102   :  { %v2009_v32 = vpop.permute.xlu0 %2008 }
0x3103   :  { %3579 = vmatmul.mubr.msk.bf16.vlgmr.msra.gmra.mrb[48].mxu0 %vm945_vm4, %v2009_v32 }
0x3104   :  { %3589 = vmatpush3.bf16.msra.mxu0 %v4418_v14  ;;  %3590 = vmatprep.mubr.msk.bf16.mxu0 %vm3902_vm2, %v3901_v10 }
0x31d6   :  { %v2047_v44 = vpop.f32.mrb[48].mxu0 }
0x31d7   :  { %v2060_v8 = vadd.f32 %v2047_v44, %v4436_v16  ;;  %v3580_v46 = vpop.f32.mrb[49].mxu0  ;;  %v2053_v17 = vadd.f32 %v2047_v44, %v1666_v50 }
0x31d8   :  { %v2050_v48 = vpop.f32.mrb[50].mxu0 }
0x31d9   :  { %2062 = vrot.lane.b32.xlu1 %v2060_v8, %s3905_s3  ;;  %v3581_v28 = vpop.f32.mrb[51].mxu0  ;;  %v3263_v57 = vmul.f32 -1.442695, %v2053_v17 }
0x31db   :  { %3829 = vpow2.f32 %v3263_v57 }
0x31e5   :  { %v3830_v59 = vpop.eup %3829 }
0x31e6   :  { %v2057_v60 = vadd.f32 1.0, %v3830_v59 }
0x31e8   :  { %3831 = vrcp.f32 %v2057_v60 }
0x31f2   :  { %v3832_v30 = vpop.eup %3831 }
0x31f3   :  { %v2072_v6 = vsub.f32 1.0, %v3832_v30  ;;  %v2078_v55 = vmul.f32 %v3832_v30, %v4532_v42 }
0x324b   :  { %v2063_v61 = vpop.permute.xlu1 %2062 }
0x324c   :  { %v2065_v62 = vmul.f32 %v3832_v30, %v2063_v61 }
0x324e   :  { %2067 = vrot.lane.b32.xlu0 %v2065_v62, %s3906_s23  ;;  %v3706_v62 = vld [vmem:[%s4876_s13] sm:$0xff]  }
0x324f   :  { %3600 = vmatprep.subr.bf16.mxu0 %v3706_v62 }
0x32c0   :  { %v2068_v63 = vpop.permute.xlu0 %2067 }
0x32c1   :  { %v2070_v4 = vadd.f32 %v2068_v63, %v1666_v50 }
0x32c3   :  { %3833 = vtanh.f32 %v2070_v4 }
0x32cd   :  { %v3834_v43 = vpop.eup %3833 }
0x32ce   :  { %2074 = vrot.lane.b32.xlu1 %v3834_v43, %s3907_s4  ;;  %v4604_v43 = vld [vmem:[%s4875_s14] sm:$0xff]  }
0x3340   :  { %v2075_v51 = vpop.permute.xlu1 %2074 }
0x3341   :  { %v2077_v1 = vmul.f32 %v2075_v51, %v2072_v6 }
0x3343   :  { %v4548_v7 = vadd.f32 %v2078_v55, %v2077_v1 }
0x3345   :  { %v2085_v9 = vpack.c.bf16 %v4548_v7, %v4548_v7 }
0x3347   :  { %2087 = vrot.lane.b32.xlu0 %v2085_v9, %s3907_s4 }
0x33b9   :  { %v2088_v12 = vpop.permute.xlu0 %2087 }
0x33ba   :  { %3585 = vmatmul.mubr.msk.bf16.vlgmr.msra.gmra.mrb[56].mxu1 %vm945_vm4, %v2088_v12 }
0x33bb   :  { %3595 = vmatpush3.bf16.msra.mxu1 %v4418_v14  ;;  %3596 = vmatprep.mubr.msk.bf16.mxu1 %vm3902_vm2, %v3901_v10 }
0x33bc   :  { %3610 = vmatprep.subr.bf16.mxu1 %v3901_v10 }
0x348d   :  { %v2126_v11 = vpop.f32.mrb[56].mxu1 }
0x348e   :  { %v2139_v29 = vadd.f32 %v2126_v11, %v4436_v16  ;;  %v3586_v13 = vpop.f32.mrb[57].mxu1  ;;  %v2132_v54 = vadd.f32 %v2126_v11, %v1669_v15 }
0x348f   :  { %v2129_v35 = vpop.f32.mrb[58].mxu1 }
0x3490   :  { %2141 = vrot.lane.b32.xlu1 %v2139_v29, %s3905_s3  ;;  %v3587_v34 = vpop.f32.mrb[59].mxu1  ;;  %v3265_v20 = vmul.f32 -1.442695, %v2132_v54 }
0x3492   :  { %3835 = vpow2.f32 %v3265_v20 }
0x349c   :  { %v3836_v14 = vpop.eup %3835 }
0x349d   :  { %v2136_v0 = vadd.f32 1.0, %v3836_v14 }
0x349f   :  { %3837 = vrcp.f32 %v2136_v0 }
0x34a9   :  { %v3838_v19 = vpop.eup %3837 }
0x34aa   :  { %v2151_v49 = vsub.f32 1.0, %v3838_v19  ;;  %v2157_v58 = vmul.f32 %v3838_v19, %v4548_v7 }
0x3502   :  { %v2142_v22 = vpop.permute.xlu1 %2141 }
0x3503   :  { %v2144_v26 = vmul.f32 %v3838_v19, %v2142_v22 }
0x3505   :  { %2146 = vrot.lane.b32.xlu0 %v2144_v26, %s3906_s23 }
0x3577   :  { %v2147_v24 = vpop.permute.xlu0 %2146 }
0x3578   :  { %v2149_v56 = vadd.f32 %v2147_v24, %v1669_v15 }
0x357a   :  { %3839 = vtanh.f32 %v2149_v56 }
0x3584   :  { %v3840_v47 = vpop.eup %3839 }
0x3585   :  { %2153 = vrot.lane.b32.xlu1 %v3840_v47, %s3907_s4  ;;  %v4646_v47 = vld [vmem:[%s4878_s15] ss:$0 sm:$0xff] }
0x35f7   :  { %v2154_v25 = vpop.permute.xlu1 %2153 }
0x35f8   :  { %v2156_v31 = vmul.f32 %v2154_v25, %v2151_v49 }
0x35fa   :  { %v4565_v38 = vadd.f32 %v2157_v58, %v2156_v31 }
0x35fc   :  { %v2164_v27 = vpack.c.bf16 %v4565_v38, %v4565_v38 }
0x35fe   :  { %2166 = vrot.lane.b32.xlu0 %v2164_v27, %s3907_s4 }
0x3670   :  { %v2167_v5 = vpop.permute.xlu0 %2166 }
0x3671   :  { %3591 = vmatmul.mubr.msk.bf16.vlgmr.msra.gmra.mrb[52].mxu0 %vm945_vm4, %v2167_v5 }
0x3672   :  { %3601 = vmatpush3.bf16.msra.mxu0 %v3706_v62 }
0x3673   :  { %3626 = vmatprep.subr.bf16.mxu0 %v3901_v10 }
0x3744   :  { %v2205_v33 = vpop.f32.mrb[52].mxu0 }
0x3745   :  { %v2218_v36 = vadd.f32 %v2205_v33, %v4436_v16  ;;  %v3592_v39 = vpop.f32.mrb[53].mxu0  ;;  %v2211_v45 = vadd.f32 %v2205_v33, %v1674_v41 }
0x3746   :  { %v2208_v23 = vpop.f32.mrb[54].mxu0 }
0x3747   :  { %2220 = vrot.lane.b32.xlu1 %v2218_v36, %s3905_s3  ;;  %v3593_v37 = vpop.f32.mrb[55].mxu0  ;;  %v3267_v32 = vmul.f32 -1.442695, %v2211_v45  ;;  %v1677_v45 = vadd.f32 %v4504_v21, %v4447_v40 }
0x3749   :  { %3841 = vpow2.f32 %v3267_v32 }
0x3753   :  { %v3842_v44 = vpop.eup %3841 }
0x3754   :  { %v2215_v8 = vadd.f32 1.0, %v3842_v44 }
0x3756   :  { %3843 = vrcp.f32 %v2215_v8 }
0x3760   :  { %v3844_v46 = vpop.eup %3843 }
0x3761   :  { %v2230_v52 = vsub.f32 1.0, %v3844_v46  ;;  %v2236_v60 = vmul.f32 %v3844_v46, %v4565_v38 }
0x37b9   :  { %v2221_v48 = vpop.permute.xlu1 %2220 }
0x37ba   :  { %v2223_v28 = vmul.f32 %v3844_v46, %v2221_v48 }
0x37bc   :  { %2225 = vrot.lane.b32.xlu0 %v2223_v28, %s3906_s23 }
0x382e   :  { %v2226_v50 = vpop.permute.xlu0 %2225 }
0x382f   :  { %v2228_v17 = vadd.f32 %v2226_v50, %v1674_v41 }
0x3831   :  { %3845 = vtanh.f32 %v2228_v17 }
0x383b   :  { %v3846_v57 = vpop.eup %3845 }
0x383c   :  { %2232 = vrot.lane.b32.xlu1 %v3846_v57, %s3907_s4 }
0x3840   :  { %1765 = vrot.lane.b32.xlu1 %v4456_v3, %s3907_s4 }
0x3844   :  { %1923 = vrot.lane.b32.xlu1 %v4515_v53, %s3907_s4  ;;  %v3276_v53 = vld [vmem:[%s4877_s16] ss:$0 sm:$0xff] }
0x3848   :  { %2495 = vrot.lane.b32.xlu1 %v3276_v53, %s3903_s22 }
0x38ae   :  { %v2233_v59 = vpop.permute.xlu1 %2232 }
0x38af   :  { %v2235_v30 = vmul.f32 %v2233_v59, %v2230_v52 }
0x38b1   :  { %v4582_v61 = vadd.f32 %v2236_v60, %v2235_v30 }
0x38b2   :  { %v1766_v63 = vpop.permute.xlu1 %1765 }
0x38b3   :  { %v2243_v4 = vpack.c.bf16 %v4582_v61, %v4582_v61  ;;  %1768 = vst.msk [vmem:[#allocation4] sm:$0xff] %vm945_vm4, %v1766_v63 }
0x38b5   :  { %2245 = vrot.lane.b32.xlu0 %v2243_v4, %s3907_s4 }
0x38b6   :  { %v1924_v3 = vpop.permute.xlu1 %1923 }
0x38b7   :  { %1926 = vst.msk [vmem:[#allocation4 + $0x10] sm:$0xff] %vm945_vm4, %v1924_v3 }
0x38b9   :  { %1844 = vrot.lane.b32.xlu0 %v4484_v2, %s3907_s4  ;;  %v4611_v2 = vld [vmem:[%s4875_s14 + $0x8] sm:$0xff]  }
0x38ba   :  { %v2322_v55 = vld [vmem:[#allocation4] sm:$0xff]  ;;  %v4633_v15 = vpop.permute.xlu1 %2495 }
0x38bd   :  { %2002 = vrot.lane.b32.xlu0 %v4532_v42, %s3907_s4 }
0x38be   :  { %v2324_v12 = vld [vmem:[#allocation4 + $0x10] sm:$0xff] }
0x3927   :  { %v2246_v6 = vpop.permute.xlu0 %2245 }
0x3928   :  { %3597 = vmatmul.mubr.msk.bf16.vlgmr.msra.gmra.mrb[60].mxu1 %vm945_vm4, %v2246_v6 }
0x3929   :  { %3611 = vmatpush3.bf16.msra.mxu1 %v4604_v43  ;;  %3614 = vmatprep.mubr.msk.bf16.mxu1 %vm3902_vm2, %v3901_v10 }
0x392a   :  { %3612 = vmatprep.subr.bf16.mxu1 %v3901_v10 }
0x392b   :  { %v1845_v42 = vpop.permute.xlu0 %1844 }
0x392c   :  { %1847 = vst.msk [vmem:[#allocation4 + $0x8] sm:$0xff] %vm945_vm4, %v1845_v42 }
0x392d   :  { %3613 = vmatpush3.bf16.msra.mxu1 %v4611_v2 }
0x392e   :  { %3618 = vmatprep.subr.bf16.mxu1 %v3901_v10 }
0x392f   :  { %v2003_v51 = vpop.permute.xlu0 %2002 }
0x3930   :  { %2005 = vst.msk [vmem:[#allocation4 + $0x18] sm:$0xff] %vm945_vm4, %v2003_v51  ;;  %3615 = vmatmul.mubr.bf16.vlgmr.msra.gmra.mrb[64].mxu1 %v3904_v18 }
0x3931   :  { %3619 = vmatpush3.bf16.msra.mxu1 %v4604_v43  ;;  %3622 = vmatprep.mubr.msk.bf16.mxu1 %vm3902_vm2, %v3901_v10 }
0x3932   :  { %3620 = vmatprep.subr.bf16.mxu1 %v3901_v10 }
0x3933   :  { %v2323_v1 = vld [vmem:[#allocation4 + $0x8] sm:$0xff] }
0x3934   :  { %v2330_v9 = vpack.c.bf16 %v2323_v1, %v2322_v55 }
0x3935   :  { %3621 = vmatpush3.bf16.msra.mxu1 %v4611_v2 }
0x3936   :  { %3602 = vmatprep.mubr.msk.bf16.mxu0 %vm945_vm4, %v2330_v9  ;;  %3634 = vmatprep.subr.bf16.mxu1 %v3901_v10 }
0x3937   :  { %v2325_v11 = vld [vmem:[#allocation4 + $0x18] sm:$0xff] }
0x3938   :  { %v2331_v29 = vpack.c.bf16 %v2325_v11, %v2324_v12 }
0x393a   :  { %3603 = vmatmul.mubr.msk.bf16.vlgmr.msra.gmra.mrb[56].mxu0 %vm945_vm4, %v2331_v29 }
0x393b   :  { %3627 = vmatpush3.bf16.msra.mxu0 %v4604_v43 }
0x393c   :  { %3628 = vmatprep.subr.bf16.mxu0 %v3901_v10 }
0x393f   :  { %3629 = vmatpush3.bf16.msra.mxu0 %v4611_v2 }
0x3940   :  { %3642 = vmatprep.subr.bf16.mxu0 %v3901_v10 }
0x39fb   :  { %v2284_v18 = vpop.f32.mrb[60].mxu1 }
0x39fc   :  { %v3598_v13 = vpop.f32.mrb[61].mxu1  ;;  %v2297_v41 = vadd.f32 %v2284_v18, %v4436_v16  ;;  %v2290_v32 = vadd.f32 %v2284_v18, %v1677_v45 }
0x39fd   :  { %v2287_v35 = vpop.f32.mrb[62].mxu1 }
0x39fe   :  { %v3599_v34 = vpop.f32.mrb[63].mxu1  ;;  %v3269_v44 = vmul.f32 -1.442695, %v2290_v32 }
0x3a03   :  { %v2482_v54 = vpop.f32.mrb[64].mxu1 }
0x3a04   :  { %v2498_v20 = vadd.f32 %v4633_v15, %v2482_v54  ;;  %v3616_v14 = vpop.f32.mrb[65].mxu1 }
0x3a05   :  { %v2485_v0 = vpop.f32.mrb[66].mxu1 }
0x3a06   :  { %2500 = vrot.lane.b32.xlu0 %v2498_v20, %s3903_s22  ;;  %v3617_v19 = vpop.f32.mrb[67].mxu1 }
0x3a0d   :  { %v4637_v22 = vpop.f32.mrb[56].mxu0 }
0x3a0e   :  { %v2395_v26 = vpop.f32.mrb[57].mxu0 }
0x3a0f   :  { %v4639_v24 = vpop.f32.mrb[58].mxu0  ;;  %v2396_v49 = vadd.f32 %v4646_v47, %v2395_v26 }
0x3a10   :  { %v4641_v56 = vpop.f32.mrb[59].mxu0 }
0x3a11   :  { %v2488_v25 = vadd.f32 %v2482_v54, %v2396_v49 }
0x3a13   :  { %v3279_v58 = vmul.f32 -1.442695, %v2488_v25 }
0x3a15   :  { %3847 = vpow2.f32 %v3279_v58 }
0x3a1f   :  { %v3848_v31 = vpop.eup %3847 }
0x3a20   :  { %v2492_v27 = vadd.f32 1.0, %v3848_v31 }
0x3a22   :  { %3849 = vrcp.f32 %v2492_v27 }
0x3a2c   :  { %v3850_v5 = vpop.eup %3849 }
0x3a2d   :  { %v2510_v48 = vsub.f32 1.0, %v3850_v5  ;;  %v2516_v50 = vmul.f32 0.0, %v3850_v5 }
0x3a78   :  { %v2501_v33 = vpop.permute.xlu0 %2500 }
0x3a79   :  { %v2503_v36 = vmul.f32 %v3850_v5, %v2501_v33 }
0x3a7b   :  { %2505 = vrot.lane.b32.xlu1 %v2503_v36, %s3903_s22 }
0x3aed   :  { %v2506_v39 = vpop.permute.xlu1 %2505 }
0x3aee   :  { %v2508_v23 = vadd.f32 %v2506_v39, %v2396_v49 }
0x3af0   :  { %3851 = vtanh.f32 %v2508_v23 }
0x3af1   :  { %3853 = vpow2.f32 %v3269_v44 }
0x3afa   :  { %v3852_v37 = vpop.eup %3851 }
0x3afb   :  { %2512 = vrot.lane.b32.xlu0 %v3852_v37, %s3905_s3  ;;  %v3854_v8 = vpop.eup %3853 }
0x3afc   :  { %v2294_v46 = vadd.f32 1.0, %v3854_v8 }
0x3afe   :  { %3855 = vrcp.f32 %v2294_v46 }
0x3aff   :  { %2299 = vrot.lane.b32.xlu0 %v2297_v41, %s3905_s3 }
0x3b08   :  { %v3856_v52 = vpop.eup %3855 }
0x3b09   :  { %v2309_v20 = vsub.f32 1.0, %v3856_v52  ;;  %v2315_v0 = vmul.f32 %v3856_v52, %v4582_v61 }
0x3b6d   :  { %v2513_v28 = vpop.permute.xlu0 %2512 }
0x3b6e   :  { %v2515_v17 = vmul.f32 %v2513_v28, %v2510_v48 }
0x3b70   :  { %v4655_v57 = vadd.f32 %v2516_v50, %v2515_v17  ;;  %v2404_v17 = vadd.f32 %v4637_v22, %v4646_v47 }
0x3b71   :  { %v2300_v59 = vpop.permute.xlu0 %2299 }
0x3b72   :  { %v2523_v16 = vpack.c.bf16 %v4655_v57, %v4655_v57  ;;  %v2302_v60 = vmul.f32 %v3856_v52, %v2300_v59 }
0x3b74   :  { %2525 = vrot.lane.b32.xlu1 %v2523_v16, %s3905_s3  ;;  %2304 = vrot.lane.b32.xlu0 %v2302_v60, %s3906_s23 }
0x3be6   :  { %v2526_v40 = vpop.permute.xlu1 %2525  ;;  %v2305_v21 = vpop.permute.xlu0 %2304 }
0x3be7   :  { %v2307_v30 = vadd.f32 %v2305_v21, %v1677_v45  ;;  %3623 = vmatmul.mubr.msk.bf16.vlgmr.msra.gmra.mrb[68].mxu1 %vm187_vm3, %v2526_v40 }
0x3be8   :  { %3635 = vmatpush3.bf16.msra.mxu1 %v4604_v43  ;;  %3638 = vmatprep.mubr.msk.bf16.mxu1 %vm3902_vm2, %v3901_v10 }
0x3be9   :  { %3857 = vtanh.f32 %v2307_v30  ;;  %3636 = vmatprep.subr.bf16.mxu1 %v3901_v10 }
0x3bec   :  { %3637 = vmatpush3.bf16.msra.mxu1 %v4611_v2 }
0x3bed   :  { %3650 = vmatprep.subr.bf16.mxu1 %v3901_v10 }
0x3bf3   :  { %v3858_v62 = vpop.eup %3857 }
0x3bf4   :  { %2311 = vrot.lane.b32.xlu0 %v3858_v62, %s3907_s4 }
0x3bf8   :  { %2081 = vrot.lane.b32.xlu0 %v4548_v7, %s3907_s4  ;;  %v2399_v7 = vadd.f32 %v4646_v47, %v4641_v56 }
0x3bfc   :  { %2239 = vrot.lane.b32.xlu0 %v4582_v61, %s3907_s4 }
0x3c66   :  { %v2312_v63 = vpop.permute.xlu0 %2311 }
0x3c67   :  { %v2314_v14 = vmul.f32 %v2312_v63, %v2309_v20 }
0x3c69   :  { %v2316_v19 = vadd.f32 %v2315_v0, %v2314_v14 }
0x3c6a   :  { %v2082_v4 = vpop.permute.xlu0 %2081 }
0x3c6b   :  { %2084 = vst.msk [vmem:[#allocation4 + $0x20] sm:$0xff] %vm945_vm4, %v2082_v4 }
0x3c6e   :  { %v2240_v3 = vpop.permute.xlu0 %2239 }
0x3c6f   :  { %2242 = vst.msk [vmem:[#allocation4 + $0x30] sm:$0xff] %vm945_vm4, %v2240_v3 }
0x3c76   :  { %v2328_v36 = vld [vmem:[#allocation4 + $0x30] sm:$0xff] }
0x3cba   :  { %v2564_v53 = vpop.f32.mrb[68].mxu1 }
0x3cbb   :  { %v2577_v6 = vadd.f32 %v2564_v53, %v4633_v15  ;;  %v3624_v42 = vpop.f32.mrb[69].mxu1  ;;  %v2570_v1 = vadd.f32 %v2564_v53, %v2399_v7 }
0x3cbc   :  { %v2567_v51 = vpop.f32.mrb[70].mxu1 }
0x3cbd   :  { %2579 = vrot.lane.b32.xlu1 %v2577_v6, %s3903_s22  ;;  %v3625_v55 = vpop.f32.mrb[71].mxu1  ;;  %v3281_v9 = vmul.f32 -1.442695, %v2570_v1 }
0x3cbf   :  { %3859 = vpow2.f32 %v3281_v9 }
0x3cc9   :  { %v3860_v12 = vpop.eup %3859 }
0x3cca   :  { %v2574_v11 = vadd.f32 1.0, %v3860_v12 }
0x3ccc   :  { %3861 = vrcp.f32 %v2574_v11 }
0x3cd6   :  { %v3862_v29 = vpop.eup %3861 }
0x3cd7   :  { %v2589_v26 = vsub.f32 1.0, %v3862_v29  ;;  %v2595_v49 = vmul.f32 %v3862_v29, %v4655_v57 }
0x3d2f   :  { %v2580_v18 = vpop.permute.xlu1 %2579 }
0x3d30   :  { %v2582_v13 = vmul.f32 %v3862_v29, %v2580_v18  ;;  %v2407_v29 = vadd.f32 %v4639_v24, %v4646_v47 }
0x3d32   :  { %2584 = vrot.lane.b32.xlu1 %v2582_v13, %s3903_s22 }
0x3da4   :  { %v2585_v35 = vpop.permute.xlu1 %2584 }
0x3da5   :  { %v2587_v34 = vadd.f32 %v2585_v35, %v2399_v7 }
0x3da7   :  { %3863 = vtanh.f32 %v2587_v34 }
0x3db1   :  { %v3864_v54 = vpop.eup %3863 }
0x3db2   :  { %2591 = vrot.lane.b32.xlu1 %v3864_v54, %s3905_s3 }
0x3db6   :  { %2160 = vrot.lane.b32.xlu1 %v4565_v38, %s3907_s4  ;;  %v2326_v38 = vld [vmem:[#allocation4 + $0x20] sm:$0xff] }
0x3dba   :  { %2318 = vrot.lane.b32.xlu1 %v2316_v19, %s3907_s4 }
0x3e24   :  { %v2592_v56 = vpop.permute.xlu1 %2591 }
0x3e25   :  { %v2594_v25 = vmul.f32 %v2592_v56, %v2589_v26 }
0x3e27   :  { %v4686_v58 = vadd.f32 %v2595_v49, %v2594_v25 }
0x3e28   :  { %v2161_v31 = vpop.permute.xlu1 %2160 }
0x3e29   :  { %v2602_v27 = vpack.c.bf16 %v4686_v58, %v4686_v58  ;;  %2163 = vst.msk [vmem:[#allocation4 + $0x28] sm:$0xff] %vm945_vm4, %v2161_v31 }
0x3e2b   :  { %2604 = vrot.lane.b32.xlu0 %v2602_v27, %s3905_s3 }
0x3e2c   :  { %v2319_v61 = vpop.permute.xlu1 %2318 }
0x3e2d   :  { %2321 = vst.msk [vmem:[#allocation4 + $0x38] sm:$0xff] %vm945_vm4, %v2319_v61 }
0x3e30   :  { %v2327_v5 = vld [vmem:[#allocation4 + $0x28] sm:$0xff] }
0x3e31   :  { %v2332_v33 = vpack.c.bf16 %v2327_v5, %v2326_v38 }
0x3e33   :  { %3606 = vmatprep.mubr.msk.bf16.mxu0 %vm945_vm4, %v2332_v33 }
0x3e34   :  { %v2329_v39 = vld [vmem:[#allocation4 + $0x38] sm:$0xff] }
0x3e35   :  { %v2333_v23 = vpack.c.bf16 %v2329_v39, %v2328_v36 }
0x3e37   :  { %3607 = vmatmul.mubr.msk.bf16.gmra.mrb[60].mxu0 %vm945_vm4, %v2333_v23 }
0x3e38   :  { %3630 = vmatprep.mubr.msk.bf16.mxu0 %vm3902_vm2, %v3901_v10 }
0x3e9d   :  { %v2605_v37 = vpop.permute.xlu0 %2604 }
0x3e9e   :  { %3631 = vmatmul.mubr.msk.bf16.vlgmr.msra.gmra.mrb[64].mxu0 %vm187_vm3, %v2605_v37 }
0x3e9f   :  { %3643 = vmatpush3.bf16.msra.mxu0 %v4604_v43  ;;  %3646 = vmatprep.mubr.msk.bf16.mxu0 %vm3902_vm2, %v3901_v10 }
0x3ea0   :  { %3644 = vmatprep.subr.bf16.mxu0 %v3901_v10 }
0x3ea3   :  { %3645 = vmatpush3.bf16.msra.mxu0 %v4611_v2 }
0x3ea4   :  { %3658 = vmatprep.subr.bf16.mxu0 %v3901_v10 }
0x3f0a   :  { %v4704_v41 = vpop.f32.mrb[60].mxu0 }
0x3f0b   :  { %v4706_v45 = vpop.f32.mrb[61].mxu0 }
0x3f0c   :  { %v4708_v32 = vpop.f32.mrb[62].mxu0  ;;  %v2412_v23 = vadd.f32 %v4646_v47, %v4706_v45 }
0x3f0d   :  { %v4710_v44 = vpop.f32.mrb[63].mxu0 }
0x3f71   :  { %v2643_v8 = vpop.f32.mrb[64].mxu0 }
0x3f72   :  { %v2656_v46 = vadd.f32 %v2643_v8, %v4633_v15  ;;  %v3632_v48 = vpop.f32.mrb[65].mxu0  ;;  %v2649_v52 = vadd.f32 %v2643_v8, %v2404_v17 }
0x3f73   :  { %v2646_v28 = vpop.f32.mrb[66].mxu0 }
0x3f74   :  { %2658 = vrot.lane.b32.xlu1 %v2656_v46, %s3903_s22  ;;  %v3633_v50 = vpop.f32.mrb[67].mxu0  ;;  %v3283_v59 = vmul.f32 -1.442695, %v2649_v52 }
0x3f76   :  { %3865 = vpow2.f32 %v3283_v59 }
0x3f80   :  { %v3866_v16 = vpop.eup %3865 }
0x3f81   :  { %v2653_v60 = vadd.f32 1.0, %v3866_v16 }
0x3f83   :  { %3867 = vrcp.f32 %v2653_v60 }
0x3f8d   :  { %v3868_v40 = vpop.eup %3867 }
0x3f8e   :  { %v2668_v3 = vsub.f32 1.0, %v3868_v40  ;;  %v2674_v22 = vmul.f32 %v3868_v40, %v4686_v58 }
0x3fe6   :  { %v2659_v21 = vpop.permute.xlu1 %2658 }
0x3fe7   :  { %v2661_v30 = vmul.f32 %v3868_v40, %v2659_v21 }
0x3fe9   :  { %2663 = vrot.lane.b32.xlu0 %v2661_v30, %s3903_s22 }
0x405b   :  { %v2664_v62 = vpop.permute.xlu0 %2663 }
0x405c   :  { %v2666_v63 = vadd.f32 %v2664_v62, %v2404_v17 }
0x405e   :  { %3869 = vtanh.f32 %v2666_v63 }
0x4068   :  { %v3870_v4 = vpop.eup %3869 }
0x4069   :  { %2670 = vrot.lane.b32.xlu1 %v3870_v4, %s3905_s3 }
0x40db   :  { %v2671_v53 = vpop.permute.xlu1 %2670 }
0x40dc   :  { %v2673_v6 = vmul.f32 %v2671_v53, %v2668_v3 }
0x40de   :  { %v4719_v42 = vadd.f32 %v2674_v22, %v2673_v6 }
0x40e0   :  { %v2681_v51 = vpack.c.bf16 %v4719_v42, %v4719_v42 }
0x40e2   :  { %2683 = vrot.lane.b32.xlu0 %v2681_v51, %s3905_s3  ;;  %v2415_v51 = vadd.f32 %v4646_v47, %v4710_v44 }
0x4154   :  { %v2684_v55 = vpop.permute.xlu0 %2683 }
0x4155   :  { %3639 = vmatmul.mubr.msk.bf16.vlgmr.msra.gmra.mrb[72].mxu1 %vm187_vm3, %v2684_v55 }
0x4156   :  { %3651 = vmatpush3.bf16.msra.mxu1 %v4604_v43  ;;  %3654 = vmatprep.mubr.msk.bf16.mxu1 %vm3902_vm2, %v3901_v10 }
0x4157   :  { %3652 = vmatprep.subr.bf16.mxu1 %v3901_v10 }
0x415a   :  { %3653 = vmatpush3.bf16.msra.mxu1 %v4611_v2 }
0x415b   :  { %3666 = vmatprep.subr.bf16.mxu1 %v3901_v10 }
0x4228   :  { %v2722_v7 = vpop.f32.mrb[72].mxu1 }
0x4229   :  { %v2735_v1 = vadd.f32 %v2722_v7, %v4633_v15  ;;  %v3640_v9 = vpop.f32.mrb[73].mxu1  ;;  %v2728_v18 = vadd.f32 %v2722_v7, %v2407_v29 }
0x422a   :  { %v2725_v12 = vpop.f32.mrb[74].mxu1 }
0x422b   :  { %2737 = vrot.lane.b32.xlu1 %v2735_v1, %s3903_s22  ;;  %v3641_v11 = vpop.f32.mrb[75].mxu1  ;;  %v3285_v13 = vmul.f32 -1.442695, %v2728_v18 }
0x422d   :  { %3871 = vpow2.f32 %v3285_v13 }
0x4237   :  { %v3872_v35 = vpop.eup %3871 }
0x4238   :  { %v2732_v34 = vadd.f32 1.0, %v3872_v35 }
0x423a   :  { %3873 = vrcp.f32 %v2732_v34 }
0x4244   :  { %v3874_v54 = vpop.eup %3873 }
0x4245   :  { %v2747_v56 = vsub.f32 1.0, %v3874_v54  ;;  %v2753_v24 = vmul.f32 %v3874_v54, %v4719_v42 }
0x429d   :  { %v2738_v20 = vpop.permute.xlu1 %2737 }
0x429e   :  { %v2740_v14 = vmul.f32 %v3874_v54, %v2738_v20 }
0x42a0   :  { %2742 = vrot.lane.b32.xlu0 %v2740_v14, %s3903_s22 }
0x4312   :  { %v2743_v0 = vpop.permute.xlu0 %2742 }
0x4313   :  { %v2745_v19 = vadd.f32 %v2743_v0, %v2407_v29 }
0x4315   :  { %3875 = vtanh.f32 %v2745_v19 }
0x431f   :  { %v3876_v26 = vpop.eup %3875 }
0x4320   :  { %2749 = vrot.lane.b32.xlu1 %v3876_v26, %s3905_s3 }
0x4392   :  { %v2750_v49 = vpop.permute.xlu1 %2749 }
0x4393   :  { %v2752_v25 = vmul.f32 %v2750_v49, %v2747_v56  ;;  %v2420_v49 = vadd.f32 %v4704_v41, %v4646_v47 }
0x4395   :  { %v4738_v31 = vadd.f32 %v2753_v24, %v2752_v25 }
0x4397   :  { %v2760_v27 = vpack.c.bf16 %v4738_v31, %v4738_v31 }
0x4399   :  { %2762 = vrot.lane.b32.xlu0 %v2760_v27, %s3905_s3 }
0x440b   :  { %v2763_v61 = vpop.permute.xlu0 %2762 }
0x440c   :  { %3647 = vmatmul.mubr.msk.bf16.vlgmr.msra.gmra.mrb[68].mxu0 %vm187_vm3, %v2763_v61 }
0x440d   :  { %3659 = vmatpush3.bf16.msra.mxu0 %v4604_v43  ;;  %3662 = vmatprep.mubr.msk.bf16.mxu0 %vm3902_vm2, %v3901_v10 }
0x440e   :  { %3660 = vmatprep.subr.bf16.mxu0 %v3901_v10 }
0x4411   :  { %3661 = vmatpush3.bf16.msra.mxu0 %v4611_v2 }
0x44df   :  { %v2801_v38 = vpop.f32.mrb[68].mxu0 }
0x44e0   :  { %v2814_v5 = vadd.f32 %v2801_v38, %v4633_v15  ;;  %v3648_v33 = vpop.f32.mrb[69].mxu0  ;;  %v2807_v37 = vadd.f32 %v2801_v38, %v2412_v23 }
0x44e1   :  { %v2804_v36 = vpop.f32.mrb[70].mxu0 }
0x44e2   :  { %2816 = vrot.lane.b32.xlu1 %v2814_v5, %s3903_s22  ;;  %v3649_v39 = vpop.f32.mrb[71].mxu0  ;;  %v3287_v8 = vmul.f32 -1.442695, %v2807_v37 }
0x44e4   :  { %3877 = vpow2.f32 %v3287_v8 }
0x44ee   :  { %v3878_v46 = vpop.eup %3877 }
0x44ef   :  { %v2811_v48 = vadd.f32 1.0, %v3878_v46 }
0x44f1   :  { %3879 = vrcp.f32 %v2811_v48 }
0x44fb   :  { %v3880_v28 = vpop.eup %3879 }
0x44fc   :  { %v2826_v60 = vsub.f32 1.0, %v3880_v28  ;;  %v2832_v45 = vmul.f32 %v3880_v28, %v4738_v31 }
0x4554   :  { %v2817_v50 = vpop.permute.xlu1 %2816 }
0x4555   :  { %v2819_v17 = vmul.f32 %v3880_v28, %v2817_v50 }
0x4557   :  { %2821 = vrot.lane.b32.xlu0 %v2819_v17, %s3903_s22 }
0x45c9   :  { %v2822_v52 = vpop.permute.xlu0 %2821 }
0x45ca   :  { %v2824_v59 = vadd.f32 %v2822_v52, %v2412_v23 }
0x45cc   :  { %3881 = vtanh.f32 %v2824_v59 }
0x45d6   :  { %v3882_v16 = vpop.eup %3881 }
0x45d7   :  { %2828 = vrot.lane.b32.xlu1 %v3882_v16, %s3905_s3 }
0x4649   :  { %v2829_v40 = vpop.permute.xlu1 %2828 }
0x464a   :  { %v2831_v21 = vmul.f32 %v2829_v40, %v2826_v60  ;;  %v2423_v40 = vadd.f32 %v4708_v32, %v4646_v47 }
0x464c   :  { %v4756_v30 = vadd.f32 %v2832_v45, %v2831_v21 }
0x464e   :  { %v2839_v62 = vpack.c.bf16 %v4756_v30, %v4756_v30 }
0x4650   :  { %2841 = vrot.lane.b32.xlu0 %v2839_v62, %s3905_s3 }
0x46c2   :  { %v2842_v63 = vpop.permute.xlu0 %2841 }
0x46c3   :  { %3655 = vmatmul.mubr.msk.bf16.vlgmr.msra.gmra.mrb[76].mxu1 %vm187_vm3, %v2842_v63 }
0x46c4   :  { %3667 = vmatpush3.bf16.msra.mxu1 %v4604_v43  ;;  %3670 = vmatprep.mubr.msk.bf16.mxu1 %vm3902_vm2, %v3901_v10 }
0x46c5   :  { %3668 = vmatprep.subr.bf16.mxu1 %v3901_v10 }
0x46c8   :  { %3669 = vmatpush3.bf16.msra.mxu1 %v4611_v2 }
0x4796   :  { %v2880_v4 = vpop.f32.mrb[76].mxu1 }
0x4797   :  { %v2893_v3 = vadd.f32 %v2880_v4, %v4633_v15  ;;  %v3656_v53 = vpop.f32.mrb[77].mxu1  ;;  %v2886_v55 = vadd.f32 %v2880_v4, %v2415_v51 }
0x4798   :  { %v2883_v22 = vpop.f32.mrb[78].mxu1 }
0x4799   :  { %2895 = vrot.lane.b32.xlu1 %v2893_v3, %s3903_s22  ;;  %v3657_v6 = vpop.f32.mrb[79].mxu1  ;;  %v3289_v43 = vmul.f32 -1.442695, %v2886_v55 }
0x479b   :  { %3883 = vpow2.f32 %v3289_v43 }
0x47a5   :  { %v3884_v7 = vpop.eup %3883 }
0x47a6   :  { %v2890_v1 = vadd.f32 1.0, %v3884_v7 }
0x47a8   :  { %3885 = vrcp.f32 %v2890_v1 }
0x47b2   :  { %v3886_v10 = vpop.eup %3885 }
0x47b3   :  { %v2905_v18 = vsub.f32 1.0, %v3886_v10  ;;  %v2911_v44 = vmul.f32 %v3886_v10, %v4756_v30 }
0x480b   :  { %v2896_v9 = vpop.permute.xlu1 %2895 }
0x480c   :  { %v2898_v2 = vmul.f32 %v3886_v10, %v2896_v9 }
0x480e   :  { %2900 = vrot.lane.b32.xlu0 %v2898_v2, %s3903_s22 }
0x4880   :  { %v2901_v12 = vpop.permute.xlu0 %2900 }
0x4881   :  { %v2903_v11 = vadd.f32 %v2901_v12, %v2415_v51 }
0x4883   :  { %3887 = vtanh.f32 %v2903_v11 }
0x488d   :  { %v3888_v29 = vpop.eup %3887 }
0x488e   :  { %2907 = vrot.lane.b32.xlu1 %v3888_v29, %s3905_s3 }
0x4900   :  { %v2908_v13 = vpop.permute.xlu1 %2907 }
0x4901   :  { %v2910_v35 = vmul.f32 %v2908_v13, %v2905_v18 }
0x4903   :  { %v4774_v34 = vadd.f32 %v2911_v44, %v2910_v35 }
0x4905   :  { %v2918_v54 = vpack.c.bf16 %v4774_v34, %v4774_v34 }
0x4907   :  { %2920 = vrot.lane.b32.xlu0 %v2918_v54, %s3905_s3 }
0x4979   :  { %v2921_v20 = vpop.permute.xlu0 %2920 }
0x497a   :  { %3663 = vmatmul.mubr.msk.bf16.vlgmr.msra.gmra.mrb[72].mxu0 %vm187_vm3, %v2921_v20 }
0x4a4d   :  { %v2959_v14 = vpop.f32.mrb[72].mxu0 }
0x4a4e   :  { %v2972_v0 = vadd.f32 %v2959_v14, %v4633_v15  ;;  %v3664_v19 = vpop.f32.mrb[73].mxu0  ;;  %v2965_v24 = vadd.f32 %v2959_v14, %v2420_v49 }
0x4a4f   :  { %v2962_v26 = vpop.f32.mrb[74].mxu0  ;;  %v3294_v19 = vld [vmem:[%s4880_s18] ss:$0 sm:$0xff] }
0x4a50   :  { %2974 = vrot.lane.b32.xlu1 %v2972_v0, %s3903_s22  ;;  %v3665_v56 = vpop.f32.mrb[75].mxu0  ;;  %v3291_v25 = vmul.f32 -1.442695, %v2965_v24 }
0x4a52   :  { %3889 = vpow2.f32 %v3291_v25 }
0x4a5c   :  { %v3890_v27 = vpop.eup %3889 }
0x4a5d   :  { %v2969_v61 = vadd.f32 1.0, %v3890_v27 }
0x4a5f   :  { %3891 = vrcp.f32 %v2969_v61 }
0x4a69   :  { %v3892_v38 = vpop.eup %3891 }
0x4a6a   :  { %v2984_v37 = vsub.f32 1.0, %v3892_v38  ;;  %v2990_v41 = vmul.f32 %v3892_v38, %v4774_v34 }
0x4ac2   :  { %v2975_v5 = vpop.permute.xlu1 %2974 }
0x4ac3   :  { %v2977_v33 = vmul.f32 %v3892_v38, %v2975_v5 }
0x4ac5   :  { %2979 = vrot.lane.b32.xlu0 %v2977_v33, %s3903_s22 }
0x4b37   :  { %v2980_v36 = vpop.permute.xlu0 %2979 }
0x4b38   :  { %v2982_v39 = vadd.f32 %v2980_v36, %v2420_v49 }
0x4b3a   :  { %3893 = vtanh.f32 %v2982_v39 }
0x4b44   :  { %v3894_v23 = vpop.eup %3893 }
0x4b45   :  { %2986 = vrot.lane.b32.xlu1 %v3894_v23, %s3905_s3 }
0x4bb7   :  { %v2987_v8 = vpop.permute.xlu1 %2986 }
0x4bb8   :  { %v2989_v46 = vmul.f32 %v2987_v8, %v2984_v37 }
0x4bba   :  { %v2991_v48 = vadd.f32 %v2990_v41, %v2989_v46 }
0x4bbc   :  { %v2997_v28 = vpack.c.bf16 %v2991_v48, %v2991_v48 }
0x4bbe   :  { %2999 = vrot.lane.b32.xlu0 %v2997_v28, %s3905_s3 }
0x4c30   :  { %v3000_v50 = vpop.permute.xlu0 %2999 }
0x4c31   :  { %3671 = vmatmul.mubr.msk.bf16.vlgmr.msra.gmra.mrb[80].mxu1 %vm187_vm3, %v3000_v50 }
0x4d04   :  { %v3038_v17 = vpop.f32.mrb[80].mxu1 }
0x4d05   :  { %v3051_v52 = vadd.f32 %v3038_v17, %v4633_v15  ;;  %v3672_v59 = vpop.f32.mrb[81].mxu1  ;;  %v3044_v45 = vadd.f32 %v3038_v17, %v2423_v40 }
0x4d06   :  { %v3041_v16 = vpop.f32.mrb[82].mxu1 }
0x4d07   :  { %3053 = vrot.lane.b32.xlu1 %v3051_v52, %s3903_s22  ;;  %v3673_v60 = vpop.f32.mrb[83].mxu1  ;;  %v3293_v21 = vmul.f32 -1.442695, %v3044_v45 }
0x4d09   :  { %3895 = vpow2.f32 %v3293_v21 }
0x4d13   :  { %v3896_v62 = vpop.eup %3895 }
0x4d14   :  { %v3048_v63 = vadd.f32 1.0, %v3896_v62 }
0x4d16   :  { %3897 = vrcp.f32 %v3048_v63 }
0x4d20   :  { %v3898_v4 = vpop.eup %3897 }
0x4d21   :  { %v3063_v55 = vsub.f32 1.0, %v3898_v4  ;;  %v3069_v7 = vmul.f32 %v3898_v4, %v2991_v48 }
0x4d79   :  { %v3054_v3 = vpop.permute.xlu1 %3053 }
0x4d7a   :  { %v3056_v53 = vmul.f32 %v3898_v4, %v3054_v3 }
0x4d7c   :  { %3058 = vrot.lane.b32.xlu0 %v3056_v53, %s3903_s22 }
0x4d80   :  { %2519 = vrot.lane.b32.xlu0 %v4655_v57, %s3905_s3  ;;  %v3707_v57 = vld [vmem:[%s4879_s17] sm:$0xff]  }
0x4d81   :  { %3674 = vmatprep.subr.bf16.mxu0 %v3707_v57 }
0x4d82   :  { %3675 = vmatpush3.bf16.msra.mxu0 %v3707_v57 }
0x4d84   :  { %2677 = vrot.lane.b32.xlu0 %v4719_v42, %s3905_s3 }
0x4d88   :  { %2835 = vrot.lane.b32.xlu0 %v4756_v30, %s3905_s3  ;;  %v3708_v30 = vld [vmem:[%s4879_s17 + $0x8] sm:$0xff]  }
0x4d89   :  { %3676 = vmatprep.subr.bf16.mxu0 %v3708_v30 }
0x4d8a   :  { %3677 = vmatpush3.bf16.msra.mxu0 %v3708_v30 }
0x4d8c   :  { %2993 = vrot.lane.b32.xlu0 %v2991_v48, %s3905_s3 }
0x4dee   :  { %v3059_v15 = vpop.permute.xlu0 %3058 }
0x4def   :  { %v3061_v47 = vadd.f32 %v3059_v15, %v2423_v40 }
0x4df1   :  { %3899 = vtanh.f32 %v3061_v47 }
0x4df2   :  { %v2520_v32 = vpop.permute.xlu0 %2519 }
0x4df3   :  { %2522 = vst.msk [vmem:[#allocation5] sm:$0xff] %vm187_vm3, %v2520_v32 }
0x4df6   :  { %v2678_v22 = vpop.permute.xlu0 %2677 }
0x4df7   :  { %2680 = vst.msk [vmem:[#allocation5 + $0x10] sm:$0xff] %vm187_vm3, %v2678_v22 }
0x4dfa   :  { %v2836_v42 = vpop.permute.xlu0 %2835  ;;  %v3076_v12 = vld [vmem:[#allocation5] sm:$0xff] }
0x4dfb   :  { %v3900_v6 = vpop.eup %3899  ;;  %2838 = vst.msk [vmem:[#allocation5 + $0x20] sm:$0xff] %vm187_vm3, %v2836_v42 }
0x4dfc   :  { %3065 = vrot.lane.b32.xlu1 %v3900_v6, %s3905_s3 }
0x4dfe   :  { %v2994_v51 = vpop.permute.xlu0 %2993  ;;  %v3078_v29 = vld [vmem:[#allocation5 + $0x10] sm:$0xff] }
0x4dff   :  { %2996 = vst.msk [vmem:[#allocation5 + $0x30] sm:$0xff] %vm187_vm3, %v2994_v51 }
0x4e00   :  { %2598 = vrot.lane.b32.xlu1 %v4686_v58, %s3905_s3 }
0x4e02   :  { %v3080_v44 = vld [vmem:[#allocation5 + $0x20] sm:$0xff] }
0x4e04   :  { %2756 = vrot.lane.b32.xlu1 %v4738_v31, %s3905_s3 }
0x4e06   :  { %v3082_v20 = vld [vmem:[#allocation5 + $0x30] sm:$0xff] }
0x4e08   :  { %2914 = vrot.lane.b32.xlu1 %v4774_v34, %s3905_s3 }
0x4e6e   :  { %v3066_v43 = vpop.permute.xlu1 %3065 }
0x4e6f   :  { %v3068_v1 = vmul.f32 %v3066_v43, %v3063_v55 }
0x4e71   :  { %v3070_v10 = vadd.f32 %v3069_v7, %v3068_v1 }
0x4e72   :  { %v2599_v9 = vpop.permute.xlu1 %2598 }
0x4e73   :  { %2601 = vst.msk [vmem:[#allocation5 + $0x8] sm:$0xff] %vm187_vm3, %v2599_v9  ;;  %3072 = vrot.lane.b32.xlu1 %v3070_v10, %s3905_s3 }
0x4e76   :  { %v2757_v2 = vpop.permute.xlu1 %2756 }
0x4e77   :  { %2759 = vst.msk [vmem:[#allocation5 + $0x18] sm:$0xff] %vm187_vm3, %v2757_v2 }
0x4e7a   :  { %v2915_v58 = vpop.permute.xlu1 %2914  ;;  %v3077_v11 = vld [vmem:[#allocation5 + $0x8] sm:$0xff] }
0x4e7b   :  { %2917 = vst.msk [vmem:[#allocation5 + $0x28] sm:$0xff] %vm187_vm3, %v2915_v58  ;;  %v3084_v31 = vpack.c.bf16 %v3077_v11, %v3076_v12 }
0x4e7d   :  { %3678 = vmatprep.mubr.msk.bf16.mxu0 %vm187_vm3, %v3084_v31 }
0x4e7e   :  { %v3079_v18 = vld [vmem:[#allocation5 + $0x18] sm:$0xff] }
0x4e7f   :  { %v3085_v13 = vpack.c.bf16 %v3079_v18, %v3078_v29 }
0x4e81   :  { %3679 = vmatmul.mubr.msk.bf16.vlgmr.msra.gmra.mrb[76].mxu0 %vm187_vm3, %v3085_v13 }
0x4e82   :  { %v3081_v35 = vld [vmem:[#allocation5 + $0x28] sm:$0xff] }
0x4e83   :  { %v3086_v34 = vpack.c.bf16 %v3081_v35, %v3080_v44 }
0x4e85   :  { %3682 = vmatprep.mubr.msk.bf16.mxu0 %vm187_vm3, %v3086_v34 }
0x4ee5   :  { %v3073_v54 = vpop.permute.xlu1 %3072 }
0x4ee6   :  { %3075 = vst.msk [vmem:[#allocation5 + $0x38] sm:$0xff] %vm187_vm3, %v3073_v54 }
0x4eed   :  { %v3083_v14 = vld [vmem:[#allocation5 + $0x38] sm:$0xff] }
0x4eee   :  { %v3087_v0 = vpack.c.bf16 %v3083_v14, %v3082_v20 }
0x4ef0   :  { %3683 = vmatmul.mubr.msk.bf16.gmra.mrb[80].mxu0 %vm187_vm3, %v3087_v0 }
0x4f54   :  { %v3680_v26 = vpop.f32.mrb[76].mxu0 }
0x4f55   :  { %v3166_v56 = vadd.f32 %v3680_v26, %v3294_v19  ;;  %v3157_v49 = vpop.f32.mrb[77].mxu0 }
0x4f56   :  { %v3158_v24 = vadd.f32 %v3294_v19, %v3157_v49  ;;  %v3681_v25 = vpop.f32.mrb[78].mxu0 }
0x4f57   :  { %3190 = vst.msk [vmem:[%s4881_s19 + $0x10] sm:$0xff] %vm83_vm1, %v3166_v56  ;;  %v3169_v27 = vadd.f32 %v3681_v25, %v3294_v19  ;;  %v3160_v61 = vpop.f32.mrb[79].mxu0 }
0x4f58   :  { %3188 = vst.msk [vmem:[%s4881_s19] sm:$0xff] %vm83_vm1, %v3158_v24  ;;  %v3161_v38 = vadd.f32 %v3294_v19, %v3160_v61 }
0x4f59   :  { %3191 = vst.msk [vmem:[%s4881_s19 + $0x18] sm:$0xff] %vm83_vm1, %v3169_v27 }
0x4f5a   :  { %3189 = vst.msk [vmem:[%s4881_s19 + $0x8] sm:$0xff] %vm83_vm1, %v3161_v38 }
0x4fc3   :  { %v3684_v5 = vpop.f32.mrb[80].mxu0 }
0x4fc4   :  { %v3182_v33 = vadd.f32 %v3684_v5, %v3294_v19  ;;  %v3173_v36 = vpop.f32.mrb[81].mxu0 }
0x4fc5   :  { %v3174_v39 = vadd.f32 %v3294_v19, %v3173_v36  ;;  %v3685_v23 = vpop.f32.mrb[82].mxu0 }
0x4fc6   :  { %3194 = vst.msk [vmem:[%s4881_s19 + $0x30] sm:$0xff] %vm83_vm1, %v3182_v33  ;;  %v3185_v37 = vadd.f32 %v3685_v23, %v3294_v19  ;;  %v3176_v8 = vpop.f32.mrb[83].mxu0 }
0x4fc7   :  { %3192 = vst.msk [vmem:[%s4881_s19 + $0x20] sm:$0xff] %vm83_vm1, %v3174_v39  ;;  %v3177_v41 = vadd.f32 %v3294_v19, %v3176_v8 }
0x4fc8   :  { %3195 = vst.msk [vmem:[%s4881_s19 + $0x38] sm:$0xff] %vm83_vm1, %v3185_v37 }
0x4fc9   :  { %3193 = vst.msk [vmem:[%s4881_s19 + $0x28] sm:$0xff] %vm83_vm1, %v3177_v41 }

</bundles_post_ra>
